<compile_context>
chip_gen: v7x
topology: tpu7x:2x2x1
jax: 0.10.0
libtpu: 0.0.40
codegen_flags: <defaults>
</compile_context>

<pallas_src>
import numpy as np

import jax
import jax.numpy as jnp
from jax.experimental import pallas as pl
from jax.experimental.pallas import tpu as pltpu


# ----------------------------- model config ---------------------------------

CFG = [[64, 1, (2, 2, 2)], [128, 2, (2, 2, 2)], [256, 2, (2, 2, 2)],
       [512, 6, (2, 2, 2)], [1024, 2, (1, 1, 1)]]
STEM_STRIDE = (1, 2, 2)
BLOCK1_STRIDE = CFG[0][2]
K_PAD = 128          # stem im2col K (=81) padded once at init
CPAD = 128           # channel padding for the 1x1x1-spatial tail blocks

_VMEM_LIMIT = 16 * 1024 * 1024


def _conv_out(n, k, s, p):
    return (n + 2 * p - k) // s + 1


# ------------------------------- kernels ------------------------------------

def _stem_kernel(x_ref, w_ref, b_ref, o_ref):
    # x: (Kp, TM) bf16 im2col patches; w: (Cout, Kp) bf16, BN scale folded;
    # b: (Cout, 1) f32.  out = relu(w @ x + b), lane-dense over M.
    y = jnp.dot(w_ref[...], x_ref[...], preferred_element_type=jnp.float32)
    o_ref[...] = jnp.maximum(y + b_ref[...], 0.0).astype(o_ref.dtype)


def _tail_kernel(taps1_ref, wdw1_ref, b11_ref, wpw1_ref, b21_ref,
                 a2_ref, b12_ref, wp2_ref, b22_ref,
                 a3_ref, b13_ref, wp3_ref, b23_ref,
                 a4_ref, b14_ref, wp4_ref, b24_ref,
                 dv_ref, b1t_ref, wpt_ref, b2t_ref,
                 wcls_ref, bcls_ref, o_ref):
    f32 = jnp.float32

    # ---- block 1: depthwise 27-tap VPU loop + pointwise, (C, M=128) layout
    acc = taps1_ref[0].astype(f32) * wdw1_ref[0]
    for t in range(1, taps1_ref.shape[0]):
        acc = acc + taps1_ref[t].astype(f32) * wdw1_ref[t]
    h = jnp.maximum(acc + b11_ref[...], 0.0)                        # (4, 128)
    y1 = jnp.maximum(
        jnp.dot(wpw1_ref[...], h, preferred_element_type=f32) + b21_ref[...],
        0.0)                                                        # (8, 128)

    # ---- block 2: spatial 4^3 -> 2^3 (stride 2).  Depthwise as precomputed
    #      mixing tensor A2[(m_out, c, m_in)]: broadcast-multiply + lane
    #      reduce; result flips to channel-last (M, C) layout.
    t2 = jnp.sum(a2_ref[...] * y1[None, :, :], axis=-1)             # (16, 8)
    h = jnp.maximum(t2 + b12_ref[...], 0.0)
    h = jnp.maximum(
        jnp.dot(h, wp2_ref[...], preferred_element_type=f32) + b22_ref[...],
        0.0)                                                        # (16, 16)

    # ---- block 3: spatial 2^3 -> 2^3 (stride 1); A3[(m_in, m_out, c)] ----
    t3 = a3_ref[0] * h[0:1, :]
    for mi in range(1, a3_ref.shape[0]):
        t3 = t3 + a3_ref[mi] * h[mi:mi + 1, :]                      # (16, 16)
    h = jnp.maximum(t3 + b13_ref[...], 0.0)
    h = jnp.maximum(
        jnp.dot(h, wp3_ref[...], preferred_element_type=f32) + b23_ref[...],
        0.0)                                                        # (16, 16)

    # ---- block 4: spatial 2^3 -> 1^3 (stride 2); Cout padded to 128 ----
    t4 = a4_ref[0] * h[0:1, :]
    for mi in range(1, a4_ref.shape[0]):
        t4 = t4 + a4_ref[mi] * h[mi:mi + 1, :]                      # (2, 16)
    h = jnp.maximum(t4 + b14_ref[...], 0.0)
    h = jnp.maximum(
        jnp.dot(h, wp4_ref[...], preferred_element_type=f32) + b24_ref[...],
        0.0)                                                        # (2, 128)

    # ---- blocks 5..13: spatial 1x1x1 -> only the centre depthwise tap is
    #      real; channel-last, channels padded to 128 (lane-dense).
    for i in range(dv_ref.shape[0]):
        h = jnp.maximum(h * dv_ref[i] + b1t_ref[i], 0.0)
        h = jnp.maximum(
            jnp.dot(h, wpt_ref[i], preferred_element_type=f32) + b2t_ref[i],
            0.0)                                                    # (2, 128)

    # ---- AvgPool3d((1,1,1)) on a 1x1x1 volume == identity; flatten;
    #      Dropout (eval) == identity; Linear classifier.
    o_ref[...] = (jnp.dot(h, wcls_ref[...], preferred_element_type=f32)
                  + bcls_ref[...]).astype(o_ref.dtype)


# --------------------------- pallas_call wrappers ----------------------------

def _pick_m_tile(m):
    # Largest lane-aligned tile that still yields >= 2 grid steps (so both
    # v7x TensorCores get work); tiny M falls back to one full block.
    for t in (512, 256, 128):
        if m % t == 0 and m // t >= 2:
            return t
    return m


def stem_conv_bn_relu(patches, w, b):
    kp, m = patches.shape
    cout = w.shape[0]
    tm = _pick_m_tile(m)
    cost = pl.CostEstimate(
        flops=2 * m * kp * cout,
        transcendentals=0,
        bytes_accessed=patches.size * 2 + w.size * 2 + m * cout * 2
        + b.size * 4)
    return pl.pallas_call(
        _stem_kernel,
        out_shape=jax.ShapeDtypeStruct((cout, m), jnp.bfloat16),
        grid=(m // tm,),
        in_specs=[
            pl.BlockSpec((kp, tm), lambda i: (0, i)),
            pl.BlockSpec((cout, kp), lambda i: (0, 0)),
            pl.BlockSpec((cout, 1), lambda i: (0, 0)),
        ],
        out_specs=pl.BlockSpec((cout, tm), lambda i: (0, i)),
        compiler_params=pltpu.CompilerParams(
            dimension_semantics=("parallel",),
            vmem_limit_bytes=_VMEM_LIMIT),
        cost_estimate=cost,
    )(patches, w, b)


def fused_tail(taps1, params, n_batch):
    p1, p2, p3, p4 = (params['blk1'], params['blk2'], params['blk3'],
                      params['blk4'])
    pt, ph = params['tail9'], params['head']
    num_classes = ph['w'].shape[1]
    args = (taps1,
            p1['wdw'], p1['b1'], p1['wpw'], p1['b2'],
            p2['a'], p2['b1'], p2['wp'], p2['b2'],
            p3['a'], p3['b1'], p3['wp'], p3['b2'],
            p4['a'], p4['b1'], p4['wp'], p4['b2'],
            pt['dv'], pt['b1'], pt['wp'], pt['b2'],
            ph['w'], ph['b'])
    # No grid: every operand is a single whole-array VMEM block (~1.3 MiB
    # total), the kernel runs once per call.
    return pl.pallas_call(
        _tail_kernel,
        out_shape=jax.ShapeDtypeStruct((n_batch, num_classes), jnp.float32),
        compiler_params=pltpu.CompilerParams(vmem_limit_bytes=_VMEM_LIMIT),
    )(*args)


# ------------------------------ conv glue -----------------------------------

def _extract_taps(x, stride, k=3, p=1):
    # x: (C, N, D, H, W) -> 27 strided tap slices, each flattened to (C, M),
    # M = N*Do*Ho*Wo (n-major, then d, h, w).  Only used for the stem im2col
    # and block-1 taps; everything downstream is formed inside the fused
    # tail kernel.
    c, n, d, h, w = x.shape
    sd, sh, sw = stride
    do = _conv_out(d, k, sd, p)
    ho = _conv_out(h, k, sh, p)
    wo = _conv_out(w, k, sw, p)
    xp = jnp.pad(x, ((0, 0), (0, 0), (p, p), (p, p), (p, p)))
    taps = []
    for kd in range(k):
        for kh in range(k):
            for kw in range(k):
                t = xp[:, :,
                       kd:kd + sd * (do - 1) + 1:sd,
                       kh:kh + sh * (ho - 1) + 1:sh,
                       kw:kw + sw * (wo - 1) + 1:sw]
                taps.append(t.reshape(c, n * do * ho * wo))
    return taps, (n, do, ho, wo)


# ------------------------- parameter preparation -----------------------------

def _fold_bn(gamma, beta, mean, var, eps=1e-5):
    scale = gamma / np.sqrt(var + eps)
    bias = beta - mean * scale
    return scale.astype(np.float32), bias.astype(np.float32)


def _dw_to_27c(w_dw):
    # PyTorch depthwise Conv3d weight (C, 1, 3, 3, 3) -> (27, C),
    # tap index = (kd*3 + kh)*3 + kw (matches _extract_taps ordering).
    c = w_dw.shape[0]
    return np.transpose(w_dw, (2, 3, 4, 0, 1)).reshape(27, c)


def _build_dw_mix(wdw_27c, n, din, hin, win, stride):
    # Per-channel spatial mixing tensor for a tiny 3x3x3 depthwise conv:
    #   A[m_out, m_in, c] = sum_t wdw[t, c] * [input_index(t, m_out) == m_in]
    # Zero-padding taps simply never contribute (review: skip padding taps).
    sd, sh, sw = stride
    do = _conv_out(din, 3, sd, 1)
    ho = _conv_out(hin, 3, sh, 1)
    wo = _conv_out(win, 3, sw, 1)
    c = wdw_27c.shape[1]
    a = np.zeros((n * do * ho * wo, n * din * hin * win, c), np.float32)
    for b in range(n):
        for od in range(do):
            for oh in range(ho):
                for ow in range(wo):
                    mo = ((b * do + od) * ho + oh) * wo + ow
                    for kd in range(3):
                        di = od * sd - 1 + kd
                        if not 0 <= di < din:
                            continue
                        for kh in range(3):
                            hi = oh * sh - 1 + kh
                            if not 0 <= hi < hin:
                                continue
                            for kw in range(3):
                                wi = ow * sw - 1 + kw
                                if not 0 <= wi < win:
                                    continue
                                mi = ((b * din + di) * hin + hi) * win + wi
                                a[mo, mi, :] += wdw_27c[(kd * 3 + kh) * 3 + kw]
    return a


def _pad2(x, rows, cols):
    out = np.zeros((rows, cols), np.float32)
    out[:x.shape[0], :x.shape[1]] = x
    return out


def init_params(key, width_mult=0.125, num_classes=10, n_batch=2,
                n_frame=8, frame_size=16):
    input_channel = int(32 * width_mult)
    last_channel = int(1024 * width_mult)
    keys = iter(jax.random.split(key, 128))

    def rnd(shape):
        return np.asarray(0.1 * jax.random.normal(next(keys), shape,
                                                  jnp.float32))

    def bn(c):
        gamma = 1.0 + 0.1 * np.asarray(
            jax.random.normal(next(keys), (c,), jnp.float32))
        beta = 0.1 * np.asarray(
            jax.random.normal(next(keys), (c,), jnp.float32))
        return _fold_bn(gamma, beta, np.zeros((c,), np.float32),
                        np.ones((c,), np.float32))

    params = {}

    # ---- stem: Conv3d(3, C0, 3, stride=(1,2,2), pad=1) + BN + ReLU ----
    w_stem = rnd((input_channel, 3, 3, 3, 3))
    s, b = bn(input_channel)
    w = np.transpose(w_stem, (0, 2, 3, 4, 1)).reshape(input_channel, 81)
    w = w * s[:, None]                               # fold BN scale
    w = np.pad(w, ((0, 0), (0, K_PAD - 81)))
    params['stem'] = dict(w=jnp.asarray(w, jnp.bfloat16),
                          b=jnp.asarray(b.reshape(-1, 1), jnp.float32))

    # ---- expand block config (cin, cout, stride) ----
    blocks = []
    inp = input_channel
    for c, n, st in CFG:
        outp = int(c * width_mult)
        for i in range(n):
            blocks.append((inp, outp, st if i == 0 else (1, 1, 1)))
            inp = outp

    # spatial size entering each block
    d = _conv_out(n_frame, 3, STEM_STRIDE[0], 1)
    h = _conv_out(frame_size, 3, STEM_STRIDE[1], 1)
    wsp = _conv_out(frame_size, 3, STEM_STRIDE[2], 1)
    spatial = []
    for (_ci, _co, st) in blocks:
        spatial.append((d, h, wsp))
        d = _conv_out(d, 3, st[0], 1)
        h = _conv_out(h, 3, st[1], 1)
        wsp = _conv_out(wsp, 3, st[2], 1)

    raw = []
    for (ci, co, _st) in blocks:
        w_dw = rnd((ci, 1, 3, 3, 3))
        s1, b1 = bn(ci)
        w_pw = rnd((co, ci, 1, 1, 1))
        s2, b2 = bn(co)
        raw.append((w_dw, s1, b1, w_pw, s2, b2))

    def pw_mat(w_pw, s2, ci, co):
        return w_pw.reshape(co, ci).T * s2[None, :]   # (ci, co), BN folded

    # ---- block 1 (index 0): (C, M) layout, M = 128 lanes ----
    (w_dw, s1, b1, w_pw, s2, b2) = raw[0]
    ci, co, _st = blocks[0]
    wdw = (_dw_to_27c(w_dw) * s1[None, :]).reshape(27, ci, 1)
    params['blk1'] = dict(
        wdw=jnp.asarray(wdw, jnp.float32),
        b1=jnp.asarray(b1.reshape(ci, 1), jnp.float32),
        wpw=jnp.asarray(w_pw.reshape(co, ci) * s2[:, None], jnp.float32),
        b2=jnp.asarray(b2.reshape(co, 1), jnp.float32))

    # ---- blocks 2-4 (indices 1-3): tiny-spatial mixing tensors ----
    def mix_block(idx, layout, pad_out=None):
        (w_dw, s1, b1, w_pw, s2, b2) = raw[idx]
        ci, co, st = blocks[idx]
        din, hin, win = spatial[idx]
        a = _build_dw_mix(_dw_to_27c(w_dw) * s1[None, :],
                          n_batch, din, hin, win, st)
        a = np.transpose(a, layout)
        wp = pw_mat(w_pw, s2, ci, co)
        b2v = b2.reshape(1, co)
        if pad_out is not None:
            wp = _pad2(wp, ci, pad_out)
            b2v = _pad2(b2v, 1, pad_out)
        return dict(a=jnp.asarray(a, jnp.float32),
                    b1=jnp.asarray(b1.reshape(1, ci), jnp.float32),
                    wp=jnp.asarray(wp, jnp.float32),
                    b2=jnp.asarray(b2v, jnp.float32))

    params['blk2'] = mix_block(1, (0, 2, 1))                  # (M_out, C, M_in)
    params['blk3'] = mix_block(2, (1, 0, 2))                  # (M_in, M_out, C)
    params['blk4'] = mix_block(3, (1, 0, 2), pad_out=CPAD)

    # ---- blocks 5-13 (indices 4..): 1x1x1 spatial, channels padded to 128 ----
    dv_l, b1_l, wp_l, b2_l = [], [], [], []
    for idx in range(4, len(blocks)):
        (w_dw, s1, b1, w_pw, s2, b2) = raw[idx]
        ci, co, _st = blocks[idx]
        dv = (_dw_to_27c(w_dw)[13, :] * s1).reshape(1, ci)    # centre tap only
        dv_l.append(_pad2(dv, 1, CPAD))
        b1_l.append(_pad2(b1.reshape(1, ci), 1, CPAD))
        wp_l.append(_pad2(pw_mat(w_pw, s2, ci, co), CPAD, CPAD))
        b2_l.append(_pad2(b2.reshape(1, co), 1, CPAD))
    params['tail9'] = dict(dv=jnp.asarray(np.stack(dv_l), jnp.float32),
                           b1=jnp.asarray(np.stack(b1_l), jnp.float32),
                           wp=jnp.asarray(np.stack(wp_l), jnp.float32),
                           b2=jnp.asarray(np.stack(b2_l), jnp.float32))

    # ---- head: AvgPool3d((1,1,1)) == identity, Dropout(eval) == identity ----
    w_cls = rnd((num_classes, last_channel))
    b_cls = rnd((num_classes,))
    params['head'] = dict(w=jnp.asarray(w_cls.T, jnp.float32),
                          b=jnp.asarray(b_cls.reshape(1, -1), jnp.float32))
    return params


# -------------------------------- forward -----------------------------------

def make_forward():
    def forward(params, x_ncdhw):
        # QuantStub / DeQuantStub and Dropout are identity in eval mode.
        # NCDHW -> channels-first (C, N, D, H, W), bf16 activations.
        x = jnp.transpose(x_ncdhw, (1, 0, 2, 3, 4)).astype(jnp.bfloat16)

        # ---- stem: im2col (81 -> 128 K-pad) + fused conv/BN/ReLU kernel ----
        taps, (n, do, ho, wo) = _extract_taps(x, STEM_STRIDE)
        patches = jnp.stack(taps, axis=0).reshape(27 * 3, -1)     # (81, 1024)
        patches = jnp.pad(patches, ((0, K_PAD - 27 * 3), (0, 0)))
        y = stem_conv_bn_relu(patches, params['stem']['w'],
                              params['stem']['b'])                # (4, 1024)
        y = y.reshape(-1, n, do, ho, wo)                          # (4,2,8,8,8)

        # ---- block-1 depthwise taps: the only wrapper-side im2col left ----
        taps1, _ = _extract_taps(y, BLOCK1_STRIDE)
        taps1 = jnp.stack(taps1, axis=0)                          # (27,4,128)

        # ---- blocks 1..13 + avgpool + classifier: ONE fused VMEM kernel ----
        return fused_tail(taps1, params, n)

    return forward


# ---------------------------------- main -------------------------------------

if __name__ == "__main__":
    key = jax.random.PRNGKey(0)
    kp, kx = jax.random.split(key)

    # width_mult=0.125 -> channels 4/8/16/32/64/128, n_frame=8, frame_size=16,
    # pool kernel/width/height = 1, num_classes=10.
    params = init_params(kp, width_mult=0.125, num_classes=10, n_batch=2,
                         n_frame=8, frame_size=16)

    # PyTorch-style NCDHW input: (batch, 3, n_frame, frame_size, frame_size)
    x = jax.random.normal(kx, (2, 3, 8, 16, 16), jnp.float32)

    forward = jax.jit(make_forward())
    out = jax.block_until_ready(forward(params, x))
    assert out.shape == (2, 10) and out.dtype == jnp.float32
    print("KERNEL_OK")
</pallas_src>

<mosaic_0001>
module attributes {stable_mosaic.version = 11 : i64} {
  func.func @_stem_kernel(%arg0: i32, %arg1: memref<128x512xbf16, #tpu.memory_space<vmem>>, %arg2: memref<4x128xbf16, #tpu.memory_space<vmem>>, %arg3: memref<4x1xf32, #tpu.memory_space<vmem>>, %arg4: memref<4x512xbf16, #tpu.memory_space<vmem>>) attributes {dimension_semantics = [#tpu.dimension_semantics<parallel>], iteration_bounds = array<i64: 2>, scalar_prefetch = 0 : i64, scratch_operands = 0 : i64, tpu.core_type = #tpu.core_type<tc>, window_params = [{transform_indices = @transform_0, window_bounds = array<i64: 128, 512>}, {pipeline_mode = #tpu.pipeline_mode<synchronous>, transform_indices = @transform_1, window_bounds = array<i64: 4, 128>}, {pipeline_mode = #tpu.pipeline_mode<synchronous>, transform_indices = @transform_2, window_bounds = array<i64: 4, 1>}, {transform_indices = @transform_3, window_bounds = array<i64: 4, 512>}]} {
    %c0 = arith.constant 0 : index
    %c0_0 = arith.constant 0 : index
    %0 = vector.load %arg2[%c0, %c0_0] : memref<4x128xbf16, #tpu.memory_space<vmem>>, vector<4x128xbf16>
    %c0_1 = arith.constant 0 : index
    %c0_2 = arith.constant 0 : index
    %1 = vector.load %arg1[%c0_1, %c0_2] : memref<128x512xbf16, #tpu.memory_space<vmem>>, vector<128x512xbf16>
    %cst = arith.constant dense<0.000000e+00> : vector<4x512xf32>
    %2 = tpu.matmul %0, %1, %cst {dimension_numbers = #tpu.dot_dimension_numbers<[1], [0], [0], [1], [0, 0, 1, 1], [], []>} : vector<4x128xbf16>, vector<128x512xbf16>, vector<4x512xf32> -> vector<4x512xf32>
    %c0_3 = arith.constant 0 : index
    %c0_4 = arith.constant 0 : index
    %3 = vector.load %arg3[%c0_3, %c0_4] : memref<4x1xf32, #tpu.memory_space<vmem>>, vector<4x1xf32>
    %4 = vector.broadcast %3 : vector<4x1xf32> to vector<4x512xf32>
    %5 = arith.addf %2, %4 : vector<4x512xf32>
    %cst_5 = arith.constant 0.000000e+00 : f32
    %6 = vector.broadcast %cst_5 : f32 to vector<4x512xf32>
    %7 = arith.maximumf %5, %6 : vector<4x512xf32>
    %8 = arith.truncf %7 : vector<4x512xf32> to vector<4x512xbf16>
    %c0_6 = arith.constant 0 : index
    %c0_7 = arith.constant 0 : index
    %9 = vector.load %arg4[%c0_6, %c0_7] : memref<4x512xbf16, #tpu.memory_space<vmem>>, vector<4x512xbf16>
    tpu.vector_store %arg4[%c0_6, %c0_7], %8 {strides = array<i32>} : memref<4x512xbf16, #tpu.memory_space<vmem>>, vector<4x512xbf16>,
    return
  }
  func.func @transform_0(%arg0: i32) -> (i32, i32) {
    %c0_i32 = arith.constant 0 : i32
    %c0_i32_0 = arith.constant 0 : i32
    return %c0_i32, %arg0 : i32, i32
  }
  func.func @transform_1(%arg0: i32) -> (i32, i32) {
    %c0_i32 = arith.constant 0 : i32
    %c0_i32_0 = arith.constant 0 : i32
    %c0_i32_1 = arith.constant 0 : i32
    return %c0_i32, %c0_i32_0 : i32, i32
  }
  func.func @transform_2(%arg0: i32) -> (i32, i32) {
    %c0_i32 = arith.constant 0 : i32
    %c0_i32_0 = arith.constant 0 : i32
    %c0_i32_1 = arith.constant 0 : i32
    return %c0_i32, %c0_i32_0 : i32, i32
  }
  func.func @transform_3(%arg0: i32) -> (i32, i32) {
    %c0_i32 = arith.constant 0 : i32
    %c0_i32_0 = arith.constant 0 : i32
    return %c0_i32, %arg0 : i32, i32
  }
}

module attributes {stable_mosaic.version = 11 : i64} {
  func.func @_tail_kernel(%arg0: memref<27x4x128xbf16, #tpu.memory_space<vmem>>, %arg1: memref<27x4x1xf32, #tpu.memory_space<vmem>>, %arg2: memref<4x1xf32, #tpu.memory_space<vmem>>, %arg3: memref<8x4xf32, #tpu.memory_space<vmem>>, %arg4: memref<8x1xf32, #tpu.memory_space<vmem>>, %arg5: memref<16x8x128xf32, #tpu.memory_space<vmem>>, %arg6: memref<1x8xf32, #tpu.memory_space<vmem>>, %arg7: memref<8x16xf32, #tpu.memory_space<vmem>>, %arg8: memref<1x16xf32, #tpu.memory_space<vmem>>, %arg9: memref<16x16x16xf32, #tpu.memory_space<vmem>>, %arg10: memref<1x16xf32, #tpu.memory_space<vmem>>, %arg11: memref<16x16xf32, #tpu.memory_space<vmem>>, %arg12: memref<1x16xf32, #tpu.memory_space<vmem>>, %arg13: memref<16x2x16xf32, #tpu.memory_space<vmem>>, %arg14: memref<1x16xf32, #tpu.memory_space<vmem>>, %arg15: memref<16x128xf32, #tpu.memory_space<vmem>>, %arg16: memref<1x128xf32, #tpu.memory_space<vmem>>, %arg17: memref<9x1x128xf32, #tpu.memory_space<vmem>>, %arg18: memref<9x1x128xf32, #tpu.memory_space<vmem>>, %arg19: memref<9x128x128xf32, #tpu.memory_space<vmem>>, %arg20: memref<9x1x128xf32, #tpu.memory_space<vmem>>, %arg21: memref<128x10xf32, #tpu.memory_space<vmem>>, %arg22: memref<1x10xf32, #tpu.memory_space<vmem>>, %arg23: memref<2x10xf32, #tpu.memory_space<vmem>>) attributes {dimension_semantics = [], scalar_prefetch = 0 : i64, scratch_operands = 0 : i64, tpu.core_type = #tpu.core_type<tc>} {
    %c0 = arith.constant 0 : index
    %c0_0 = arith.constant 0 : index
    %c0_1 = arith.constant 0 : index
    %0 = vector.load %arg0[%c0, %c0_0, %c0_1] : memref<27x4x128xbf16, #tpu.memory_space<vmem>>, vector<1x4x128xbf16>
    %1 = vector.shape_cast %0 : vector<1x4x128xbf16> to vector<4x128xbf16>
    %2 = arith.extf %1 : vector<4x128xbf16> to vector<4x128xf32>
    %c0_2 = arith.constant 0 : index
    %c0_3 = arith.constant 0 : index
    %c0_4 = arith.constant 0 : index
    %3 = vector.load %arg1[%c0_2, %c0_3, %c0_4] : memref<27x4x1xf32, #tpu.memory_space<vmem>>, vector<1x4x1xf32>
    %4 = vector.shape_cast %3 : vector<1x4x1xf32> to vector<4x1xf32>
    %5 = vector.broadcast %4 : vector<4x1xf32> to vector<4x128xf32>
    %6 = arith.mulf %2, %5 : vector<4x128xf32>
    %c1 = arith.constant 1 : index
    %c0_5 = arith.constant 0 : index
    %c0_6 = arith.constant 0 : index
    %7 = vector.load %arg0[%c1, %c0_5, %c0_6] : memref<27x4x128xbf16, #tpu.memory_space<vmem>>, vector<1x4x128xbf16>
    %8 = vector.shape_cast %7 : vector<1x4x128xbf16> to vector<4x128xbf16>
    %9 = arith.extf %8 : vector<4x128xbf16> to vector<4x128xf32>
    %c1_7 = arith.constant 1 : index
    %c0_8 = arith.constant 0 : index
    %c0_9 = arith.constant 0 : index
    %10 = vector.load %arg1[%c1_7, %c0_8, %c0_9] : memref<27x4x1xf32, #tpu.memory_space<vmem>>, vector<1x4x1xf32>
    %11 = vector.shape_cast %10 : vector<1x4x1xf32> to vector<4x1xf32>
    %12 = vector.broadcast %11 : vector<4x1xf32> to vector<4x128xf32>
    %13 = arith.mulf %9, %12 : vector<4x128xf32>
    %14 = arith.addf %6, %13 : vector<4x128xf32>
    %c2 = arith.constant 2 : index
    %c0_10 = arith.constant 0 : index
    %c0_11 = arith.constant 0 : index
    %15 = vector.load %arg0[%c2, %c0_10, %c0_11] : memref<27x4x128xbf16, #tpu.memory_space<vmem>>, vector<1x4x128xbf16>
    %16 = vector.shape_cast %15 : vector<1x4x128xbf16> to vector<4x128xbf16>
    %17 = arith.extf %16 : vector<4x128xbf16> to vector<4x128xf32>
    %c2_12 = arith.constant 2 : index
    %c0_13 = arith.constant 0 : index
    %c0_14 = arith.constant 0 : index
    %18 = vector.load %arg1[%c2_12, %c0_13, %c0_14] : memref<27x4x1xf32, #tpu.memory_space<vmem>>, vector<1x4x1xf32>
    %19 = vector.shape_cast %18 : vector<1x4x1xf32> to vector<4x1xf32>
    %20 = vector.broadcast %19 : vector<4x1xf32> to vector<4x128xf32>
    %21 = arith.mulf %17, %20 : vector<4x128xf32>
    %22 = arith.addf %14, %21 : vector<4x128xf32>
    %c3 = arith.constant 3 : index
    %c0_15 = arith.constant 0 : index
    %c0_16 = arith.constant 0 : index
    %23 = vector.load %arg0[%c3, %c0_15, %c0_16] : memref<27x4x128xbf16, #tpu.memory_space<vmem>>, vector<1x4x128xbf16>
    %24 = vector.shape_cast %23 : vector<1x4x128xbf16> to vector<4x128xbf16>
    %25 = arith.extf %24 : vector<4x128xbf16> to vector<4x128xf32>
    %c3_17 = arith.constant 3 : index
    %c0_18 = arith.constant 0 : index
    %c0_19 = arith.constant 0 : index
    %26 = vector.load %arg1[%c3_17, %c0_18, %c0_19] : memref<27x4x1xf32, #tpu.memory_space<vmem>>, vector<1x4x1xf32>
    %27 = vector.shape_cast %26 : vector<1x4x1xf32> to vector<4x1xf32>
    %28 = vector.broadcast %27 : vector<4x1xf32> to vector<4x128xf32>
    %29 = arith.mulf %25, %28 : vector<4x128xf32>
    %30 = arith.addf %22, %29 : vector<4x128xf32>
    %c4 = arith.constant 4 : index
    %c0_20 = arith.constant 0 : index
    %c0_21 = arith.constant 0 : index
    %31 = vector.load %arg0[%c4, %c0_20, %c0_21] : memref<27x4x128xbf16, #tpu.memory_space<vmem>>, vector<1x4x128xbf16>
    %32 = vector.shape_cast %31 : vector<1x4x128xbf16> to vector<4x128xbf16>
    %33 = arith.extf %32 : vector<4x128xbf16> to vector<4x128xf32>
    %c4_22 = arith.constant 4 : index
    %c0_23 = arith.constant 0 : index
    %c0_24 = arith.constant 0 : index
    %34 = vector.load %arg1[%c4_22, %c0_23, %c0_24] : memref<27x4x1xf32, #tpu.memory_space<vmem>>, vector<1x4x1xf32>
    %35 = vector.shape_cast %34 : vector<1x4x1xf32> to vector<4x1xf32>
    %36 = vector.broadcast %35 : vector<4x1xf32> to vector<4x128xf32>
    %37 = arith.mulf %33, %36 : vector<4x128xf32>
    %38 = arith.addf %30, %37 : vector<4x128xf32>
    %c5 = arith.constant 5 : index
    %c0_25 = arith.constant 0 : index
    %c0_26 = arith.constant 0 : index
    %39 = vector.load %arg0[%c5, %c0_25, %c0_26] : memref<27x4x128xbf16, #tpu.memory_space<vmem>>, vector<1x4x128xbf16>
    %40 = vector.shape_cast %39 : vector<1x4x128xbf16> to vector<4x128xbf16>
    %41 = arith.extf %40 : vector<4x128xbf16> to vector<4x128xf32>
    %c5_27 = arith.constant 5 : index
    %c0_28 = arith.constant 0 : index
    %c0_29 = arith.constant 0 : index
    %42 = vector.load %arg1[%c5_27, %c0_28, %c0_29] : memref<27x4x1xf32, #tpu.memory_space<vmem>>, vector<1x4x1xf32>
    %43 = vector.shape_cast %42 : vector<1x4x1xf32> to vector<4x1xf32>
    %44 = vector.broadcast %43 : vector<4x1xf32> to vector<4x128xf32>
    %45 = arith.mulf %41, %44 : vector<4x128xf32>
    %46 = arith.addf %38, %45 : vector<4x128xf32>
    %c6 = arith.constant 6 : index
    %c0_30 = arith.constant 0 : index
    %c0_31 = arith.constant 0 : index
    %47 = vector.load %arg0[%c6, %c0_30, %c0_31] : memref<27x4x128xbf16, #tpu.memory_space<vmem>>, vector<1x4x128xbf16>
    %48 = vector.shape_cast %47 : vector<1x4x128xbf16> to vector<4x128xbf16>
    %49 = arith.extf %48 : vector<4x128xbf16> to vector<4x128xf32>
    %c6_32 = arith.constant 6 : index
    %c0_33 = arith.constant 0 : index
    %c0_34 = arith.constant 0 : index
    %50 = vector.load %arg1[%c6_32, %c0_33, %c0_34] : memref<27x4x1xf32, #tpu.memory_space<vmem>>, vector<1x4x1xf32>
    %51 = vector.shape_cast %50 : vector<1x4x1xf32> to vector<4x1xf32>
    %52 = vector.broadcast %51 : vector<4x1xf32> to vector<4x128xf32>
    %53 = arith.mulf %49, %52 : vector<4x128xf32>
    %54 = arith.addf %46, %53 : vector<4x128xf32>
    %c7 = arith.constant 7 : index
    %c0_35 = arith.constant 0 : index
    %c0_36 = arith.constant 0 : index
    %55 = vector.load %arg0[%c7, %c0_35, %c0_36] : memref<27x4x128xbf16, #tpu.memory_space<vmem>>, vector<1x4x128xbf16>
    %56 = vector.shape_cast %55 : vector<1x4x128xbf16> to vector<4x128xbf16>
    %57 = arith.extf %56 : vector<4x128xbf16> to vector<4x128xf32>
    %c7_37 = arith.constant 7 : index
    %c0_38 = arith.constant 0 : index
    %c0_39 = arith.constant 0 : index
    %58 = vector.load %arg1[%c7_37, %c0_38, %c0_39] : memref<27x4x1xf32, #tpu.memory_space<vmem>>, vector<1x4x1xf32>
    %59 = vector.shape_cast %58 : vector<1x4x1xf32> to vector<4x1xf32>
    %60 = vector.broadcast %59 : vector<4x1xf32> to vector<4x128xf32>
    %61 = arith.mulf %57, %60 : vector<4x128xf32>
    %62 = arith.addf %54, %61 : vector<4x128xf32>
    %c8 = arith.constant 8 : index
    %c0_40 = arith.constant 0 : index
    %c0_41 = arith.constant 0 : index
    %63 = vector.load %arg0[%c8, %c0_40, %c0_41] : memref<27x4x128xbf16, #tpu.memory_space<vmem>>, vector<1x4x128xbf16>
    %64 = vector.shape_cast %63 : vector<1x4x128xbf16> to vector<4x128xbf16>
    %65 = arith.extf %64 : vector<4x128xbf16> to vector<4x128xf32>
    %c8_42 = arith.constant 8 : index
    %c0_43 = arith.constant 0 : index
    %c0_44 = arith.constant 0 : index
    %66 = vector.load %arg1[%c8_42, %c0_43, %c0_44] : memref<27x4x1xf32, #tpu.memory_space<vmem>>, vector<1x4x1xf32>
    %67 = vector.shape_cast %66 : vector<1x4x1xf32> to vector<4x1xf32>
    %68 = vector.broadcast %67 : vector<4x1xf32> to vector<4x128xf32>
    %69 = arith.mulf %65, %68 : vector<4x128xf32>
    %70 = arith.addf %62, %69 : vector<4x128xf32>
    %c9 = arith.constant 9 : index
    %c0_45 = arith.constant 0 : index
    %c0_46 = arith.constant 0 : index
    %71 = vector.load %arg0[%c9, %c0_45, %c0_46] : memref<27x4x128xbf16, #tpu.memory_space<vmem>>, vector<1x4x128xbf16>
    %72 = vector.shape_cast %71 : vector<1x4x128xbf16> to vector<4x128xbf16>
    %73 = arith.extf %72 : vector<4x128xbf16> to vector<4x128xf32>
    %c9_47 = arith.constant 9 : index
    %c0_48 = arith.constant 0 : index
    %c0_49 = arith.constant 0 : index
    %74 = vector.load %arg1[%c9_47, %c0_48, %c0_49] : memref<27x4x1xf32, #tpu.memory_space<vmem>>, vector<1x4x1xf32>
    %75 = vector.shape_cast %74 : vector<1x4x1xf32> to vector<4x1xf32>
    %76 = vector.broadcast %75 : vector<4x1xf32> to vector<4x128xf32>
    %77 = arith.mulf %73, %76 : vector<4x128xf32>
    %78 = arith.addf %70, %77 : vector<4x128xf32>
    %c10 = arith.constant 10 : index
    %c0_50 = arith.constant 0 : index
    %c0_51 = arith.constant 0 : index
    %79 = vector.load %arg0[%c10, %c0_50, %c0_51] : memref<27x4x128xbf16, #tpu.memory_space<vmem>>, vector<1x4x128xbf16>
    %80 = vector.shape_cast %79 : vector<1x4x128xbf16> to vector<4x128xbf16>
    %81 = arith.extf %80 : vector<4x128xbf16> to vector<4x128xf32>
    %c10_52 = arith.constant 10 : index
    %c0_53 = arith.constant 0 : index
    %c0_54 = arith.constant 0 : index
    %82 = vector.load %arg1[%c10_52, %c0_53, %c0_54] : memref<27x4x1xf32, #tpu.memory_space<vmem>>, vector<1x4x1xf32>
    %83 = vector.shape_cast %82 : vector<1x4x1xf32> to vector<4x1xf32>
    %84 = vector.broadcast %83 : vector<4x1xf32> to vector<4x128xf32>
    %85 = arith.mulf %81, %84 : vector<4x128xf32>
    %86 = arith.addf %78, %85 : vector<4x128xf32>
    %c11 = arith.constant 11 : index
    %c0_55 = arith.constant 0 : index
    %c0_56 = arith.constant 0 : index
    %87 = vector.load %arg0[%c11, %c0_55, %c0_56] : memref<27x4x128xbf16, #tpu.memory_space<vmem>>, vector<1x4x128xbf16>
    %88 = vector.shape_cast %87 : vector<1x4x128xbf16> to vector<4x128xbf16>
    %89 = arith.extf %88 : vector<4x128xbf16> to vector<4x128xf32>
    %c11_57 = arith.constant 11 : index
    %c0_58 = arith.constant 0 : index
    %c0_59 = arith.constant 0 : index
    %90 = vector.load %arg1[%c11_57, %c0_58, %c0_59] : memref<27x4x1xf32, #tpu.memory_space<vmem>>, vector<1x4x1xf32>
    %91 = vector.shape_cast %90 : vector<1x4x1xf32> to vector<4x1xf32>
    %92 = vector.broadcast %91 : vector<4x1xf32> to vector<4x128xf32>
    %93 = arith.mulf %89, %92 : vector<4x128xf32>
    %94 = arith.addf %86, %93 : vector<4x128xf32>
    %c12 = arith.constant 12 : index
    %c0_60 = arith.constant 0 : index
    %c0_61 = arith.constant 0 : index
    %95 = vector.load %arg0[%c12, %c0_60, %c0_61] : memref<27x4x128xbf16, #tpu.memory_space<vmem>>, vector<1x4x128xbf16>
    %96 = vector.shape_cast %95 : vector<1x4x128xbf16> to vector<4x128xbf16>
    %97 = arith.extf %96 : vector<4x128xbf16> to vector<4x128xf32>
    %c12_62 = arith.constant 12 : index
    %c0_63 = arith.constant 0 : index
    %c0_64 = arith.constant 0 : index
    %98 = vector.load %arg1[%c12_62, %c0_63, %c0_64] : memref<27x4x1xf32, #tpu.memory_space<vmem>>, vector<1x4x1xf32>
    %99 = vector.shape_cast %98 : vector<1x4x1xf32> to vector<4x1xf32>
    %100 = vector.broadcast %99 : vector<4x1xf32> to vector<4x128xf32>
    %101 = arith.mulf %97, %100 : vector<4x128xf32>
    %102 = arith.addf %94, %101 : vector<4x128xf32>
    %c13 = arith.constant 13 : index
    %c0_65 = arith.constant 0 : index
    %c0_66 = arith.constant 0 : index
    %103 = vector.load %arg0[%c13, %c0_65, %c0_66] : memref<27x4x128xbf16, #tpu.memory_space<vmem>>, vector<1x4x128xbf16>
    %104 = vector.shape_cast %103 : vector<1x4x128xbf16> to vector<4x128xbf16>
    %105 = arith.extf %104 : vector<4x128xbf16> to vector<4x128xf32>
    %c13_67 = arith.constant 13 : index
    %c0_68 = arith.constant 0 : index
    %c0_69 = arith.constant 0 : index
    %106 = vector.load %arg1[%c13_67, %c0_68, %c0_69] : memref<27x4x1xf32, #tpu.memory_space<vmem>>, vector<1x4x1xf32>
    %107 = vector.shape_cast %106 : vector<1x4x1xf32> to vector<4x1xf32>
    %108 = vector.broadcast %107 : vector<4x1xf32> to vector<4x128xf32>
    %109 = arith.mulf %105, %108 : vector<4x128xf32>
    %110 = arith.addf %102, %109 : vector<4x128xf32>
    %c14 = arith.constant 14 : index
    %c0_70 = arith.constant 0 : index
    %c0_71 = arith.constant 0 : index
    %111 = vector.load %arg0[%c14, %c0_70, %c0_71] : memref<27x4x128xbf16, #tpu.memory_space<vmem>>, vector<1x4x128xbf16>
    %112 = vector.shape_cast %111 : vector<1x4x128xbf16> to vector<4x128xbf16>
    %113 = arith.extf %112 : vector<4x128xbf16> to vector<4x128xf32>
    %c14_72 = arith.constant 14 : index
    %c0_73 = arith.constant 0 : index
    %c0_74 = arith.constant 0 : index
    %114 = vector.load %arg1[%c14_72, %c0_73, %c0_74] : memref<27x4x1xf32, #tpu.memory_space<vmem>>, vector<1x4x1xf32>
    %115 = vector.shape_cast %114 : vector<1x4x1xf32> to vector<4x1xf32>
    %116 = vector.broadcast %115 : vector<4x1xf32> to vector<4x128xf32>
    %117 = arith.mulf %113, %116 : vector<4x128xf32>
    %118 = arith.addf %110, %117 : vector<4x128xf32>
    %c15 = arith.constant 15 : index
    %c0_75 = arith.constant 0 : index
    %c0_76 = arith.constant 0 : index
    %119 = vector.load %arg0[%c15, %c0_75, %c0_76] : memref<27x4x128xbf16, #tpu.memory_space<vmem>>, vector<1x4x128xbf16>
    %120 = vector.shape_cast %119 : vector<1x4x128xbf16> to vector<4x128xbf16>
    %121 = arith.extf %120 : vector<4x128xbf16> to vector<4x128xf32>
    %c15_77 = arith.constant 15 : index
    %c0_78 = arith.constant 0 : index
    %c0_79 = arith.constant 0 : index
    %122 = vector.load %arg1[%c15_77, %c0_78, %c0_79] : memref<27x4x1xf32, #tpu.memory_space<vmem>>, vector<1x4x1xf32>
    %123 = vector.shape_cast %122 : vector<1x4x1xf32> to vector<4x1xf32>
    %124 = vector.broadcast %123 : vector<4x1xf32> to vector<4x128xf32>
    %125 = arith.mulf %121, %124 : vector<4x128xf32>
    %126 = arith.addf %118, %125 : vector<4x128xf32>
    %c16 = arith.constant 16 : index
    %c0_80 = arith.constant 0 : index
    %c0_81 = arith.constant 0 : index
    %127 = vector.load %arg0[%c16, %c0_80, %c0_81] : memref<27x4x128xbf16, #tpu.memory_space<vmem>>, vector<1x4x128xbf16>
    %128 = vector.shape_cast %127 : vector<1x4x128xbf16> to vector<4x128xbf16>
    %129 = arith.extf %128 : vector<4x128xbf16> to vector<4x128xf32>
    %c16_82 = arith.constant 16 : index
    %c0_83 = arith.constant 0 : index
    %c0_84 = arith.constant 0 : index
    %130 = vector.load %arg1[%c16_82, %c0_83, %c0_84] : memref<27x4x1xf32, #tpu.memory_space<vmem>>, vector<1x4x1xf32>
    %131 = vector.shape_cast %130 : vector<1x4x1xf32> to vector<4x1xf32>
    %132 = vector.broadcast %131 : vector<4x1xf32> to vector<4x128xf32>
    %133 = arith.mulf %129, %132 : vector<4x128xf32>
    %134 = arith.addf %126, %133 : vector<4x128xf32>
    %c17 = arith.constant 17 : index
    %c0_85 = arith.constant 0 : index
    %c0_86 = arith.constant 0 : index
    %135 = vector.load %arg0[%c17, %c0_85, %c0_86] : memref<27x4x128xbf16, #tpu.memory_space<vmem>>, vector<1x4x128xbf16>
    %136 = vector.shape_cast %135 : vector<1x4x128xbf16> to vector<4x128xbf16>
    %137 = arith.extf %136 : vector<4x128xbf16> to vector<4x128xf32>
    %c17_87 = arith.constant 17 : index
    %c0_88 = arith.constant 0 : index
    %c0_89 = arith.constant 0 : index
    %138 = vector.load %arg1[%c17_87, %c0_88, %c0_89] : memref<27x4x1xf32, #tpu.memory_space<vmem>>, vector<1x4x1xf32>
    %139 = vector.shape_cast %138 : vector<1x4x1xf32> to vector<4x1xf32>
    %140 = vector.broadcast %139 : vector<4x1xf32> to vector<4x128xf32>
    %141 = arith.mulf %137, %140 : vector<4x128xf32>
    %142 = arith.addf %134, %141 : vector<4x128xf32>
    %c18 = arith.constant 18 : index
    %c0_90 = arith.constant 0 : index
    %c0_91 = arith.constant 0 : index
    %143 = vector.load %arg0[%c18, %c0_90, %c0_91] : memref<27x4x128xbf16, #tpu.memory_space<vmem>>, vector<1x4x128xbf16>
    %144 = vector.shape_cast %143 : vector<1x4x128xbf16> to vector<4x128xbf16>
    %145 = arith.extf %144 : vector<4x128xbf16> to vector<4x128xf32>
    %c18_92 = arith.constant 18 : index
    %c0_93 = arith.constant 0 : index
    %c0_94 = arith.constant 0 : index
    %146 = vector.load %arg1[%c18_92, %c0_93, %c0_94] : memref<27x4x1xf32, #tpu.memory_space<vmem>>, vector<1x4x1xf32>
    %147 = vector.shape_cast %146 : vector<1x4x1xf32> to vector<4x1xf32>
    %148 = vector.broadcast %147 : vector<4x1xf32> to vector<4x128xf32>
    %149 = arith.mulf %145, %148 : vector<4x128xf32>
    %150 = arith.addf %142, %149 : vector<4x128xf32>
    %c19 = arith.constant 19 : index
    %c0_95 = arith.constant 0 : index
    %c0_96 = arith.constant 0 : index
    %151 = vector.load %arg0[%c19, %c0_95, %c0_96] : memref<27x4x128xbf16, #tpu.memory_space<vmem>>, vector<1x4x128xbf16>
    %152 = vector.shape_cast %151 : vector<1x4x128xbf16> to vector<4x128xbf16>
    %153 = arith.extf %152 : vector<4x128xbf16> to vector<4x128xf32>
    %c19_97 = arith.constant 19 : index
    %c0_98 = arith.constant 0 : index
    %c0_99 = arith.constant 0 : index
    %154 = vector.load %arg1[%c19_97, %c0_98, %c0_99] : memref<27x4x1xf32, #tpu.memory_space<vmem>>, vector<1x4x1xf32>
    %155 = vector.shape_cast %154 : vector<1x4x1xf32> to vector<4x1xf32>
    %156 = vector.broadcast %155 : vector<4x1xf32> to vector<4x128xf32>
    %157 = arith.mulf %153, %156 : vector<4x128xf32>
    %158 = arith.addf %150, %157 : vector<4x128xf32>
    %c20 = arith.constant 20 : index
    %c0_100 = arith.constant 0 : index
    %c0_101 = arith.constant 0 : index
    %159 = vector.load %arg0[%c20, %c0_100, %c0_101] : memref<27x4x128xbf16, #tpu.memory_space<vmem>>, vector<1x4x128xbf16>
    %160 = vector.shape_cast %159 : vector<1x4x128xbf16> to vector<4x128xbf16>
    %161 = arith.extf %160 : vector<4x128xbf16> to vector<4x128xf32>
    %c20_102 = arith.constant 20 : index
    %c0_103 = arith.constant 0 : index
    %c0_104 = arith.constant 0 : index
    %162 = vector.load %arg1[%c20_102, %c0_103, %c0_104] : memref<27x4x1xf32, #tpu.memory_space<vmem>>, vector<1x4x1xf32>
    %163 = vector.shape_cast %162 : vector<1x4x1xf32> to vector<4x1xf32>
    %164 = vector.broadcast %163 : vector<4x1xf32> to vector<4x128xf32>
    %165 = arith.mulf %161, %164 : vector<4x128xf32>
    %166 = arith.addf %158, %165 : vector<4x128xf32>
    %c21 = arith.constant 21 : index
    %c0_105 = arith.constant 0 : index
    %c0_106 = arith.constant 0 : index
    %167 = vector.load %arg0[%c21, %c0_105, %c0_106] : memref<27x4x128xbf16, #tpu.memory_space<vmem>>, vector<1x4x128xbf16>
    %168 = vector.shape_cast %167 : vector<1x4x128xbf16> to vector<4x128xbf16>
    %169 = arith.extf %168 : vector<4x128xbf16> to vector<4x128xf32>
    %c21_107 = arith.constant 21 : index
    %c0_108 = arith.constant 0 : index
    %c0_109 = arith.constant 0 : index
    %170 = vector.load %arg1[%c21_107, %c0_108, %c0_109] : memref<27x4x1xf32, #tpu.memory_space<vmem>>, vector<1x4x1xf32>
    %171 = vector.shape_cast %170 : vector<1x4x1xf32> to vector<4x1xf32>
    %172 = vector.broadcast %171 : vector<4x1xf32> to vector<4x128xf32>
    %173 = arith.mulf %169, %172 : vector<4x128xf32>
    %174 = arith.addf %166, %173 : vector<4x128xf32>
    %c22 = arith.constant 22 : index
    %c0_110 = arith.constant 0 : index
    %c0_111 = arith.constant 0 : index
    %175 = vector.load %arg0[%c22, %c0_110, %c0_111] : memref<27x4x128xbf16, #tpu.memory_space<vmem>>, vector<1x4x128xbf16>
    %176 = vector.shape_cast %175 : vector<1x4x128xbf16> to vector<4x128xbf16>
    %177 = arith.extf %176 : vector<4x128xbf16> to vector<4x128xf32>
    %c22_112 = arith.constant 22 : index
    %c0_113 = arith.constant 0 : index
    %c0_114 = arith.constant 0 : index
    %178 = vector.load %arg1[%c22_112, %c0_113, %c0_114] : memref<27x4x1xf32, #tpu.memory_space<vmem>>, vector<1x4x1xf32>
    %179 = vector.shape_cast %178 : vector<1x4x1xf32> to vector<4x1xf32>
    %180 = vector.broadcast %179 : vector<4x1xf32> to vector<4x128xf32>
    %181 = arith.mulf %177, %180 : vector<4x128xf32>
    %182 = arith.addf %174, %181 : vector<4x128xf32>
    %c23 = arith.constant 23 : index
    %c0_115 = arith.constant 0 : index
    %c0_116 = arith.constant 0 : index
    %183 = vector.load %arg0[%c23, %c0_115, %c0_116] : memref<27x4x128xbf16, #tpu.memory_space<vmem>>, vector<1x4x128xbf16>
    %184 = vector.shape_cast %183 : vector<1x4x128xbf16> to vector<4x128xbf16>
    %185 = arith.extf %184 : vector<4x128xbf16> to vector<4x128xf32>
    %c23_117 = arith.constant 23 : index
    %c0_118 = arith.constant 0 : index
    %c0_119 = arith.constant 0 : index
    %186 = vector.load %arg1[%c23_117, %c0_118, %c0_119] : memref<27x4x1xf32, #tpu.memory_space<vmem>>, vector<1x4x1xf32>
    %187 = vector.shape_cast %186 : vector<1x4x1xf32> to vector<4x1xf32>
    %188 = vector.broadcast %187 : vector<4x1xf32> to vector<4x128xf32>
    %189 = arith.mulf %185, %188 : vector<4x128xf32>
    %190 = arith.addf %182, %189 : vector<4x128xf32>
    %c24 = arith.constant 24 : index
    %c0_120 = arith.constant 0 : index
    %c0_121 = arith.constant 0 : index
    %191 = vector.load %arg0[%c24, %c0_120, %c0_121] : memref<27x4x128xbf16, #tpu.memory_space<vmem>>, vector<1x4x128xbf16>
    %192 = vector.shape_cast %191 : vector<1x4x128xbf16> to vector<4x128xbf16>
    %193 = arith.extf %192 : vector<4x128xbf16> to vector<4x128xf32>
    %c24_122 = arith.constant 24 : index
    %c0_123 = arith.constant 0 : index
    %c0_124 = arith.constant 0 : index
    %194 = vector.load %arg1[%c24_122, %c0_123, %c0_124] : memref<27x4x1xf32, #tpu.memory_space<vmem>>, vector<1x4x1xf32>
    %195 = vector.shape_cast %194 : vector<1x4x1xf32> to vector<4x1xf32>
    %196 = vector.broadcast %195 : vector<4x1xf32> to vector<4x128xf32>
    %197 = arith.mulf %193, %196 : vector<4x128xf32>
    %198 = arith.addf %190, %197 : vector<4x128xf32>
    %c25 = arith.constant 25 : index
    %c0_125 = arith.constant 0 : index
    %c0_126 = arith.constant 0 : index
    %199 = vector.load %arg0[%c25, %c0_125, %c0_126] : memref<27x4x128xbf16, #tpu.memory_space<vmem>>, vector<1x4x128xbf16>
    %200 = vector.shape_cast %199 : vector<1x4x128xbf16> to vector<4x128xbf16>
    %201 = arith.extf %200 : vector<4x128xbf16> to vector<4x128xf32>
    %c25_127 = arith.constant 25 : index
    %c0_128 = arith.constant 0 : index
    %c0_129 = arith.constant 0 : index
    %202 = vector.load %arg1[%c25_127, %c0_128, %c0_129] : memref<27x4x1xf32, #tpu.memory_space<vmem>>, vector<1x4x1xf32>
    %203 = vector.shape_cast %202 : vector<1x4x1xf32> to vector<4x1xf32>
    %204 = vector.broadcast %203 : vector<4x1xf32> to vector<4x128xf32>
    %205 = arith.mulf %201, %204 : vector<4x128xf32>
    %206 = arith.addf %198, %205 : vector<4x128xf32>
    %c26 = arith.constant 26 : index
    %c0_130 = arith.constant 0 : index
    %c0_131 = arith.constant 0 : index
    %207 = vector.load %arg0[%c26, %c0_130, %c0_131] : memref<27x4x128xbf16, #tpu.memory_space<vmem>>, vector<1x4x128xbf16>
    %208 = vector.shape_cast %207 : vector<1x4x128xbf16> to vector<4x128xbf16>
    %209 = arith.extf %208 : vector<4x128xbf16> to vector<4x128xf32>
    %c26_132 = arith.constant 26 : index
    %c0_133 = arith.constant 0 : index
    %c0_134 = arith.constant 0 : index
    %210 = vector.load %arg1[%c26_132, %c0_133, %c0_134] : memref<27x4x1xf32, #tpu.memory_space<vmem>>, vector<1x4x1xf32>
    %211 = vector.shape_cast %210 : vector<1x4x1xf32> to vector<4x1xf32>
    %212 = vector.broadcast %211 : vector<4x1xf32> to vector<4x128xf32>
    %213 = arith.mulf %209, %212 : vector<4x128xf32>
    %214 = arith.addf %206, %213 : vector<4x128xf32>
    %c0_135 = arith.constant 0 : index
    %c0_136 = arith.constant 0 : index
    %215 = vector.load %arg2[%c0_135, %c0_136] : memref<4x1xf32, #tpu.memory_space<vmem>>, vector<4x1xf32>
    %216 = vector.broadcast %215 : vector<4x1xf32> to vector<4x128xf32>
    %217 = arith.addf %214, %216 : vector<4x128xf32>
    %cst = arith.constant 0.000000e+00 : f32
    %218 = vector.broadcast %cst : f32 to vector<4x128xf32>
    %219 = arith.maximumf %217, %218 : vector<4x128xf32>
    %c0_137 = arith.constant 0 : index
    %c0_138 = arith.constant 0 : index
    %220 = vector.load %arg3[%c0_137, %c0_138] : memref<8x4xf32, #tpu.memory_space<vmem>>, vector<8x4xf32>
    %cst_139 = arith.constant dense<0.000000e+00> : vector<8x128xf32>
    %221 = tpu.matmul %220, %219, %cst_139 {dimension_numbers = #tpu.dot_dimension_numbers<[1], [0], [0], [1], [0, 0, 1, 1], [], []>} : vector<8x4xf32>, vector<4x128xf32>, vector<8x128xf32> -> vector<8x128xf32>
    %c0_140 = arith.constant 0 : index
    %c0_141 = arith.constant 0 : index
    %222 = vector.load %arg4[%c0_140, %c0_141] : memref<8x1xf32, #tpu.memory_space<vmem>>, vector<8x1xf32>
    %223 = vector.broadcast %222 : vector<8x1xf32> to vector<8x128xf32>
    %224 = arith.addf %221, %223 : vector<8x128xf32>
    %cst_142 = arith.constant 0.000000e+00 : f32
    %225 = vector.broadcast %cst_142 : f32 to vector<8x128xf32>
    %226 = arith.maximumf %224, %225 : vector<8x128xf32>
    %c0_143 = arith.constant 0 : index
    %c0_144 = arith.constant 0 : index
    %c0_145 = arith.constant 0 : index
    %227 = vector.load %arg5[%c0_143, %c0_144, %c0_145] : memref<16x8x128xf32, #tpu.memory_space<vmem>>, vector<16x8x128xf32>
    %228 = vector.shape_cast %226 : vector<8x128xf32> to vector<1x8x128xf32>
    %229 = vector.broadcast %228 : vector<1x8x128xf32> to vector<16x8x128xf32>
    %230 = arith.mulf %227, %229 : vector<16x8x128xf32>
    %cst_146 = arith.constant dense<0.000000e+00> : vector<16x8xf32>
    %231 = vector.multi_reduction <add>, %230, %cst_146 [2] : vector<16x8x128xf32> to vector<16x8xf32>
    %c0_147 = arith.constant 0 : index
    %c0_148 = arith.constant 0 : index
    %232 = vector.load %arg6[%c0_147, %c0_148] : memref<1x8xf32, #tpu.memory_space<vmem>>, vector<1x8xf32>
    %233 = vector.broadcast %232 : vector<1x8xf32> to vector<16x8xf32>
    %234 = arith.addf %231, %233 : vector<16x8xf32>
    %cst_149 = arith.constant 0.000000e+00 : f32
    %235 = vector.broadcast %cst_149 : f32 to vector<16x8xf32>
    %236 = arith.maximumf %234, %235 : vector<16x8xf32>
    %c0_150 = arith.constant 0 : index
    %c0_151 = arith.constant 0 : index
    %237 = vector.load %arg7[%c0_150, %c0_151] : memref<8x16xf32, #tpu.memory_space<vmem>>, vector<8x16xf32>
    %cst_152 = arith.constant dense<0.000000e+00> : vector<16x16xf32>
    %238 = tpu.matmul %236, %237, %cst_152 {dimension_numbers = #tpu.dot_dimension_numbers<[1], [0], [0], [1], [0, 0, 1, 1], [], []>} : vector<16x8xf32>, vector<8x16xf32>, vector<16x16xf32> -> vector<16x16xf32>
    %c0_153 = arith.constant 0 : index
    %c0_154 = arith.constant 0 : index
    %239 = vector.load %arg8[%c0_153, %c0_154] : memref<1x16xf32, #tpu.memory_space<vmem>>, vector<1x16xf32>
    %240 = vector.broadcast %239 : vector<1x16xf32> to vector<16x16xf32>
    %241 = arith.addf %238, %240 : vector<16x16xf32>
    %cst_155 = arith.constant 0.000000e+00 : f32
    %242 = vector.broadcast %cst_155 : f32 to vector<16x16xf32>
    %243 = arith.maximumf %241, %242 : vector<16x16xf32>
    %c0_156 = arith.constant 0 : index
    %c0_157 = arith.constant 0 : index
    %c0_158 = arith.constant 0 : index
    %244 = vector.load %arg9[%c0_156, %c0_157, %c0_158] : memref<16x16x16xf32, #tpu.memory_space<vmem>>, vector<1x16x16xf32>
    %245 = vector.shape_cast %244 : vector<1x16x16xf32> to vector<16x16xf32>
    %246 = vector.extract_strided_slice %243 {offsets = [0, 0], sizes = [1, 16], strides = [1, 1]} : vector<16x16xf32> to vector<1x16xf32>
    %247 = vector.broadcast %246 : vector<1x16xf32> to vector<16x16xf32>
    %248 = arith.mulf %245, %247 : vector<16x16xf32>
    %c1_159 = arith.constant 1 : index
    %c0_160 = arith.constant 0 : index
    %c0_161 = arith.constant 0 : index
    %249 = vector.load %arg9[%c1_159, %c0_160, %c0_161] : memref<16x16x16xf32, #tpu.memory_space<vmem>>, vector<1x16x16xf32>
    %250 = vector.shape_cast %249 : vector<1x16x16xf32> to vector<16x16xf32>
    %251 = vector.extract_strided_slice %243 {offsets = [1, 0], sizes = [1, 16], strides = [1, 1]} : vector<16x16xf32> to vector<1x16xf32>
    %252 = vector.broadcast %251 : vector<1x16xf32> to vector<16x16xf32>
    %253 = arith.mulf %250, %252 : vector<16x16xf32>
    %254 = arith.addf %248, %253 : vector<16x16xf32>
    %c2_162 = arith.constant 2 : index
    %c0_163 = arith.constant 0 : index
    %c0_164 = arith.constant 0 : index
    %255 = vector.load %arg9[%c2_162, %c0_163, %c0_164] : memref<16x16x16xf32, #tpu.memory_space<vmem>>, vector<1x16x16xf32>
    %256 = vector.shape_cast %255 : vector<1x16x16xf32> to vector<16x16xf32>
    %257 = vector.extract_strided_slice %243 {offsets = [2, 0], sizes = [1, 16], strides = [1, 1]} : vector<16x16xf32> to vector<1x16xf32>
    %258 = vector.broadcast %257 : vector<1x16xf32> to vector<16x16xf32>
    %259 = arith.mulf %256, %258 : vector<16x16xf32>
    %260 = arith.addf %254, %259 : vector<16x16xf32>
    %c3_165 = arith.constant 3 : index
    %c0_166 = arith.constant 0 : index
    %c0_167 = arith.constant 0 : index
    %261 = vector.load %arg9[%c3_165, %c0_166, %c0_167] : memref<16x16x16xf32, #tpu.memory_space<vmem>>, vector<1x16x16xf32>
    %262 = vector.shape_cast %261 : vector<1x16x16xf32> to vector<16x16xf32>
    %263 = vector.extract_strided_slice %243 {offsets = [3, 0], sizes = [1, 16], strides = [1, 1]} : vector<16x16xf32> to vector<1x16xf32>
    %264 = vector.broadcast %263 : vector<1x16xf32> to vector<16x16xf32>
    %265 = arith.mulf %262, %264 : vector<16x16xf32>
    %266 = arith.addf %260, %265 : vector<16x16xf32>
    %c4_168 = arith.constant 4 : index
    %c0_169 = arith.constant 0 : index
    %c0_170 = arith.constant 0 : index
    %267 = vector.load %arg9[%c4_168, %c0_169, %c0_170] : memref<16x16x16xf32, #tpu.memory_space<vmem>>, vector<1x16x16xf32>
    %268 = vector.shape_cast %267 : vector<1x16x16xf32> to vector<16x16xf32>
    %269 = vector.extract_strided_slice %243 {offsets = [4, 0], sizes = [1, 16], strides = [1, 1]} : vector<16x16xf32> to vector<1x16xf32>
    %270 = vector.broadcast %269 : vector<1x16xf32> to vector<16x16xf32>
    %271 = arith.mulf %268, %270 : vector<16x16xf32>
    %272 = arith.addf %266, %271 : vector<16x16xf32>
    %c5_171 = arith.constant 5 : index
    %c0_172 = arith.constant 0 : index
    %c0_173 = arith.constant 0 : index
    %273 = vector.load %arg9[%c5_171, %c0_172, %c0_173] : memref<16x16x16xf32, #tpu.memory_space<vmem>>, vector<1x16x16xf32>
    %274 = vector.shape_cast %273 : vector<1x16x16xf32> to vector<16x16xf32>
    %275 = vector.extract_strided_slice %243 {offsets = [5, 0], sizes = [1, 16], strides = [1, 1]} : vector<16x16xf32> to vector<1x16xf32>
    %276 = vector.broadcast %275 : vector<1x16xf32> to vector<16x16xf32>
    %277 = arith.mulf %274, %276 : vector<16x16xf32>
    %278 = arith.addf %272, %277 : vector<16x16xf32>
    %c6_174 = arith.constant 6 : index
    %c0_175 = arith.constant 0 : index
    %c0_176 = arith.constant 0 : index
    %279 = vector.load %arg9[%c6_174, %c0_175, %c0_176] : memref<16x16x16xf32, #tpu.memory_space<vmem>>, vector<1x16x16xf32>
    %280 = vector.shape_cast %279 : vector<1x16x16xf32> to vector<16x16xf32>
    %281 = vector.extract_strided_slice %243 {offsets = [6, 0], sizes = [1, 16], strides = [1, 1]} : vector<16x16xf32> to vector<1x16xf32>
    %282 = vector.broadcast %281 : vector<1x16xf32> to vector<16x16xf32>
    %283 = arith.mulf %280, %282 : vector<16x16xf32>
    %284 = arith.addf %278, %283 : vector<16x16xf32>
    %c7_177 = arith.constant 7 : index
    %c0_178 = arith.constant 0 : index
    %c0_179 = arith.constant 0 : index
    %285 = vector.load %arg9[%c7_177, %c0_178, %c0_179] : memref<16x16x16xf32, #tpu.memory_space<vmem>>, vector<1x16x16xf32>
    %286 = vector.shape_cast %285 : vector<1x16x16xf32> to vector<16x16xf32>
    %287 = vector.extract_strided_slice %243 {offsets = [7, 0], sizes = [1, 16], strides = [1, 1]} : vector<16x16xf32> to vector<1x16xf32>
    %288 = vector.broadcast %287 : vector<1x16xf32> to vector<16x16xf32>
    %289 = arith.mulf %286, %288 : vector<16x16xf32>
    %290 = arith.addf %284, %289 : vector<16x16xf32>
    %c8_180 = arith.constant 8 : index
    %c0_181 = arith.constant 0 : index
    %c0_182 = arith.constant 0 : index
    %291 = vector.load %arg9[%c8_180, %c0_181, %c0_182] : memref<16x16x16xf32, #tpu.memory_space<vmem>>, vector<1x16x16xf32>
    %292 = vector.shape_cast %291 : vector<1x16x16xf32> to vector<16x16xf32>
    %293 = vector.extract_strided_slice %243 {offsets = [8, 0], sizes = [1, 16], strides = [1, 1]} : vector<16x16xf32> to vector<1x16xf32>
    %294 = vector.broadcast %293 : vector<1x16xf32> to vector<16x16xf32>
    %295 = arith.mulf %292, %294 : vector<16x16xf32>
    %296 = arith.addf %290, %295 : vector<16x16xf32>
    %c9_183 = arith.constant 9 : index
    %c0_184 = arith.constant 0 : index
    %c0_185 = arith.constant 0 : index
    %297 = vector.load %arg9[%c9_183, %c0_184, %c0_185] : memref<16x16x16xf32, #tpu.memory_space<vmem>>, vector<1x16x16xf32>
    %298 = vector.shape_cast %297 : vector<1x16x16xf32> to vector<16x16xf32>
    %299 = vector.extract_strided_slice %243 {offsets = [9, 0], sizes = [1, 16], strides = [1, 1]} : vector<16x16xf32> to vector<1x16xf32>
    %300 = vector.broadcast %299 : vector<1x16xf32> to vector<16x16xf32>
    %301 = arith.mulf %298, %300 : vector<16x16xf32>
    %302 = arith.addf %296, %301 : vector<16x16xf32>
    %c10_186 = arith.constant 10 : index
    %c0_187 = arith.constant 0 : index
    %c0_188 = arith.constant 0 : index
    %303 = vector.load %arg9[%c10_186, %c0_187, %c0_188] : memref<16x16x16xf32, #tpu.memory_space<vmem>>, vector<1x16x16xf32>
    %304 = vector.shape_cast %303 : vector<1x16x16xf32> to vector<16x16xf32>
    %305 = vector.extract_strided_slice %243 {offsets = [10, 0], sizes = [1, 16], strides = [1, 1]} : vector<16x16xf32> to vector<1x16xf32>
    %306 = vector.broadcast %305 : vector<1x16xf32> to vector<16x16xf32>
    %307 = arith.mulf %304, %306 : vector<16x16xf32>
    %308 = arith.addf %302, %307 : vector<16x16xf32>
    %c11_189 = arith.constant 11 : index
    %c0_190 = arith.constant 0 : index
    %c0_191 = arith.constant 0 : index
    %309 = vector.load %arg9[%c11_189, %c0_190, %c0_191] : memref<16x16x16xf32, #tpu.memory_space<vmem>>, vector<1x16x16xf32>
    %310 = vector.shape_cast %309 : vector<1x16x16xf32> to vector<16x16xf32>
    %311 = vector.extract_strided_slice %243 {offsets = [11, 0], sizes = [1, 16], strides = [1, 1]} : vector<16x16xf32> to vector<1x16xf32>
    %312 = vector.broadcast %311 : vector<1x16xf32> to vector<16x16xf32>
    %313 = arith.mulf %310, %312 : vector<16x16xf32>
    %314 = arith.addf %308, %313 : vector<16x16xf32>
    %c12_192 = arith.constant 12 : index
    %c0_193 = arith.constant 0 : index
    %c0_194 = arith.constant 0 : index
    %315 = vector.load %arg9[%c12_192, %c0_193, %c0_194] : memref<16x16x16xf32, #tpu.memory_space<vmem>>, vector<1x16x16xf32>
    %316 = vector.shape_cast %315 : vector<1x16x16xf32> to vector<16x16xf32>
    %317 = vector.extract_strided_slice %243 {offsets = [12, 0], sizes = [1, 16], strides = [1, 1]} : vector<16x16xf32> to vector<1x16xf32>
    %318 = vector.broadcast %317 : vector<1x16xf32> to vector<16x16xf32>
    %319 = arith.mulf %316, %318 : vector<16x16xf32>
    %320 = arith.addf %314, %319 : vector<16x16xf32>
    %c13_195 = arith.constant 13 : index
    %c0_196 = arith.constant 0 : index
    %c0_197 = arith.constant 0 : index
    %321 = vector.load %arg9[%c13_195, %c0_196, %c0_197] : memref<16x16x16xf32, #tpu.memory_space<vmem>>, vector<1x16x16xf32>
    %322 = vector.shape_cast %321 : vector<1x16x16xf32> to vector<16x16xf32>
    %323 = vector.extract_strided_slice %243 {offsets = [13, 0], sizes = [1, 16], strides = [1, 1]} : vector<16x16xf32> to vector<1x16xf32>
    %324 = vector.broadcast %323 : vector<1x16xf32> to vector<16x16xf32>
    %325 = arith.mulf %322, %324 : vector<16x16xf32>
    %326 = arith.addf %320, %325 : vector<16x16xf32>
    %c14_198 = arith.constant 14 : index
    %c0_199 = arith.constant 0 : index
    %c0_200 = arith.constant 0 : index
    %327 = vector.load %arg9[%c14_198, %c0_199, %c0_200] : memref<16x16x16xf32, #tpu.memory_space<vmem>>, vector<1x16x16xf32>
    %328 = vector.shape_cast %327 : vector<1x16x16xf32> to vector<16x16xf32>
    %329 = vector.extract_strided_slice %243 {offsets = [14, 0], sizes = [1, 16], strides = [1, 1]} : vector<16x16xf32> to vector<1x16xf32>
    %330 = vector.broadcast %329 : vector<1x16xf32> to vector<16x16xf32>
    %331 = arith.mulf %328, %330 : vector<16x16xf32>
    %332 = arith.addf %326, %331 : vector<16x16xf32>
    %c15_201 = arith.constant 15 : index
    %c0_202 = arith.constant 0 : index
    %c0_203 = arith.constant 0 : index
    %333 = vector.load %arg9[%c15_201, %c0_202, %c0_203] : memref<16x16x16xf32, #tpu.memory_space<vmem>>, vector<1x16x16xf32>
    %334 = vector.shape_cast %333 : vector<1x16x16xf32> to vector<16x16xf32>
    %335 = vector.extract_strided_slice %243 {offsets = [15, 0], sizes = [1, 16], strides = [1, 1]} : vector<16x16xf32> to vector<1x16xf32>
    %336 = vector.broadcast %335 : vector<1x16xf32> to vector<16x16xf32>
    %337 = arith.mulf %334, %336 : vector<16x16xf32>
    %338 = arith.addf %332, %337 : vector<16x16xf32>
    %c0_204 = arith.constant 0 : index
    %c0_205 = arith.constant 0 : index
    %339 = vector.load %arg10[%c0_204, %c0_205] : memref<1x16xf32, #tpu.memory_space<vmem>>, vector<1x16xf32>
    %340 = vector.broadcast %339 : vector<1x16xf32> to vector<16x16xf32>
    %341 = arith.addf %338, %340 : vector<16x16xf32>
    %cst_206 = arith.constant 0.000000e+00 : f32
    %342 = vector.broadcast %cst_206 : f32 to vector<16x16xf32>
    %343 = arith.maximumf %341, %342 : vector<16x16xf32>
    %c0_207 = arith.constant 0 : index
    %c0_208 = arith.constant 0 : index
    %344 = vector.load %arg11[%c0_207, %c0_208] : memref<16x16xf32, #tpu.memory_space<vmem>>, vector<16x16xf32>
    %cst_209 = arith.constant dense<0.000000e+00> : vector<16x16xf32>
    %345 = tpu.matmul %343, %344, %cst_209 {dimension_numbers = #tpu.dot_dimension_numbers<[1], [0], [0], [1], [0, 0, 1, 1], [], []>} : vector<16x16xf32>, vector<16x16xf32>, vector<16x16xf32> -> vector<16x16xf32>
    %c0_210 = arith.constant 0 : index
    %c0_211 = arith.constant 0 : index
    %346 = vector.load %arg12[%c0_210, %c0_211] : memref<1x16xf32, #tpu.memory_space<vmem>>, vector<1x16xf32>
    %347 = vector.broadcast %346 : vector<1x16xf32> to vector<16x16xf32>
    %348 = arith.addf %345, %347 : vector<16x16xf32>
    %cst_212 = arith.constant 0.000000e+00 : f32
    %349 = vector.broadcast %cst_212 : f32 to vector<16x16xf32>
    %350 = arith.maximumf %348, %349 : vector<16x16xf32>
    %c0_213 = arith.constant 0 : index
    %c0_214 = arith.constant 0 : index
    %c0_215 = arith.constant 0 : index
    %351 = vector.load %arg13[%c0_213, %c0_214, %c0_215] : memref<16x2x16xf32, #tpu.memory_space<vmem>>, vector<1x2x16xf32>
    %352 = vector.shape_cast %351 : vector<1x2x16xf32> to vector<2x16xf32>
    %353 = vector.extract_strided_slice %350 {offsets = [0, 0], sizes = [1, 16], strides = [1, 1]} : vector<16x16xf32> to vector<1x16xf32>
    %354 = vector.broadcast %353 : vector<1x16xf32> to vector<2x16xf32>
    %355 = arith.mulf %352, %354 : vector<2x16xf32>
    %c1_216 = arith.constant 1 : index
    %c0_217 = arith.constant 0 : index
    %c0_218 = arith.constant 0 : index
    %356 = vector.load %arg13[%c1_216, %c0_217, %c0_218] : memref<16x2x16xf32, #tpu.memory_space<vmem>>, vector<1x2x16xf32>
    %357 = vector.shape_cast %356 : vector<1x2x16xf32> to vector<2x16xf32>
    %358 = vector.extract_strided_slice %350 {offsets = [1, 0], sizes = [1, 16], strides = [1, 1]} : vector<16x16xf32> to vector<1x16xf32>
    %359 = vector.broadcast %358 : vector<1x16xf32> to vector<2x16xf32>
    %360 = arith.mulf %357, %359 : vector<2x16xf32>
    %361 = arith.addf %355, %360 : vector<2x16xf32>
    %c2_219 = arith.constant 2 : index
    %c0_220 = arith.constant 0 : index
    %c0_221 = arith.constant 0 : index
    %362 = vector.load %arg13[%c2_219, %c0_220, %c0_221] : memref<16x2x16xf32, #tpu.memory_space<vmem>>, vector<1x2x16xf32>
    %363 = vector.shape_cast %362 : vector<1x2x16xf32> to vector<2x16xf32>
    %364 = vector.extract_strided_slice %350 {offsets = [2, 0], sizes = [1, 16], strides = [1, 1]} : vector<16x16xf32> to vector<1x16xf32>
    %365 = vector.broadcast %364 : vector<1x16xf32> to vector<2x16xf32>
    %366 = arith.mulf %363, %365 : vector<2x16xf32>
    %367 = arith.addf %361, %366 : vector<2x16xf32>
    %c3_222 = arith.constant 3 : index
    %c0_223 = arith.constant 0 : index
    %c0_224 = arith.constant 0 : index
    %368 = vector.load %arg13[%c3_222, %c0_223, %c0_224] : memref<16x2x16xf32, #tpu.memory_space<vmem>>, vector<1x2x16xf32>
    %369 = vector.shape_cast %368 : vector<1x2x16xf32> to vector<2x16xf32>
    %370 = vector.extract_strided_slice %350 {offsets = [3, 0], sizes = [1, 16], strides = [1, 1]} : vector<16x16xf32> to vector<1x16xf32>
    %371 = vector.broadcast %370 : vector<1x16xf32> to vector<2x16xf32>
    %372 = arith.mulf %369, %371 : vector<2x16xf32>
    %373 = arith.addf %367, %372 : vector<2x16xf32>
    %c4_225 = arith.constant 4 : index
    %c0_226 = arith.constant 0 : index
    %c0_227 = arith.constant 0 : index
    %374 = vector.load %arg13[%c4_225, %c0_226, %c0_227] : memref<16x2x16xf32, #tpu.memory_space<vmem>>, vector<1x2x16xf32>
    %375 = vector.shape_cast %374 : vector<1x2x16xf32> to vector<2x16xf32>
    %376 = vector.extract_strided_slice %350 {offsets = [4, 0], sizes = [1, 16], strides = [1, 1]} : vector<16x16xf32> to vector<1x16xf32>
    %377 = vector.broadcast %376 : vector<1x16xf32> to vector<2x16xf32>
    %378 = arith.mulf %375, %377 : vector<2x16xf32>
    %379 = arith.addf %373, %378 : vector<2x16xf32>
    %c5_228 = arith.constant 5 : index
    %c0_229 = arith.constant 0 : index
    %c0_230 = arith.constant 0 : index
    %380 = vector.load %arg13[%c5_228, %c0_229, %c0_230] : memref<16x2x16xf32, #tpu.memory_space<vmem>>, vector<1x2x16xf32>
    %381 = vector.shape_cast %380 : vector<1x2x16xf32> to vector<2x16xf32>
    %382 = vector.extract_strided_slice %350 {offsets = [5, 0], sizes = [1, 16], strides = [1, 1]} : vector<16x16xf32> to vector<1x16xf32>
    %383 = vector.broadcast %382 : vector<1x16xf32> to vector<2x16xf32>
    %384 = arith.mulf %381, %383 : vector<2x16xf32>
    %385 = arith.addf %379, %384 : vector<2x16xf32>
    %c6_231 = arith.constant 6 : index
    %c0_232 = arith.constant 0 : index
    %c0_233 = arith.constant 0 : index
    %386 = vector.load %arg13[%c6_231, %c0_232, %c0_233] : memref<16x2x16xf32, #tpu.memory_space<vmem>>, vector<1x2x16xf32>
    %387 = vector.shape_cast %386 : vector<1x2x16xf32> to vector<2x16xf32>
    %388 = vector.extract_strided_slice %350 {offsets = [6, 0], sizes = [1, 16], strides = [1, 1]} : vector<16x16xf32> to vector<1x16xf32>
    %389 = vector.broadcast %388 : vector<1x16xf32> to vector<2x16xf32>
    %390 = arith.mulf %387, %389 : vector<2x16xf32>
    %391 = arith.addf %385, %390 : vector<2x16xf32>
    %c7_234 = arith.constant 7 : index
    %c0_235 = arith.constant 0 : index
    %c0_236 = arith.constant 0 : index
    %392 = vector.load %arg13[%c7_234, %c0_235, %c0_236] : memref<16x2x16xf32, #tpu.memory_space<vmem>>, vector<1x2x16xf32>
    %393 = vector.shape_cast %392 : vector<1x2x16xf32> to vector<2x16xf32>
    %394 = vector.extract_strided_slice %350 {offsets = [7, 0], sizes = [1, 16], strides = [1, 1]} : vector<16x16xf32> to vector<1x16xf32>
    %395 = vector.broadcast %394 : vector<1x16xf32> to vector<2x16xf32>
    %396 = arith.mulf %393, %395 : vector<2x16xf32>
    %397 = arith.addf %391, %396 : vector<2x16xf32>
    %c8_237 = arith.constant 8 : index
    %c0_238 = arith.constant 0 : index
    %c0_239 = arith.constant 0 : index
    %398 = vector.load %arg13[%c8_237, %c0_238, %c0_239] : memref<16x2x16xf32, #tpu.memory_space<vmem>>, vector<1x2x16xf32>
    %399 = vector.shape_cast %398 : vector<1x2x16xf32> to vector<2x16xf32>
    %400 = vector.extract_strided_slice %350 {offsets = [8, 0], sizes = [1, 16], strides = [1, 1]} : vector<16x16xf32> to vector<1x16xf32>
    %401 = vector.broadcast %400 : vector<1x16xf32> to vector<2x16xf32>
    %402 = arith.mulf %399, %401 : vector<2x16xf32>
    %403 = arith.addf %397, %402 : vector<2x16xf32>
    %c9_240 = arith.constant 9 : index
    %c0_241 = arith.constant 0 : index
    %c0_242 = arith.constant 0 : index
    %404 = vector.load %arg13[%c9_240, %c0_241, %c0_242] : memref<16x2x16xf32, #tpu.memory_space<vmem>>, vector<1x2x16xf32>
    %405 = vector.shape_cast %404 : vector<1x2x16xf32> to vector<2x16xf32>
    %406 = vector.extract_strided_slice %350 {offsets = [9, 0], sizes = [1, 16], strides = [1, 1]} : vector<16x16xf32> to vector<1x16xf32>
    %407 = vector.broadcast %406 : vector<1x16xf32> to vector<2x16xf32>
    %408 = arith.mulf %405, %407 : vector<2x16xf32>
    %409 = arith.addf %403, %408 : vector<2x16xf32>
    %c10_243 = arith.constant 10 : index
    %c0_244 = arith.constant 0 : index
    %c0_245 = arith.constant 0 : index
    %410 = vector.load %arg13[%c10_243, %c0_244, %c0_245] : memref<16x2x16xf32, #tpu.memory_space<vmem>>, vector<1x2x16xf32>
    %411 = vector.shape_cast %410 : vector<1x2x16xf32> to vector<2x16xf32>
    %412 = vector.extract_strided_slice %350 {offsets = [10, 0], sizes = [1, 16], strides = [1, 1]} : vector<16x16xf32> to vector<1x16xf32>
    %413 = vector.broadcast %412 : vector<1x16xf32> to vector<2x16xf32>
    %414 = arith.mulf %411, %413 : vector<2x16xf32>
    %415 = arith.addf %409, %414 : vector<2x16xf32>
    %c11_246 = arith.constant 11 : index
    %c0_247 = arith.constant 0 : index
    %c0_248 = arith.constant 0 : index
    %416 = vector.load %arg13[%c11_246, %c0_247, %c0_248] : memref<16x2x16xf32, #tpu.memory_space<vmem>>, vector<1x2x16xf32>
    %417 = vector.shape_cast %416 : vector<1x2x16xf32> to vector<2x16xf32>
    %418 = vector.extract_strided_slice %350 {offsets = [11, 0], sizes = [1, 16], strides = [1, 1]} : vector<16x16xf32> to vector<1x16xf32>
    %419 = vector.broadcast %418 : vector<1x16xf32> to vector<2x16xf32>
    %420 = arith.mulf %417, %419 : vector<2x16xf32>
    %421 = arith.addf %415, %420 : vector<2x16xf32>
    %c12_249 = arith.constant 12 : index
    %c0_250 = arith.constant 0 : index
    %c0_251 = arith.constant 0 : index
    %422 = vector.load %arg13[%c12_249, %c0_250, %c0_251] : memref<16x2x16xf32, #tpu.memory_space<vmem>>, vector<1x2x16xf32>
    %423 = vector.shape_cast %422 : vector<1x2x16xf32> to vector<2x16xf32>
    %424 = vector.extract_strided_slice %350 {offsets = [12, 0], sizes = [1, 16], strides = [1, 1]} : vector<16x16xf32> to vector<1x16xf32>
    %425 = vector.broadcast %424 : vector<1x16xf32> to vector<2x16xf32>
    %426 = arith.mulf %423, %425 : vector<2x16xf32>
    %427 = arith.addf %421, %426 : vector<2x16xf32>
    %c13_252 = arith.constant 13 : index
    %c0_253 = arith.constant 0 : index
    %c0_254 = arith.constant 0 : index
    %428 = vector.load %arg13[%c13_252, %c0_253, %c0_254] : memref<16x2x16xf32, #tpu.memory_space<vmem>>, vector<1x2x16xf32>
    %429 = vector.shape_cast %428 : vector<1x2x16xf32> to vector<2x16xf32>
    %430 = vector.extract_strided_slice %350 {offsets = [13, 0], sizes = [1, 16], strides = [1, 1]} : vector<16x16xf32> to vector<1x16xf32>
    %431 = vector.broadcast %430 : vector<1x16xf32> to vector<2x16xf32>
    %432 = arith.mulf %429, %431 : vector<2x16xf32>
    %433 = arith.addf %427, %432 : vector<2x16xf32>
    %c14_255 = arith.constant 14 : index
    %c0_256 = arith.constant 0 : index
    %c0_257 = arith.constant 0 : index
    %434 = vector.load %arg13[%c14_255, %c0_256, %c0_257] : memref<16x2x16xf32, #tpu.memory_space<vmem>>, vector<1x2x16xf32>
    %435 = vector.shape_cast %434 : vector<1x2x16xf32> to vector<2x16xf32>
    %436 = vector.extract_strided_slice %350 {offsets = [14, 0], sizes = [1, 16], strides = [1, 1]} : vector<16x16xf32> to vector<1x16xf32>
    %437 = vector.broadcast %436 : vector<1x16xf32> to vector<2x16xf32>
    %438 = arith.mulf %435, %437 : vector<2x16xf32>
    %439 = arith.addf %433, %438 : vector<2x16xf32>
    %c15_258 = arith.constant 15 : index
    %c0_259 = arith.constant 0 : index
    %c0_260 = arith.constant 0 : index
    %440 = vector.load %arg13[%c15_258, %c0_259, %c0_260] : memref<16x2x16xf32, #tpu.memory_space<vmem>>, vector<1x2x16xf32>
    %441 = vector.shape_cast %440 : vector<1x2x16xf32> to vector<2x16xf32>
    %442 = vector.extract_strided_slice %350 {offsets = [15, 0], sizes = [1, 16], strides = [1, 1]} : vector<16x16xf32> to vector<1x16xf32>
    %443 = vector.broadcast %442 : vector<1x16xf32> to vector<2x16xf32>
    %444 = arith.mulf %441, %443 : vector<2x16xf32>
    %445 = arith.addf %439, %444 : vector<2x16xf32>
    %c0_261 = arith.constant 0 : index
    %c0_262 = arith.constant 0 : index
    %446 = vector.load %arg14[%c0_261, %c0_262] : memref<1x16xf32, #tpu.memory_space<vmem>>, vector<1x16xf32>
    %447 = vector.broadcast %446 : vector<1x16xf32> to vector<2x16xf32>
    %448 = arith.addf %445, %447 : vector<2x16xf32>
    %cst_263 = arith.constant 0.000000e+00 : f32
    %449 = vector.broadcast %cst_263 : f32 to vector<2x16xf32>
    %450 = arith.maximumf %448, %449 : vector<2x16xf32>
    %c0_264 = arith.constant 0 : index
    %c0_265 = arith.constant 0 : index
    %451 = vector.load %arg15[%c0_264, %c0_265] : memref<16x128xf32, #tpu.memory_space<vmem>>, vector<16x128xf32>
    %cst_266 = arith.constant dense<0.000000e+00> : vector<2x128xf32>
    %452 = tpu.matmul %450, %451, %cst_266 {dimension_numbers = #tpu.dot_dimension_numbers<[1], [0], [0], [1], [0, 0, 1, 1], [], []>} : vector<2x16xf32>, vector<16x128xf32>, vector<2x128xf32> -> vector<2x128xf32>
    %c0_267 = arith.constant 0 : index
    %c0_268 = arith.constant 0 : index
    %453 = vector.load %arg16[%c0_267, %c0_268] : memref<1x128xf32, #tpu.memory_space<vmem>>, vector<1x128xf32>
    %454 = vector.broadcast %453 : vector<1x128xf32> to vector<2x128xf32>
    %455 = arith.addf %452, %454 : vector<2x128xf32>
    %cst_269 = arith.constant 0.000000e+00 : f32
    %456 = vector.broadcast %cst_269 : f32 to vector<2x128xf32>
    %457 = arith.maximumf %455, %456 : vector<2x128xf32>
    %c0_270 = arith.constant 0 : index
    %c0_271 = arith.constant 0 : index
    %c0_272 = arith.constant 0 : index
    %458 = vector.load %arg17[%c0_270, %c0_271, %c0_272] : memref<9x1x128xf32, #tpu.memory_space<vmem>>, vector<1x1x128xf32>
    %459 = vector.shape_cast %458 : vector<1x1x128xf32> to vector<1x128xf32>
    %460 = vector.broadcast %459 : vector<1x128xf32> to vector<2x128xf32>
    %461 = arith.mulf %457, %460 : vector<2x128xf32>
    %c0_273 = arith.constant 0 : index
    %c0_274 = arith.constant 0 : index
    %c0_275 = arith.constant 0 : index
    %462 = vector.load %arg18[%c0_273, %c0_274, %c0_275] : memref<9x1x128xf32, #tpu.memory_space<vmem>>, vector<1x1x128xf32>
    %463 = vector.shape_cast %462 : vector<1x1x128xf32> to vector<1x128xf32>
    %464 = vector.broadcast %463 : vector<1x128xf32> to vector<2x128xf32>
    %465 = arith.addf %461, %464 : vector<2x128xf32>
    %cst_276 = arith.constant 0.000000e+00 : f32
    %466 = vector.broadcast %cst_276 : f32 to vector<2x128xf32>
    %467 = arith.maximumf %465, %466 : vector<2x128xf32>
    %c0_277 = arith.constant 0 : index
    %c0_278 = arith.constant 0 : index
    %c0_279 = arith.constant 0 : index
    %468 = vector.load %arg19[%c0_277, %c0_278, %c0_279] : memref<9x128x128xf32, #tpu.memory_space<vmem>>, vector<1x128x128xf32>
    %469 = vector.shape_cast %468 : vector<1x128x128xf32> to vector<128x128xf32>
    %cst_280 = arith.constant dense<0.000000e+00> : vector<2x128xf32>
    %470 = tpu.matmul %467, %469, %cst_280 {dimension_numbers = #tpu.dot_dimension_numbers<[1], [0], [0], [1], [0, 0, 1, 1], [], []>} : vector<2x128xf32>, vector<128x128xf32>, vector<2x128xf32> -> vector<2x128xf32>
    %c0_281 = arith.constant 0 : index
    %c0_282 = arith.constant 0 : index
    %c0_283 = arith.constant 0 : index
    %471 = vector.load %arg20[%c0_281, %c0_282, %c0_283] : memref<9x1x128xf32, #tpu.memory_space<vmem>>, vector<1x1x128xf32>
    %472 = vector.shape_cast %471 : vector<1x1x128xf32> to vector<1x128xf32>
    %473 = vector.broadcast %472 : vector<1x128xf32> to vector<2x128xf32>
    %474 = arith.addf %470, %473 : vector<2x128xf32>
    %cst_284 = arith.constant 0.000000e+00 : f32
    %475 = vector.broadcast %cst_284 : f32 to vector<2x128xf32>
    %476 = arith.maximumf %474, %475 : vector<2x128xf32>
    %c1_285 = arith.constant 1 : index
    %c0_286 = arith.constant 0 : index
    %c0_287 = arith.constant 0 : index
    %477 = vector.load %arg17[%c1_285, %c0_286, %c0_287] : memref<9x1x128xf32, #tpu.memory_space<vmem>>, vector<1x1x128xf32>
    %478 = vector.shape_cast %477 : vector<1x1x128xf32> to vector<1x128xf32>
    %479 = vector.broadcast %478 : vector<1x128xf32> to vector<2x128xf32>
    %480 = arith.mulf %476, %479 : vector<2x128xf32>
    %c1_288 = arith.constant 1 : index
    %c0_289 = arith.constant 0 : index
    %c0_290 = arith.constant 0 : index
    %481 = vector.load %arg18[%c1_288, %c0_289, %c0_290] : memref<9x1x128xf32, #tpu.memory_space<vmem>>, vector<1x1x128xf32>
    %482 = vector.shape_cast %481 : vector<1x1x128xf32> to vector<1x128xf32>
    %483 = vector.broadcast %482 : vector<1x128xf32> to vector<2x128xf32>
    %484 = arith.addf %480, %483 : vector<2x128xf32>
    %cst_291 = arith.constant 0.000000e+00 : f32
    %485 = vector.broadcast %cst_291 : f32 to vector<2x128xf32>
    %486 = arith.maximumf %484, %485 : vector<2x128xf32>
    %c1_292 = arith.constant 1 : index
    %c0_293 = arith.constant 0 : index
    %c0_294 = arith.constant 0 : index
    %487 = vector.load %arg19[%c1_292, %c0_293, %c0_294] : memref<9x128x128xf32, #tpu.memory_space<vmem>>, vector<1x128x128xf32>
    %488 = vector.shape_cast %487 : vector<1x128x128xf32> to vector<128x128xf32>
    %cst_295 = arith.constant dense<0.000000e+00> : vector<2x128xf32>
    %489 = tpu.matmul %486, %488, %cst_295 {dimension_numbers = #tpu.dot_dimension_numbers<[1], [0], [0], [1], [0, 0, 1, 1], [], []>} : vector<2x128xf32>, vector<128x128xf32>, vector<2x128xf32> -> vector<2x128xf32>
    %c1_296 = arith.constant 1 : index
    %c0_297 = arith.constant 0 : index
    %c0_298 = arith.constant 0 : index
    %490 = vector.load %arg20[%c1_296, %c0_297, %c0_298] : memref<9x1x128xf32, #tpu.memory_space<vmem>>, vector<1x1x128xf32>
    %491 = vector.shape_cast %490 : vector<1x1x128xf32> to vector<1x128xf32>
    %492 = vector.broadcast %491 : vector<1x128xf32> to vector<2x128xf32>
    %493 = arith.addf %489, %492 : vector<2x128xf32>
    %cst_299 = arith.constant 0.000000e+00 : f32
    %494 = vector.broadcast %cst_299 : f32 to vector<2x128xf32>
    %495 = arith.maximumf %493, %494 : vector<2x128xf32>
    %c2_300 = arith.constant 2 : index
    %c0_301 = arith.constant 0 : index
    %c0_302 = arith.constant 0 : index
    %496 = vector.load %arg17[%c2_300, %c0_301, %c0_302] : memref<9x1x128xf32, #tpu.memory_space<vmem>>, vector<1x1x128xf32>
    %497 = vector.shape_cast %496 : vector<1x1x128xf32> to vector<1x128xf32>
    %498 = vector.broadcast %497 : vector<1x128xf32> to vector<2x128xf32>
    %499 = arith.mulf %495, %498 : vector<2x128xf32>
    %c2_303 = arith.constant 2 : index
    %c0_304 = arith.constant 0 : index
    %c0_305 = arith.constant 0 : index
    %500 = vector.load %arg18[%c2_303, %c0_304, %c0_305] : memref<9x1x128xf32, #tpu.memory_space<vmem>>, vector<1x1x128xf32>
    %501 = vector.shape_cast %500 : vector<1x1x128xf32> to vector<1x128xf32>
    %502 = vector.broadcast %501 : vector<1x128xf32> to vector<2x128xf32>
    %503 = arith.addf %499, %502 : vector<2x128xf32>
    %cst_306 = arith.constant 0.000000e+00 : f32
    %504 = vector.broadcast %cst_306 : f32 to vector<2x128xf32>
    %505 = arith.maximumf %503, %504 : vector<2x128xf32>
    %c2_307 = arith.constant 2 : index
    %c0_308 = arith.constant 0 : index
    %c0_309 = arith.constant 0 : index
    %506 = vector.load %arg19[%c2_307, %c0_308, %c0_309] : memref<9x128x128xf32, #tpu.memory_space<vmem>>, vector<1x128x128xf32>
    %507 = vector.shape_cast %506 : vector<1x128x128xf32> to vector<128x128xf32>
    %cst_310 = arith.constant dense<0.000000e+00> : vector<2x128xf32>
    %508 = tpu.matmul %505, %507, %cst_310 {dimension_numbers = #tpu.dot_dimension_numbers<[1], [0], [0], [1], [0, 0, 1, 1], [], []>} : vector<2x128xf32>, vector<128x128xf32>, vector<2x128xf32> -> vector<2x128xf32>
    %c2_311 = arith.constant 2 : index
    %c0_312 = arith.constant 0 : index
    %c0_313 = arith.constant 0 : index
    %509 = vector.load %arg20[%c2_311, %c0_312, %c0_313] : memref<9x1x128xf32, #tpu.memory_space<vmem>>, vector<1x1x128xf32>
    %510 = vector.shape_cast %509 : vector<1x1x128xf32> to vector<1x128xf32>
    %511 = vector.broadcast %510 : vector<1x128xf32> to vector<2x128xf32>
    %512 = arith.addf %508, %511 : vector<2x128xf32>
    %cst_314 = arith.constant 0.000000e+00 : f32
    %513 = vector.broadcast %cst_314 : f32 to vector<2x128xf32>
    %514 = arith.maximumf %512, %513 : vector<2x128xf32>
    %c3_315 = arith.constant 3 : index
    %c0_316 = arith.constant 0 : index
    %c0_317 = arith.constant 0 : index
    %515 = vector.load %arg17[%c3_315, %c0_316, %c0_317] : memref<9x1x128xf32, #tpu.memory_space<vmem>>, vector<1x1x128xf32>
    %516 = vector.shape_cast %515 : vector<1x1x128xf32> to vector<1x128xf32>
    %517 = vector.broadcast %516 : vector<1x128xf32> to vector<2x128xf32>
    %518 = arith.mulf %514, %517 : vector<2x128xf32>
    %c3_318 = arith.constant 3 : index
    %c0_319 = arith.constant 0 : index
    %c0_320 = arith.constant 0 : index
    %519 = vector.load %arg18[%c3_318, %c0_319, %c0_320] : memref<9x1x128xf32, #tpu.memory_space<vmem>>, vector<1x1x128xf32>
    %520 = vector.shape_cast %519 : vector<1x1x128xf32> to vector<1x128xf32>
    %521 = vector.broadcast %520 : vector<1x128xf32> to vector<2x128xf32>
    %522 = arith.addf %518, %521 : vector<2x128xf32>
    %cst_321 = arith.constant 0.000000e+00 : f32
    %523 = vector.broadcast %cst_321 : f32 to vector<2x128xf32>
    %524 = arith.maximumf %522, %523 : vector<2x128xf32>
    %c3_322 = arith.constant 3 : index
    %c0_323 = arith.constant 0 : index
    %c0_324 = arith.constant 0 : index
    %525 = vector.load %arg19[%c3_322, %c0_323, %c0_324] : memref<9x128x128xf32, #tpu.memory_space<vmem>>, vector<1x128x128xf32>
    %526 = vector.shape_cast %525 : vector<1x128x128xf32> to vector<128x128xf32>
    %cst_325 = arith.constant dense<0.000000e+00> : vector<2x128xf32>
    %527 = tpu.matmul %524, %526, %cst_325 {dimension_numbers = #tpu.dot_dimension_numbers<[1], [0], [0], [1], [0, 0, 1, 1], [], []>} : vector<2x128xf32>, vector<128x128xf32>, vector<2x128xf32> -> vector<2x128xf32>
    %c3_326 = arith.constant 3 : index
    %c0_327 = arith.constant 0 : index
    %c0_328 = arith.constant 0 : index
    %528 = vector.load %arg20[%c3_326, %c0_327, %c0_328] : memref<9x1x128xf32, #tpu.memory_space<vmem>>, vector<1x1x128xf32>
    %529 = vector.shape_cast %528 : vector<1x1x128xf32> to vector<1x128xf32>
    %530 = vector.broadcast %529 : vector<1x128xf32> to vector<2x128xf32>
    %531 = arith.addf %527, %530 : vector<2x128xf32>
    %cst_329 = arith.constant 0.000000e+00 : f32
    %532 = vector.broadcast %cst_329 : f32 to vector<2x128xf32>
    %533 = arith.maximumf %531, %532 : vector<2x128xf32>
    %c4_330 = arith.constant 4 : index
    %c0_331 = arith.constant 0 : index
    %c0_332 = arith.constant 0 : index
    %534 = vector.load %arg17[%c4_330, %c0_331, %c0_332] : memref<9x1x128xf32, #tpu.memory_space<vmem>>, vector<1x1x128xf32>
    %535 = vector.shape_cast %534 : vector<1x1x128xf32> to vector<1x128xf32>
    %536 = vector.broadcast %535 : vector<1x128xf32> to vector<2x128xf32>
    %537 = arith.mulf %533, %536 : vector<2x128xf32>
    %c4_333 = arith.constant 4 : index
    %c0_334 = arith.constant 0 : index
    %c0_335 = arith.constant 0 : index
    %538 = vector.load %arg18[%c4_333, %c0_334, %c0_335] : memref<9x1x128xf32, #tpu.memory_space<vmem>>, vector<1x1x128xf32>
    %539 = vector.shape_cast %538 : vector<1x1x128xf32> to vector<1x128xf32>
    %540 = vector.broadcast %539 : vector<1x128xf32> to vector<2x128xf32>
    %541 = arith.addf %537, %540 : vector<2x128xf32>
    %cst_336 = arith.constant 0.000000e+00 : f32
    %542 = vector.broadcast %cst_336 : f32 to vector<2x128xf32>
    %543 = arith.maximumf %541, %542 : vector<2x128xf32>
    %c4_337 = arith.constant 4 : index
    %c0_338 = arith.constant 0 : index
    %c0_339 = arith.constant 0 : index
    %544 = vector.load %arg19[%c4_337, %c0_338, %c0_339] : memref<9x128x128xf32, #tpu.memory_space<vmem>>, vector<1x128x128xf32>
    %545 = vector.shape_cast %544 : vector<1x128x128xf32> to vector<128x128xf32>
    %cst_340 = arith.constant dense<0.000000e+00> : vector<2x128xf32>
    %546 = tpu.matmul %543, %545, %cst_340 {dimension_numbers = #tpu.dot_dimension_numbers<[1], [0], [0], [1], [0, 0, 1, 1], [], []>} : vector<2x128xf32>, vector<128x128xf32>, vector<2x128xf32> -> vector<2x128xf32>
    %c4_341 = arith.constant 4 : index
    %c0_342 = arith.constant 0 : index
    %c0_343 = arith.constant 0 : index
    %547 = vector.load %arg20[%c4_341, %c0_342, %c0_343] : memref<9x1x128xf32, #tpu.memory_space<vmem>>, vector<1x1x128xf32>
    %548 = vector.shape_cast %547 : vector<1x1x128xf32> to vector<1x128xf32>
    %549 = vector.broadcast %548 : vector<1x128xf32> to vector<2x128xf32>
    %550 = arith.addf %546, %549 : vector<2x128xf32>
    %cst_344 = arith.constant 0.000000e+00 : f32
    %551 = vector.broadcast %cst_344 : f32 to vector<2x128xf32>
    %552 = arith.maximumf %550, %551 : vector<2x128xf32>
    %c5_345 = arith.constant 5 : index
    %c0_346 = arith.constant 0 : index
    %c0_347 = arith.constant 0 : index
    %553 = vector.load %arg17[%c5_345, %c0_346, %c0_347] : memref<9x1x128xf32, #tpu.memory_space<vmem>>, vector<1x1x128xf32>
    %554 = vector.shape_cast %553 : vector<1x1x128xf32> to vector<1x128xf32>
    %555 = vector.broadcast %554 : vector<1x128xf32> to vector<2x128xf32>
    %556 = arith.mulf %552, %555 : vector<2x128xf32>
    %c5_348 = arith.constant 5 : index
    %c0_349 = arith.constant 0 : index
    %c0_350 = arith.constant 0 : index
    %557 = vector.load %arg18[%c5_348, %c0_349, %c0_350] : memref<9x1x128xf32, #tpu.memory_space<vmem>>, vector<1x1x128xf32>
    %558 = vector.shape_cast %557 : vector<1x1x128xf32> to vector<1x128xf32>
    %559 = vector.broadcast %558 : vector<1x128xf32> to vector<2x128xf32>
    %560 = arith.addf %556, %559 : vector<2x128xf32>
    %cst_351 = arith.constant 0.000000e+00 : f32
    %561 = vector.broadcast %cst_351 : f32 to vector<2x128xf32>
    %562 = arith.maximumf %560, %561 : vector<2x128xf32>
    %c5_352 = arith.constant 5 : index
    %c0_353 = arith.constant 0 : index
    %c0_354 = arith.constant 0 : index
    %563 = vector.load %arg19[%c5_352, %c0_353, %c0_354] : memref<9x128x128xf32, #tpu.memory_space<vmem>>, vector<1x128x128xf32>
    %564 = vector.shape_cast %563 : vector<1x128x128xf32> to vector<128x128xf32>
    %cst_355 = arith.constant dense<0.000000e+00> : vector<2x128xf32>
    %565 = tpu.matmul %562, %564, %cst_355 {dimension_numbers = #tpu.dot_dimension_numbers<[1], [0], [0], [1], [0, 0, 1, 1], [], []>} : vector<2x128xf32>, vector<128x128xf32>, vector<2x128xf32> -> vector<2x128xf32>
    %c5_356 = arith.constant 5 : index
    %c0_357 = arith.constant 0 : index
    %c0_358 = arith.constant 0 : index
    %566 = vector.load %arg20[%c5_356, %c0_357, %c0_358] : memref<9x1x128xf32, #tpu.memory_space<vmem>>, vector<1x1x128xf32>
    %567 = vector.shape_cast %566 : vector<1x1x128xf32> to vector<1x128xf32>
    %568 = vector.broadcast %567 : vector<1x128xf32> to vector<2x128xf32>
    %569 = arith.addf %565, %568 : vector<2x128xf32>
    %cst_359 = arith.constant 0.000000e+00 : f32
    %570 = vector.broadcast %cst_359 : f32 to vector<2x128xf32>
    %571 = arith.maximumf %569, %570 : vector<2x128xf32>
    %c6_360 = arith.constant 6 : index
    %c0_361 = arith.constant 0 : index
    %c0_362 = arith.constant 0 : index
    %572 = vector.load %arg17[%c6_360, %c0_361, %c0_362] : memref<9x1x128xf32, #tpu.memory_space<vmem>>, vector<1x1x128xf32>
    %573 = vector.shape_cast %572 : vector<1x1x128xf32> to vector<1x128xf32>
    %574 = vector.broadcast %573 : vector<1x128xf32> to vector<2x128xf32>
    %575 = arith.mulf %571, %574 : vector<2x128xf32>
    %c6_363 = arith.constant 6 : index
    %c0_364 = arith.constant 0 : index
    %c0_365 = arith.constant 0 : index
    %576 = vector.load %arg18[%c6_363, %c0_364, %c0_365] : memref<9x1x128xf32, #tpu.memory_space<vmem>>, vector<1x1x128xf32>
    %577 = vector.shape_cast %576 : vector<1x1x128xf32> to vector<1x128xf32>
    %578 = vector.broadcast %577 : vector<1x128xf32> to vector<2x128xf32>
    %579 = arith.addf %575, %578 : vector<2x128xf32>
    %cst_366 = arith.constant 0.000000e+00 : f32
    %580 = vector.broadcast %cst_366 : f32 to vector<2x128xf32>
    %581 = arith.maximumf %579, %580 : vector<2x128xf32>
    %c6_367 = arith.constant 6 : index
    %c0_368 = arith.constant 0 : index
    %c0_369 = arith.constant 0 : index
    %582 = vector.load %arg19[%c6_367, %c0_368, %c0_369] : memref<9x128x128xf32, #tpu.memory_space<vmem>>, vector<1x128x128xf32>
    %583 = vector.shape_cast %582 : vector<1x128x128xf32> to vector<128x128xf32>
    %cst_370 = arith.constant dense<0.000000e+00> : vector<2x128xf32>
    %584 = tpu.matmul %581, %583, %cst_370 {dimension_numbers = #tpu.dot_dimension_numbers<[1], [0], [0], [1], [0, 0, 1, 1], [], []>} : vector<2x128xf32>, vector<128x128xf32>, vector<2x128xf32> -> vector<2x128xf32>
    %c6_371 = arith.constant 6 : index
    %c0_372 = arith.constant 0 : index
    %c0_373 = arith.constant 0 : index
    %585 = vector.load %arg20[%c6_371, %c0_372, %c0_373] : memref<9x1x128xf32, #tpu.memory_space<vmem>>, vector<1x1x128xf32>
    %586 = vector.shape_cast %585 : vector<1x1x128xf32> to vector<1x128xf32>
    %587 = vector.broadcast %586 : vector<1x128xf32> to vector<2x128xf32>
    %588 = arith.addf %584, %587 : vector<2x128xf32>
    %cst_374 = arith.constant 0.000000e+00 : f32
    %589 = vector.broadcast %cst_374 : f32 to vector<2x128xf32>
    %590 = arith.maximumf %588, %589 : vector<2x128xf32>
    %c7_375 = arith.constant 7 : index
    %c0_376 = arith.constant 0 : index
    %c0_377 = arith.constant 0 : index
    %591 = vector.load %arg17[%c7_375, %c0_376, %c0_377] : memref<9x1x128xf32, #tpu.memory_space<vmem>>, vector<1x1x128xf32>
    %592 = vector.shape_cast %591 : vector<1x1x128xf32> to vector<1x128xf32>
    %593 = vector.broadcast %592 : vector<1x128xf32> to vector<2x128xf32>
    %594 = arith.mulf %590, %593 : vector<2x128xf32>
    %c7_378 = arith.constant 7 : index
    %c0_379 = arith.constant 0 : index
    %c0_380 = arith.constant 0 : index
    %595 = vector.load %arg18[%c7_378, %c0_379, %c0_380] : memref<9x1x128xf32, #tpu.memory_space<vmem>>, vector<1x1x128xf32>
    %596 = vector.shape_cast %595 : vector<1x1x128xf32> to vector<1x128xf32>
    %597 = vector.broadcast %596 : vector<1x128xf32> to vector<2x128xf32>
    %598 = arith.addf %594, %597 : vector<2x128xf32>
    %cst_381 = arith.constant 0.000000e+00 : f32
    %599 = vector.broadcast %cst_381 : f32 to vector<2x128xf32>
    %600 = arith.maximumf %598, %599 : vector<2x128xf32>
    %c7_382 = arith.constant 7 : index
    %c0_383 = arith.constant 0 : index
    %c0_384 = arith.constant 0 : index
    %601 = vector.load %arg19[%c7_382, %c0_383, %c0_384] : memref<9x128x128xf32, #tpu.memory_space<vmem>>, vector<1x128x128xf32>
    %602 = vector.shape_cast %601 : vector<1x128x128xf32> to vector<128x128xf32>
    %cst_385 = arith.constant dense<0.000000e+00> : vector<2x128xf32>
    %603 = tpu.matmul %600, %602, %cst_385 {dimension_numbers = #tpu.dot_dimension_numbers<[1], [0], [0], [1], [0, 0, 1, 1], [], []>} : vector<2x128xf32>, vector<128x128xf32>, vector<2x128xf32> -> vector<2x128xf32>
    %c7_386 = arith.constant 7 : index
    %c0_387 = arith.constant 0 : index
    %c0_388 = arith.constant 0 : index
    %604 = vector.load %arg20[%c7_386, %c0_387, %c0_388] : memref<9x1x128xf32, #tpu.memory_space<vmem>>, vector<1x1x128xf32>
    %605 = vector.shape_cast %604 : vector<1x1x128xf32> to vector<1x128xf32>
    %606 = vector.broadcast %605 : vector<1x128xf32> to vector<2x128xf32>
    %607 = arith.addf %603, %606 : vector<2x128xf32>
    %cst_389 = arith.constant 0.000000e+00 : f32
    %608 = vector.broadcast %cst_389 : f32 to vector<2x128xf32>
    %609 = arith.maximumf %607, %608 : vector<2x128xf32>
    %c8_390 = arith.constant 8 : index
    %c0_391 = arith.constant 0 : index
    %c0_392 = arith.constant 0 : index
    %610 = vector.load %arg17[%c8_390, %c0_391, %c0_392] : memref<9x1x128xf32, #tpu.memory_space<vmem>>, vector<1x1x128xf32>
    %611 = vector.shape_cast %610 : vector<1x1x128xf32> to vector<1x128xf32>
    %612 = vector.broadcast %611 : vector<1x128xf32> to vector<2x128xf32>
    %613 = arith.mulf %609, %612 : vector<2x128xf32>
    %c8_393 = arith.constant 8 : index
    %c0_394 = arith.constant 0 : index
    %c0_395 = arith.constant 0 : index
    %614 = vector.load %arg18[%c8_393, %c0_394, %c0_395] : memref<9x1x128xf32, #tpu.memory_space<vmem>>, vector<1x1x128xf32>
    %615 = vector.shape_cast %614 : vector<1x1x128xf32> to vector<1x128xf32>
    %616 = vector.broadcast %615 : vector<1x128xf32> to vector<2x128xf32>
    %617 = arith.addf %613, %616 : vector<2x128xf32>
    %cst_396 = arith.constant 0.000000e+00 : f32
    %618 = vector.broadcast %cst_396 : f32 to vector<2x128xf32>
    %619 = arith.maximumf %617, %618 : vector<2x128xf32>
    %c8_397 = arith.constant 8 : index
    %c0_398 = arith.constant 0 : index
    %c0_399 = arith.constant 0 : index
    %620 = vector.load %arg19[%c8_397, %c0_398, %c0_399] : memref<9x128x128xf32, #tpu.memory_space<vmem>>, vector<1x128x128xf32>
    %621 = vector.shape_cast %620 : vector<1x128x128xf32> to vector<128x128xf32>
    %cst_400 = arith.constant dense<0.000000e+00> : vector<2x128xf32>
    %622 = tpu.matmul %619, %621, %cst_400 {dimension_numbers = #tpu.dot_dimension_numbers<[1], [0], [0], [1], [0, 0, 1, 1], [], []>} : vector<2x128xf32>, vector<128x128xf32>, vector<2x128xf32> -> vector<2x128xf32>
    %c8_401 = arith.constant 8 : index
    %c0_402 = arith.constant 0 : index
    %c0_403 = arith.constant 0 : index
    %623 = vector.load %arg20[%c8_401, %c0_402, %c0_403] : memref<9x1x128xf32, #tpu.memory_space<vmem>>, vector<1x1x128xf32>
    %624 = vector.shape_cast %623 : vector<1x1x128xf32> to vector<1x128xf32>
    %625 = vector.broadcast %624 : vector<1x128xf32> to vector<2x128xf32>
    %626 = arith.addf %622, %625 : vector<2x128xf32>
    %cst_404 = arith.constant 0.000000e+00 : f32
    %627 = vector.broadcast %cst_404 : f32 to vector<2x128xf32>
    %628 = arith.maximumf %626, %627 : vector<2x128xf32>
    %c0_405 = arith.constant 0 : index
    %c0_406 = arith.constant 0 : index
    %629 = vector.load %arg21[%c0_405, %c0_406] : memref<128x10xf32, #tpu.memory_space<vmem>>, vector<128x10xf32>
    %cst_407 = arith.constant dense<0.000000e+00> : vector<2x10xf32>
    %630 = tpu.matmul %628, %629, %cst_407 {dimension_numbers = #tpu.dot_dimension_numbers<[1], [0], [0], [1], [0, 0, 1, 1], [], []>} : vector<2x128xf32>, vector<128x10xf32>, vector<2x10xf32> -> vector<2x10xf32>
    %c0_408 = arith.constant 0 : index
    %c0_409 = arith.constant 0 : index
    %631 = vector.load %arg22[%c0_408, %c0_409] : memref<1x10xf32, #tpu.memory_space<vmem>>, vector<1x10xf32>
    %632 = vector.broadcast %631 : vector<1x10xf32> to vector<2x10xf32>
    %633 = arith.addf %630, %632 : vector<2x10xf32>
    %c0_410 = arith.constant 0 : index
    %c0_411 = arith.constant 0 : index
    %634 = vector.load %arg23[%c0_410, %c0_411] : memref<2x10xf32, #tpu.memory_space<vmem>>, vector<2x10xf32>
    tpu.vector_store %arg23[%c0_410, %c0_411], %633 {strides = array<i32>} : memref<2x10xf32, #tpu.memory_space<vmem>>, vector<2x10xf32>,
    return
  }
}

</mosaic_0001>

<bundles_post_ra>
// kernel: forward.2
= control target key start
LH: loop header
LB: loop body
LE: loop exit
PB: predicated region body
PF: predicated region fallthrough
CT: control target
= control target key end

     0   :  { %s799_s12 = smov 0   ;;  %s801_s13 = smov 0   ;;  %s959_s0 = inlined_call_operand.vmem [shape: bf16[128,1024], index: 0, kind: input, shape index: {}]   ;;  %s960_s1 = inlined_call_operand.vmem [shape: bf16[4,128], index: 1, kind: input, shape index: {}]   ;;  %s961_s2 = inlined_call_operand.vmem [shape: f32[4,1], index: 2, kind: input, shape index: {}]   ;;  %s962_s3 = inlined_call_operand.vmem [shape: bf16[4,1024], index: 3, kind: output, shape index: {}]  }
   0x1   :  { %s803_s14 = smov 0  }
   0x2 LB: > { %s630_s15 = sadd.s32 4294967295, %s775_s14   ;;  %s816_s16 = sadd.s32 1, %s775_s14   ;;  %s775_s14 = sphi %s803_s14, %s965_s14   ;;  %s771_s13 = sphi %s801_s13, %s964_s13   ;;  %s767_s12 = sphi %s799_s12, %s963_s12  }
   0x3   : > { %s17_s17 = ssub.s32 %s775_s14, %s816_s16  ;;  %s20_s18 = sadd.s32 1, %s771_s13 }
   0x4   : > { %p18_p0 = scmp.eq.s32.totalorder %s17_s17, 0  ;;  %p27_p1 = scmp.ne.s32.totalorder %s771_s13, %s767_s12 }
   0x5   : > { %p28_p2 = scmp.eq.s32.totalorder %s775_s14, 0  ;;  %p633_p4 = scmp.ge.s32.totalorder %s775_s14, 2 }
   0x6   : > { %s825_s19 = scalar_select %p18_p0, %s771_s13, %s20_s18  }
   0x7   : > { %p29_p3 = por %p28_p2, %p27_p1  ;;  %127 = sbr.rel (%p633_p4) target bundleno = 34 (0x22), region = 24 }
   0xe   : > { %130 = sbr.rel (!%p29_p3) target bundleno = 34 (0x22), region = 28  ;;  %s132_s20 = sand.u32 (%p29_p3), 1, %s771_s13  }
   0xf   : > { %s677_s21 = sshll.u32 (%p29_p3), %s775_s14, 4  ;;  %s634_s22 = sshll.u32 (%p29_p3), %s132_s20, 8 }
  0x10   : > { %s833_s25 = scalar_lea.vmem (%p29_p3), %s959_s0, %s677_s21  ;;  %s838_s26 = scalar_lea.vmem (%p29_p3), [#allocation2], %s634_s22 }
  0x11   : > { %v150_v0 = vld [vmem:[%s833_s25] sm:$0xff] (%p29_p3)  ;;  %v152_v1 = vld [vmem:[%s833_s25 + $0x8] sm:$0xff] (%p29_p3) }
  0x12   : > { %v154_v2 = vld [vmem:[%s833_s25 + $0x20] sm:$0xff] (%p29_p3)  ;;  %151 = vst [vmem:[%s838_s26] sm:$0xff] (%p29_p3), %v150_v0  ;;  %153 = vst [vmem:[%s838_s26 + $0x8] sm:$0xff] (%p29_p3), %v152_v1  ;;  %v156_v3 = vld [vmem:[%s833_s25 + $0x28] sm:$0xff] (%p29_p3) }
  0x13   : > { %155 = vst [vmem:[%s838_s26 + $0x10] sm:$0xff] (%p29_p3), %v154_v2  ;;  %v158_v4 = vld [vmem:[%s833_s25 + $0x40] sm:$0xff] (%p29_p3)  ;;  %v160_v5 = vld [vmem:[%s833_s25 + $0x48] sm:$0xff] (%p29_p3)  ;;  %157 = vst [vmem:[%s838_s26 + $0x18] sm:$0xff] (%p29_p3), %v156_v3 }
  0x14   : > { %159 = vst [vmem:[%s838_s26 + $0x20] sm:$0xff] (%p29_p3), %v158_v4  ;;  %161 = vst [vmem:[%s838_s26 + $0x28] sm:$0xff] (%p29_p3), %v160_v5  ;;  %v162_v6 = vld [vmem:[%s833_s25 + $0x60] sm:$0xff] (%p29_p3)  ;;  %v164_v7 = vld [vmem:[%s833_s25 + $0x68] sm:$0xff] (%p29_p3) }
  0x15   : > { %v166_v8 = vld [vmem:[%s833_s25 + $0x80] sm:$0xff]  ;;  %163 = vst [vmem:[%s838_s26 + $0x30] sm:$0xff] %v162_v6  ;;  %165 = vst [vmem:[%s838_s26 + $0x38] sm:$0xff] %v164_v7  ;;  %v168_v9 = vld [vmem:[%s833_s25 + $0x88] sm:$0xff] }
  0x16   : > { %167 = vst [vmem:[%s838_s26 + $0x40] sm:$0xff] %v166_v8  ;;  %v170_v10 = vld [vmem:[%s833_s25 + $0xa0] sm:$0xff]  ;;  %v172_v11 = vld [vmem:[%s833_s25 + $0xa8] sm:$0xff]  ;;  %169 = vst [vmem:[%s838_s26 + $0x48] sm:$0xff] %v168_v9 }
  0x17   : > { %171 = vst [vmem:[%s838_s26 + $0x50] sm:$0xff] %v170_v10  ;;  %173 = vst [vmem:[%s838_s26 + $0x58] sm:$0xff] %v172_v11  ;;  %v174_v12 = vld [vmem:[%s833_s25 + $0xc0] sm:$0xff]  ;;  %v176_v13 = vld [vmem:[%s833_s25 + $0xc8] sm:$0xff] }
  0x18   : > { %v178_v14 = vld [vmem:[%s833_s25 + $0xe0] sm:$0xff]  ;;  %175 = vst [vmem:[%s838_s26 + $0x60] sm:$0xff] %v174_v12  ;;  %177 = vst [vmem:[%s838_s26 + $0x68] sm:$0xff] %v176_v13  ;;  %v180_v15 = vld [vmem:[%s833_s25 + $0xe8] sm:$0xff] }
  0x19   : > { %179 = vst [vmem:[%s838_s26 + $0x70] sm:$0xff] %v178_v14  ;;  %v182_v16 = vld [vmem:[%s833_s25 + $0x100] sm:$0xff]  ;;  %v184_v17 = vld [vmem:[%s833_s25 + $0x108] sm:$0xff]  ;;  %181 = vst [vmem:[%s838_s26 + $0x78] sm:$0xff] %v180_v15 }
  0x1a   : > { %183 = vst [vmem:[%s838_s26 + $0x80] sm:$0xff] %v182_v16  ;;  %185 = vst [vmem:[%s838_s26 + $0x88] sm:$0xff] %v184_v17  ;;  %v186_v18 = vld [vmem:[%s833_s25 + $0x120] sm:$0xff]  ;;  %v188_v19 = vld [vmem:[%s833_s25 + $0x128] sm:$0xff] }
  0x1b   : > { %v190_v20 = vld [vmem:[%s833_s25 + $0x140] sm:$0xff]  ;;  %187 = vst [vmem:[%s838_s26 + $0x90] sm:$0xff] %v186_v18  ;;  %189 = vst [vmem:[%s838_s26 + $0x98] sm:$0xff] %v188_v19  ;;  %v192_v21 = vld [vmem:[%s833_s25 + $0x148] sm:$0xff] }
  0x1c   : > { %191 = vst [vmem:[%s838_s26 + $0xa0] sm:$0xff] %v190_v20  ;;  %v194_v22 = vld [vmem:[%s833_s25 + $0x160] sm:$0xff]  ;;  %v196_v23 = vld [vmem:[%s833_s25 + $0x168] sm:$0xff]  ;;  %193 = vst [vmem:[%s838_s26 + $0xa8] sm:$0xff] %v192_v21 }
  0x1d   : > { %195 = vst [vmem:[%s838_s26 + $0xb0] sm:$0xff] %v194_v22  ;;  %197 = vst [vmem:[%s838_s26 + $0xb8] sm:$0xff] %v196_v23  ;;  %v198_v24 = vld [vmem:[%s833_s25 + $0x180] sm:$0xff]  ;;  %v200_v25 = vld [vmem:[%s833_s25 + $0x188] sm:$0xff] }
  0x1e   : > { %v202_v26 = vld [vmem:[%s833_s25 + $0x1a0] sm:$0xff]  ;;  %199 = vst [vmem:[%s838_s26 + $0xc0] sm:$0xff] %v198_v24  ;;  %201 = vst [vmem:[%s838_s26 + $0xc8] sm:$0xff] %v200_v25  ;;  %v204_v27 = vld [vmem:[%s833_s25 + $0x1a8] sm:$0xff] }
  0x1f   : > { %203 = vst [vmem:[%s838_s26 + $0xd0] sm:$0xff] %v202_v26  ;;  %v206_v28 = vld [vmem:[%s833_s25 + $0x1c0] sm:$0xff]  ;;  %v208_v29 = vld [vmem:[%s833_s25 + $0x1c8] sm:$0xff]  ;;  %205 = vst [vmem:[%s838_s26 + $0xd8] sm:$0xff] %v204_v27 }
  0x20   : > { %207 = vst [vmem:[%s838_s26 + $0xe0] sm:$0xff] %v206_v28  ;;  %209 = vst [vmem:[%s838_s26 + $0xe8] sm:$0xff] %v208_v29  ;;  %v210_v30 = vld [vmem:[%s833_s25 + $0x1e0] sm:$0xff]  ;;  %v212_v31 = vld [vmem:[%s833_s25 + $0x1e8] sm:$0xff] }
  0x21   : > { %211 = vst [vmem:[%s838_s26 + $0xf0] sm:$0xff] %v210_v30  ;;  %213 = vst [vmem:[%s838_s26 + $0xf8] sm:$0xff] %v212_v31 }
  0x22 PF: > { %p637_p5 = scmp.ge.s32.totalorder %s775_s14, 1  ;;  %p218_p6 = scmp.lt.s32.totalorder %s775_s14, 3 }
  0x24   : > { %p219_p7 = pnand %p637_p5, %p218_p6 }
  0x25   : > { %s225_s27 = sand.u32 (!%p219_p7), 1, %s767_s12   ;;  %v289_v32 = vld [vmem:[%s961_s2] sm:$0xf] (!%p219_p7)  ;;  %v777_v33 = vmov (!%p219_p7), 0   ;;  %s639_s7 = sshll.u32 (!%p219_p7), %s630_s15, 2  ;;  %v554_v5 = vlaneseq (!%p219_p7) }
  0x26   : > { %222 = sbr.rel (%p219_p7) target bundleno = 297 (0x129), region = 51  ;;  %s638_s30 = sshll.u32 (!%p219_p7), %s225_s27, 8  ;;  %487 = vmatprep.mubr.bf16.mxu0 (!%p219_p7), %v777_v33  ;;  %528 = vmatprep.mubr.bf16.mxu1 (!%p219_p7), %v777_v33  ;;  %v256_v2 = vld [vmem:[%s960_s1] sm:$0x3] (!%p219_p7)  ;;  %v778_v3 = vmov (!%p219_p7), 1983009808  }
  0x27   : > { %704 = vset.pattern.permute.xlu0 (!%p219_p7), %v777_v33  ;;  %s907_s4 = scalar_lea.vmem (!%p219_p7), [#allocation2], %s638_s30  ;;  %v552_v4 = vunpack.c.l.s4 (!%p219_p7), %v778_v3  ;;  %p250_p8 = scmp.lt.s32.totalorder (!%p219_p7), %s639_s7, 7  ;;  %v555_v10 = vshrl.u32 (!%p219_p7), %v554_v5, 7 }
  0x28   : > { %v705_v34 = vld [vmem:[%s907_s4 + $0x4] ss:$16 sps:$4 sm:$0xff] (!%p219_p7)   ;;  %292 = vperm.xlu0 (!%p219_p7), %704, %v289_v32   ;;  %v707_v35 = vld [vmem:[%s907_s4 + $0xc] ss:$16 sps:$4 sm:$0xff] (!%p219_p7)   ;;  %v709_v36 = vld [vmem:[%s907_s4] ss:$16 sps:$4 sm:$0xff] (!%p219_p7)  }
  0x29   : > { %455 = vmatprep.subr.bf16.mxu0 (!%p219_p7), %v705_v34  ;;  %v710_v37 = vld [vmem:[%s907_s4 + $0x8] ss:$16 sps:$4 sm:$0xff] (!%p219_p7)   ;;  %496 = vmatprep.subr.bf16.mxu1 (!%p219_p7), %v707_v35  ;;  %v711_v38 = vld [vmem:[%s907_s4 + $0x24] ss:$16 sps:$4 sm:$0xff] (!%p219_p7)   ;;  %v713_v39 = vld [vmem:[%s907_s4 + $0x2c] ss:$16 sps:$4 sm:$0xff] (!%p219_p7)   ;;  %v553_v9 = vunpack.c.0.s8 (!%p219_p7), %v552_v4 }
  0x2a   : > { %456 = vmatpush1.bf16.msra.mxu0 (!%p219_p7), %v709_v36  ;;  %497 = vmatpush1.bf16.msra.mxu1 (!%p219_p7), %v710_v37  ;;  %v715_v40 = vld [vmem:[%s907_s4 + $0x20] ss:$16 sps:$4 sm:$0xff] (!%p219_p7)   ;;  %v716_v41 = vld [vmem:[%s907_s4 + $0x28] ss:$16 sps:$4 sm:$0xff] (!%p219_p7)   ;;  %v717_v42 = vld [vmem:[%s907_s4 + $0x44] ss:$16 sps:$4 sm:$0xff] (!%p219_p7)  }
  0x2b   : > { %457 = vmatprep.subr.bf16.mxu0 (!%p219_p7), %v711_v38  ;;  %498 = vmatprep.subr.bf16.mxu1 (!%p219_p7), %v713_v39  ;;  %v719_v43 = vld [vmem:[%s907_s4 + $0x4c] ss:$16 sps:$4 sm:$0xff] (!%p219_p7)   ;;  %v721_v44 = vld [vmem:[%s907_s4 + $0x40] ss:$16 sps:$4 sm:$0xff] (!%p219_p7)   ;;  %v722_v45 = vld [vmem:[%s907_s4 + $0x48] ss:$16 sps:$4 sm:$0xff] (!%p219_p7)   ;;  %v556_v24 = vsub.s32 (!%p219_p7), %v553_v9, %v555_v10 }
  0x2c   : > { %v723_v46 = vld [vmem:[%s907_s4 + $0x64] ss:$16 sps:$4 sm:$0xff] (!%p219_p7)   ;;  %v725_v47 = vld [vmem:[%s907_s4 + $0x6c] ss:$16 sps:$4 sm:$0xff] (!%p219_p7)   ;;  %v727_v48 = vld [vmem:[%s907_s4 + $0x60] ss:$16 sps:$4 sm:$0xff] (!%p219_p7)  }
  0x2d   : > { %v728_v49 = vld [vmem:[%s907_s4 + $0x68] ss:$16 sps:$4 sm:$0xff]   ;;  %v729_v50 = vld [vmem:[%s907_s4 + $0x84] ss:$16 sps:$4 sm:$0xff]   ;;  %v731_v51 = vld [vmem:[%s907_s4 + $0x8c] ss:$16 sps:$4 sm:$0xff]  }
  0x2e   : > { %458 = vmatpush1.bf16.msra.mxu0 %v715_v40  ;;  %499 = vmatpush1.bf16.msra.mxu1 %v716_v41  ;;  %v733_v52 = vld [vmem:[%s907_s4 + $0x80] ss:$16 sps:$4 sm:$0xff]   ;;  %v734_v53 = vld [vmem:[%s907_s4 + $0x88] ss:$16 sps:$4 sm:$0xff]   ;;  %v735_v54 = vld [vmem:[%s907_s4 + $0xa4] ss:$16 sps:$4 sm:$0xff]  }
  0x2f   : > { %459 = vmatprep.subr.bf16.mxu0 %v717_v42  ;;  %500 = vmatprep.subr.bf16.mxu1 %v719_v43  ;;  %v737_v55 = vld [vmem:[%s907_s4 + $0xac] ss:$16 sps:$4 sm:$0xff]   ;;  %v739_v56 = vld [vmem:[%s907_s4 + $0xa0] ss:$16 sps:$4 sm:$0xff]   ;;  %v740_v57 = vld [vmem:[%s907_s4 + $0xa8] ss:$16 sps:$4 sm:$0xff]  }
  0x30   : > { %v741_v58 = vld [vmem:[%s907_s4 + $0xc4] ss:$16 sps:$4 sm:$0xff]   ;;  %v743_v59 = vld [vmem:[%s907_s4 + $0xcc] ss:$16 sps:$4 sm:$0xff]   ;;  %v745_v60 = vld [vmem:[%s907_s4 + $0xc0] ss:$16 sps:$4 sm:$0xff]  }
  0x31   : > { %v746_v61 = vld [vmem:[%s907_s4 + $0xc8] ss:$16 sps:$4 sm:$0xff]   ;;  %v747_v62 = vld [vmem:[%s907_s4 + $0xe4] ss:$16 sps:$4 sm:$0xff]   ;;  %v749_v63 = vld [vmem:[%s907_s4 + $0xec] ss:$16 sps:$4 sm:$0xff]  }
  0x32   : > { %460 = vmatpush1.bf16.msra.mxu0 %v721_v44  ;;  %501 = vmatpush1.bf16.msra.mxu1 %v722_v45  ;;  %v751_v0 = vld [vmem:[%s907_s4 + $0xe0] ss:$16 sps:$4 sm:$0xff]   ;;  %v752_v1 = vld [vmem:[%s907_s4 + $0xe8] ss:$16 sps:$4 sm:$0xff]   ;;  %s967_s7 = smov (!%p250_p8, %s639_s7), 7 }
  0x33   : > { %461 = vmatprep.subr.bf16.mxu0 %v723_v46  ;;  %502 = vmatprep.subr.bf16.mxu1 %v725_v47  ;;  %s640_s8 = sshll.u32 %s967_s7, 1 }
  0x34   : > { %s253_s11 = scalar_lea.vmem %s962_s3, %s640_s8 }
  0x36   : > { %462 = vmatpush1.bf16.msra.mxu0 %v727_v48  ;;  %503 = vmatpush1.bf16.msra.mxu1 %v728_v49 }
  0x37   : > { %463 = vmatprep.subr.bf16.mxu0 %v729_v50  ;;  %504 = vmatprep.subr.bf16.mxu1 %v731_v51 }
  0x3a   : > { %464 = vmatpush1.bf16.msra.mxu0 %v733_v52  ;;  %505 = vmatpush1.bf16.msra.mxu1 %v734_v53 }
  0x3b   : > { %465 = vmatprep.subr.bf16.mxu0 %v735_v54  ;;  %506 = vmatprep.subr.bf16.mxu1 %v737_v55 }
  0x3e   : > { %466 = vmatpush1.bf16.msra.mxu0 %v739_v56  ;;  %507 = vmatpush1.bf16.msra.mxu1 %v740_v57 }
  0x3f   : > { %467 = vmatprep.subr.bf16.mxu0 %v741_v58  ;;  %508 = vmatprep.subr.bf16.mxu1 %v743_v59 }
  0x42   : > { %468 = vmatpush1.bf16.msra.mxu0 %v745_v60  ;;  %509 = vmatpush1.bf16.msra.mxu1 %v746_v61 }
  0x43   : > { %469 = vmatprep.subr.bf16.mxu0 %v747_v62  ;;  %510 = vmatprep.subr.bf16.mxu1 %v749_v63 }
  0x46   : > { %470 = vmatpush1.bf16.msra.mxu0 %v751_v0  ;;  %511 = vmatpush1.bf16.msra.mxu1 %v752_v1 }
  0x49   : > { %488 = vmatmul.mubr.bf16.vlgmr.msra.gmra.mrb[0].mxu0 %v256_v2  ;;  %529 = vmatmul.mubr.bf16.vlgmr.msra.gmra.mrb[0].mxu1 %v256_v2 }
  0xa7   : > { %v293_v6 = vpop.permute.xlu0 %292 }
 0x11c   : > { %v489_v7 = vpop.f32.mrb[0].mxu0  ;;  %v530_v8 = vpop.f32.mrb[0].mxu1 }
 0x11d   : > { %v490_v11 = vadd.f32 %v489_v7, %v293_v6  ;;  %v531_v12 = vadd.f32 %v530_v8, %v293_v6  ;;  %v491_v13 = vpop.f32.mrb[1].mxu0  ;;  %v532_v14 = vpop.f32.mrb[1].mxu1 }
 0x11e   : > { %v492_v15 = vadd.f32 %v491_v13, %v293_v6  ;;  %v533_v16 = vadd.f32 %v532_v14, %v293_v6  ;;  %v493_v17 = vpop.f32.mrb[2].mxu0  ;;  %v534_v18 = vpop.f32.mrb[2].mxu1 }
 0x11f   : > { %v537_v19 = vmax.f32 %v490_v11, 0.0  ;;  %v539_v20 = vmax.f32 %v531_v12, 0.0  ;;  %v494_v21 = vpop.f32.mrb[3].mxu0  ;;  %v535_v22 = vpop.f32.mrb[3].mxu1 }
 0x120   : > { %v538_v23 = vmax.f32 %v492_v15, 0.0  ;;  %v540_v25 = vmax.f32 %v533_v16, 0.0 }
 0x122   : > { %v673_v26 = vpack.c.bf16 %v538_v23, %v537_v19  ;;  %v674_v27 = vpack.c.bf16 %v540_v25, %v539_v20 }
 0x124   : > { %v557_v28 = vrot.slane %v673_v26, %v556_v24  ;;  %v564_v29 = vrot.slane %v674_v27, %v556_v24 }
 0x126   : > { %v565_v30 = vcombine.low %v557_v28, %v564_v29 }
 0x128   : > { %567 = vst [vmem:[%s253_s11] sm:$0xff] %v565_v30 }
 0x129 PF: > { %p10_p9 = scmp.ge.s32.totalorder %s816_s16, 4   ;;  %s963_s12 = smov %s771_s13 }
 0x12a   : > { %s964_s13 = smov %s825_s19  ;;  %s965_s14 = smov %s816_s16 }
 0x12b   :  { %12 = sbr.rel (!%p10_p9) target bundleno = 2 (0x2), region = 90 }

// kernel: forward.3
= control target key start
LH: loop header
LB: loop body
LE: loop exit
PB: predicated region body
PF: predicated region fallthrough
CT: control target
= control target key end

     0   :  { %s4885_s0 = inlined_call_operand.vmem [shape: bf16[27,4,128], index: 0, kind: input, shape index: {}]   ;;  %s4886_s1 = inlined_call_operand.vmem [shape: f32[27,4,1], index: 1, kind: input, shape index: {}]   ;;  %s4887_s2 = inlined_call_operand.vmem [shape: f32[4,1], index: 2, kind: input, shape index: {}]   ;;  %s4888_s3 = inlined_call_operand.vmem [shape: f32[8,4], index: 3, kind: input, shape index: {}]   ;;  %s4889_s4 = inlined_call_operand.vmem [shape: f32[8,1], index: 4, kind: input, shape index: {}]   ;;  %s4890_s5 = inlined_call_operand.vmem [shape: f32[16,8,128], index: 5, kind: input, shape index: {}]   ;;  %s4891_s6 = inlined_call_operand.vmem [shape: f32[1,8], index: 6, kind: input, shape index: {}]   ;;  %s4892_s7 = inlined_call_operand.vmem [shape: f32[8,16], index: 7, kind: input, shape index: {}]   ;;  %s4893_s8 = inlined_call_operand.vmem [shape: f32[1,16], index: 8, kind: input, shape index: {}]   ;;  %s4894_s9 = inlined_call_operand.vmem [shape: f32[16,16,16], index: 9, kind: input, shape index: {}]   ;;  %s4895_s10 = inlined_call_operand.vmem [shape: f32[1,16], index: 10, kind: input, shape index: {}]   ;;  %s4896_s11 = inlined_call_operand.vmem [shape: f32[16,16], index: 11, kind: input, shape index: {}]   ;;  %s4897_s12 = inlined_call_operand.vmem [shape: f32[1,16], index: 12, kind: input, shape index: {}]   ;;  %s4898_s13 = inlined_call_operand.vmem [shape: f32[16,2,16], index: 13, kind: input, shape index: {}]   ;;  %s4899_s14 = inlined_call_operand.vmem [shape: f32[1,16], index: 14, kind: input, shape index: {}]   ;;  %s4900_s15 = inlined_call_operand.vmem [shape: f32[16,128], index: 15, kind: input, shape index: {}]   ;;  %s4901_s16 = inlined_call_operand.vmem [shape: f32[1,128], index: 16, kind: input, shape index: {}]   ;;  %s4902_s17 = inlined_call_operand.vmem [shape: f32[9,1,128], index: 17, kind: input, shape index: {}]   ;;  %s4903_s18 = inlined_call_operand.vmem [shape: f32[9,1,128], index: 18, kind: input, shape index: {}]   ;;  %s4904_s19 = inlined_call_operand.vmem [shape: f32[9,128,128], index: 19, kind: input, shape index: {}]   ;;  %s4905_s20 = inlined_call_operand.vmem [shape: f32[9,1,128], index: 20, kind: input, shape index: {}]   ;;  %s4906_s21 = inlined_call_operand.vmem [shape: f32[128,10], index: 21, kind: input, shape index: {}]   ;;  %s4907_s22 = inlined_call_operand.vmem [shape: f32[1,10], index: 22, kind: input, shape index: {}]   ;;  %s4908_s23 = inlined_call_operand.hbm [shape: f32[2,10], index: 23, kind: output, shape index: {}]  }
   0x1   :  { %4912 = sst [smem:[#allocation5_spill]] %s4885_s0 }
   0x2   :  { %4913 = sst [smem:[#allocation6_spill]] %s4886_s1 }
   0x3   :  { %4914 = sst [smem:[#allocation7_spill]] %s4887_s2 }
   0x4   :  { %4915 = sst [smem:[#allocation8_spill]] %s4888_s3 }
   0x5   :  { %4916 = sst [smem:[#allocation9_spill]] %s4889_s4 }
   0x6   :  { %4917 = sst [smem:[#allocation10_spill]] %s4890_s5 }
   0x7   :  { %4918 = sst [smem:[#allocation11_spill]] %s4891_s6 }
   0x8   :  { %4919 = sst [smem:[#allocation12_spill]] %s4892_s7 }
   0x9   :  { %s4920_s24 = sld [smem:[#allocation6_spill]]  ;;  %v3596_v2 = vmov 0  }
   0xa   :  { %3571 = vset.pattern.permute.xlu1 %v3596_v2  ;;  %3570 = vset.pattern.permute.xlu0 %v3596_v2 }
   0xf   :  { %v2475_v0 = vld [vmem:[%s4920_s24 + $0x8] sm:$0xf]  ;;  %v77_v1 = vld [vmem:[%s4920_s24] sm:$0xf]  ;;  %v2477_v3 = vld [vmem:[%s4920_s24 + $0xc] sm:$0xf] }
  0x10   :  { %103 = vperm.xlu1 %3571, %v2475_v0   ;;  %80 = vperm.xlu0 %3570, %v77_v1   ;;  %v2473_v4 = vld [vmem:[%s4920_s24 + $0x4] sm:$0xf]  ;;  %v2481_v5 = vld [vmem:[%s4920_s24 + $0x14] sm:$0xf]  ;;  %v2479_v6 = vld [vmem:[%s4920_s24 + $0x10] sm:$0xf] }
  0x11   :  { %v2485_v7 = vld [vmem:[%s4920_s24 + $0x1c] sm:$0xf]  ;;  %v2483_v8 = vld [vmem:[%s4920_s24 + $0x18] sm:$0xf] }
  0x14   :  { %115 = vperm.xlu1 %3571, %v2477_v3   ;;  %91 = vperm.xlu0 %3570, %v2473_v4  }
  0x18   :  { %139 = vperm.xlu1 %3571, %v2481_v5   ;;  %127 = vperm.xlu0 %3570, %v2479_v6  }
  0x19   :  { %28 = vsyncpa [#allocation3], 0  ;;  %v2489_v9 = vld [vmem:[%s4920_s24 + $0x24] sm:$0xf]  ;;  %v2487_v10 = vld [vmem:[%s4920_s24 + $0x20] sm:$0xf] }
  0x1a   :  { %v2493_v11 = vld [vmem:[%s4920_s24 + $0x2c] sm:$0xf]  ;;  %v2491_v12 = vld [vmem:[%s4920_s24 + $0x28] sm:$0xf]  ;;  %v2497_v13 = vld [vmem:[%s4920_s24 + $0x34] sm:$0xf] }
  0x1b   :  { %v2495_v14 = vld [vmem:[%s4920_s24 + $0x30] sm:$0xf]  ;;  %v2501_v15 = vld [vmem:[%s4920_s24 + $0x3c] sm:$0xf]  ;;  %v2499_v16 = vld [vmem:[%s4920_s24 + $0x38] sm:$0xf] }
  0x1c   :  { %163 = vperm.xlu1 %3571, %v2485_v7   ;;  %151 = vperm.xlu0 %3570, %v2483_v8   ;;  %v2505_v17 = vld [vmem:[%s4920_s24 + $0x44] sm:$0xf]  ;;  %v2503_v18 = vld [vmem:[%s4920_s24 + $0x40] sm:$0xf]  ;;  %v2509_v19 = vld [vmem:[%s4920_s24 + $0x4c] sm:$0xf] }
  0x1d   :  { %v2507_v20 = vld [vmem:[%s4920_s24 + $0x48] sm:$0xf]  ;;  %v2513_v21 = vld [vmem:[%s4920_s24 + $0x54] sm:$0xf]  ;;  %v2511_v22 = vld [vmem:[%s4920_s24 + $0x50] sm:$0xf] }
  0x1e   :  { %v2517_v23 = vld [vmem:[%s4920_s24 + $0x5c] sm:$0xf]  ;;  %v2515_v24 = vld [vmem:[%s4920_s24 + $0x58] sm:$0xf]  ;;  %v2521_v25 = vld [vmem:[%s4920_s24 + $0x64] sm:$0xf] }
  0x1f   :  { %v2519_v26 = vld [vmem:[%s4920_s24 + $0x60] sm:$0xf]  ;;  %s4921_s3 = sld [smem:[#allocation7_spill]]  ;;  %v2523_v28 = vld [vmem:[%s4920_s24 + $0x68] sm:$0xf]  ;;  %s4922_s5 = sld [smem:[#allocation9_spill]] }
  0x20   :  { %187 = vperm.xlu1 %3571, %v2489_v9   ;;  %175 = vperm.xlu0 %3570, %v2487_v10   ;;  %v3597_v30 = vmov 0.0   ;;  %vm3598_vm0 = vmmov 0   ;;  %s4923_s2 = sld [smem:[#allocation5_spill]]  ;;  %vm415_vm1 = vcmask 1043456   ;;  %vm411_vm2 = vcmask 31744   ;;  %s4925_s6 = sld [smem:[#allocation10_spill]] }
  0x21   :  { %2944 = vmatprep.subr.mxu0 %v3597_v30  ;;  %2946 = vmatprep.mubr.msk.f32.mxu0 %vm3598_vm0, %v3597_v30  ;;  %s4926_s29 = sld [smem:[#allocation11_spill]]  ;;  %s4927_s0 = sld [smem:[#allocation12_spill]]  ;;  %vm734_vm3 = vcmask 1041409   ;;  %vm736_vm4 = vcmask 1042434   ;;  %vm738_vm5 = vcmask 1043459   ;;  %vm740_vm6 = vcmask 1044484  }
  0x22   :  { %vm742_vm7 = vcmask 1045509   ;;  %vm744_vm8 = vcmask 1046534   ;;  %vm746_vm9 = vcmask 1047559   ;;  %vm755_vm10 = vcmask 64512  }
  0x23   :  { %vm1030_vm11 = vcmask 130048   ;;  %vm2456_vm12 = vcmask 74752  }
  0x24   :  { %211 = vperm.xlu1 %3571, %v2493_v11   ;;  %199 = vperm.xlu0 %3570, %v2491_v12  }
  0x25   :  { %v396_v27 = vld [vmem:[%s4921_s3] sm:$0xf] }
  0x26   :  { %v405_v29 = vld [vmem:[%s4922_s5] sm:$0xff]  ;;  %v2478_v42 = vld [vmem:[%s4923_s2 + $0x8] sm:$0x3]  ;;  %v2480_v46 = vld [vmem:[%s4923_s2 + $0xa] sm:$0x3] }
  0x27   :  { %v75_v31 = vld [vmem:[%s4923_s2] sm:$0x3]  ;;  %v2472_v32 = vld [vmem:[%s4923_s2 + $0x2] sm:$0x3]  ;;  %v2474_v33 = vld [vmem:[%s4923_s2 + $0x4] sm:$0x3]  ;;  %v122_v49 = vunpack.c.l.bf16 %v2478_v42  ;;  %v134_v55 = vunpack.c.l.bf16 %v2480_v46 }
  0x28   :  { %235 = vperm.xlu1 %3571, %v2497_v13   ;;  %223 = vperm.xlu0 %3570, %v2495_v14   ;;  %v76_v36 = vunpack.c.l.bf16 %v75_v31  ;;  %v86_v37 = vunpack.c.l.bf16 %v2472_v32  ;;  %v2476_v38 = vld [vmem:[%s4923_s2 + $0x6] sm:$0x3]  ;;  %v98_v39 = vunpack.c.l.bf16 %v2474_v33  ;;  %v2482_v52 = vld [vmem:[%s4923_s2 + $0xc] sm:$0x3]  ;;  %v2484_v56 = vld [vmem:[%s4923_s2 + $0xe] sm:$0x3] }
  0x29   :  { %v110_v44 = vunpack.c.l.bf16 %v2476_v38  ;;  %v146_v59 = vunpack.c.l.bf16 %v2482_v52  ;;  %v2486_v62 = vld [vmem:[%s4923_s2 + $0x10] sm:$0x3]  ;;  %v158_v1 = vunpack.c.l.bf16 %v2484_v56  ;;  %v2488_v2 = vld [vmem:[%s4923_s2 + $0x12] sm:$0x3]  ;;  %v2490_v8 = vld [vmem:[%s4923_s2 + $0x14] sm:$0x3] }
  0x2a   :  { %v170_v5 = vunpack.c.l.bf16 %v2486_v62  ;;  %v182_v11 = vunpack.c.l.bf16 %v2488_v2  ;;  %v2492_v12 = vld [vmem:[%s4923_s2 + $0x16] sm:$0x3]  ;;  %v2500_v33 = vld [vmem:[%s4923_s2 + $0x1e] sm:$0x3] }
  0x2b   :  { %v254_v42 = vunpack.c.l.bf16 %v2500_v33 }
  0x2c   :  { %259 = vperm.xlu1 %3571, %v2501_v15   ;;  %247 = vperm.xlu0 %3570, %v2499_v16   ;;  %v194_v15 = vunpack.c.l.bf16 %v2490_v8 }
  0x30   :  { %283 = vperm.xlu1 %3571, %v2505_v17   ;;  %271 = vperm.xlu0 %3570, %v2503_v18   ;;  %v2494_v18 = vld [vmem:[%s4923_s2 + $0x18] sm:$0x3] }
  0x34   :  { %307 = vperm.xlu1 %3571, %v2509_v19   ;;  %295 = vperm.xlu0 %3570, %v2507_v20  }
  0x38   :  { %331 = vperm.xlu1 %3571, %v2513_v21   ;;  %319 = vperm.xlu0 %3570, %v2511_v22   ;;  %v206_v21 = vunpack.c.l.bf16 %v2492_v12  ;;  %v2496_v22 = vld [vmem:[%s4923_s2 + $0x1a] sm:$0x3] }
  0x39   :  { %v230_v32 = vunpack.c.l.bf16 %v2496_v22 }
  0x3c   :  { %355 = vperm.xlu1 %3571, %v2517_v23   ;;  %343 = vperm.xlu0 %3570, %v2515_v24  }
  0x40   :  { %379 = vperm.xlu1 %3571, %v2521_v25   ;;  %367 = vperm.xlu0 %3570, %v2519_v26   ;;  %v218_v25 = vunpack.c.l.bf16 %v2494_v18 }
  0x44   :  { %399 = vperm.xlu1 %3571, %v396_v27   ;;  %391 = vperm.xlu0 %3570, %v2523_v28   ;;  %v2498_v28 = vld [vmem:[%s4923_s2 + $0x1c] sm:$0x3] }
  0x48   :  { %408 = vperm.xlu0 %3570, %v405_v29  }
  0x8f   :  { %v104_v34 = vpop.permute.xlu1 %103  ;;  %v81_v35 = vpop.permute.xlu0 %80 }
  0x90   :  { %v83_v43 = vmul.f32 %v81_v35, %v76_v36  ;;  %v106_v47 = vmul.f32 %v104_v34, %v98_v39  ;;  %v242_v36 = vunpack.c.l.bf16 %v2498_v28  ;;  %v2502_v39 = vld [vmem:[%s4923_s2 + $0x20] sm:$0x3] }
  0x91   :  { %v266_v46 = vunpack.c.l.bf16 %v2502_v39 }
  0x93   :  { %v116_v40 = vpop.permute.xlu1 %115  ;;  %v92_v41 = vpop.permute.xlu0 %91 }
  0x94   :  { %v94_v45 = vmul.f32 %v92_v41, %v86_v37  ;;  %v118_v53 = vmul.f32 %v116_v40, %v110_v44 }
  0x96   :  { %v95_v48 = vadd.f32 %v94_v45, %v83_v43  ;;  %v2504_v43 = vld [vmem:[%s4923_s2 + $0x22] sm:$0x3] }
  0x97   :  { %v140_v50 = vpop.permute.xlu1 %139  ;;  %v128_v51 = vpop.permute.xlu0 %127  ;;  %v278_v52 = vunpack.c.l.bf16 %v2504_v43 }
  0x98   :  { %v107_v54 = vadd.f32 %v106_v47, %v95_v48  ;;  %v130_v58 = vmul.f32 %v128_v51, %v122_v49  ;;  %v142_v63 = vmul.f32 %v140_v50, %v134_v55  ;;  %v2506_v49 = vld [vmem:[%s4923_s2 + $0x24] sm:$0x3] }
  0x99   :  { %v290_v56 = vunpack.c.l.bf16 %v2506_v49 }
  0x9a   :  { %v119_v57 = vadd.f32 %v118_v53, %v107_v54  ;;  %v2508_v53 = vld [vmem:[%s4923_s2 + $0x26] sm:$0x3] }
  0x9b   :  { %v164_v60 = vpop.permute.xlu1 %163  ;;  %v152_v61 = vpop.permute.xlu0 %151  ;;  %v302_v62 = vunpack.c.l.bf16 %v2508_v53  ;;  %v498_v53 = vld [vmem:[%s4925_s6 + $0x40] sm:$0xff] }
  0x9c   :  { %v131_v0 = vadd.f32 %v130_v58, %v119_v57  ;;  %v154_v4 = vmul.f32 %v152_v61, %v146_v59  ;;  %v166_v9 = vmul.f32 %v164_v60, %v158_v1  ;;  %v2510_v59 = vld [vmem:[%s4923_s2 + $0x28] sm:$0x3] }
  0x9d   :  { %v314_v2 = vunpack.c.l.bf16 %v2510_v59 }
  0x9e   :  { %v143_v3 = vadd.f32 %v142_v63, %v131_v0  ;;  %v2512_v63 = vld [vmem:[%s4923_s2 + $0x2a] sm:$0x3] }
  0x9f   :  { %v188_v6 = vpop.permute.xlu1 %187  ;;  %v176_v7 = vpop.permute.xlu0 %175  ;;  %v326_v8 = vunpack.c.l.bf16 %v2512_v63 }
  0xa0   :  { %v155_v10 = vadd.f32 %v154_v4, %v143_v3  ;;  %v178_v14 = vmul.f32 %v176_v7, %v170_v5  ;;  %v190_v19 = vmul.f32 %v188_v6, %v182_v11  ;;  %v2514_v5 = vld [vmem:[%s4923_s2 + $0x2c] sm:$0x3] }
  0xa1   :  { %v338_v12 = vunpack.c.l.bf16 %v2514_v5  ;;  %v496_v5 = vld [vmem:[%s4925_s6 + $0x30] sm:$0xff] }
  0xa2   :  { %v167_v13 = vadd.f32 %v166_v9, %v155_v10  ;;  %v2516_v9 = vld [vmem:[%s4923_s2 + $0x2e] sm:$0x3] }
  0xa3   :  { %v212_v16 = vpop.permute.xlu1 %211  ;;  %v200_v17 = vpop.permute.xlu0 %199  ;;  %v350_v18 = vunpack.c.l.bf16 %v2516_v9  ;;  %v497_v9 = vld [vmem:[%s4925_s6 + $0x38] sm:$0xff] }
  0xa4   :  { %v179_v20 = vadd.f32 %v178_v14, %v167_v13  ;;  %v202_v24 = vmul.f32 %v200_v17, %v194_v15  ;;  %v214_v29 = vmul.f32 %v212_v16, %v206_v21  ;;  %v2518_v15 = vld [vmem:[%s4923_s2 + $0x30] sm:$0x3] }
  0xa5   :  { %v362_v22 = vunpack.c.l.bf16 %v2518_v15 }
  0xa6   :  { %v191_v23 = vadd.f32 %v190_v19, %v179_v20  ;;  %v2520_v19 = vld [vmem:[%s4923_s2 + $0x32] sm:$0x3] }
  0xa7   :  { %v236_v26 = vpop.permute.xlu1 %235  ;;  %v224_v27 = vpop.permute.xlu0 %223 }
  0xa8   :  { %v203_v31 = vadd.f32 %v202_v24, %v191_v23  ;;  %v226_v35 = vmul.f32 %v224_v27, %v218_v25  ;;  %v238_v40 = vmul.f32 %v236_v26, %v230_v32  ;;  %v2522_v24 = vld [vmem:[%s4923_s2 + $0x34] sm:$0x3]  ;;  %v374_v27 = vunpack.c.l.bf16 %v2520_v19  ;;  %s4924_s2 = sld [smem:[#allocation8_spill]] }
  0xa9   :  { %v386_v32 = vunpack.c.l.bf16 %v2522_v24 }
  0xaa   :  { %v215_v34 = vadd.f32 %v214_v29, %v203_v31 }
  0xab   :  { %v260_v37 = vpop.permute.xlu1 %259  ;;  %v248_v38 = vpop.permute.xlu0 %247 }
  0xac   :  { %v227_v41 = vadd.f32 %v226_v35, %v215_v34  ;;  %v250_v45 = vmul.f32 %v248_v38, %v242_v36  ;;  %v262_v50 = vmul.f32 %v260_v37, %v254_v42 }
  0xae   :  { %v239_v44 = vadd.f32 %v238_v40, %v227_v41  ;;  %v404_v42 = vld [vmem:[%s4924_s2] sm:$0xff] }
  0xaf   :  { %v284_v47 = vpop.permute.xlu1 %283  ;;  %v272_v48 = vpop.permute.xlu0 %271 }
  0xb0   :  { %v251_v51 = vadd.f32 %v250_v45, %v239_v44  ;;  %v274_v55 = vmul.f32 %v272_v48, %v266_v46  ;;  %v286_v60 = vmul.f32 %v284_v47, %v278_v52  ;;  %v491_v47 = vld [vmem:[%s4925_s6 + $0x8] sm:$0xff]  ;;  %v490_v48 = vld [vmem:[%s4925_s6] sm:$0xff]  ;;  %v492_v52 = vld [vmem:[%s4925_s6 + $0x10] sm:$0xff] }
  0xb2   :  { %v263_v54 = vadd.f32 %v262_v50, %v251_v51 }
  0xb3   :  { %v308_v57 = vpop.permute.xlu1 %307  ;;  %v296_v58 = vpop.permute.xlu0 %295 }
  0xb4   :  { %v275_v61 = vadd.f32 %v274_v55, %v263_v54  ;;  %v298_v1 = vmul.f32 %v296_v58, %v290_v56  ;;  %v310_v6 = vmul.f32 %v308_v57, %v302_v62  ;;  %v499_v56 = vld [vmem:[%s4925_s6 + $0x48] sm:$0xff]  ;;  %v493_v57 = vld [vmem:[%s4925_s6 + $0x18] sm:$0xff] }
  0xb6   :  { %v287_v0 = vadd.f32 %v286_v60, %v275_v61  ;;  %v500_v60 = vld [vmem:[%s4925_s6 + $0x50] sm:$0xff]  ;;  %v494_v61 = vld [vmem:[%s4925_s6 + $0x20] sm:$0xff] }
  0xb7   :  { %v332_v3 = vpop.permute.xlu1 %331  ;;  %v320_v4 = vpop.permute.xlu0 %319 }
  0xb8   :  { %v299_v7 = vadd.f32 %v298_v1, %v287_v0  ;;  %v322_v11 = vmul.f32 %v320_v4, %v314_v2  ;;  %v334_v16 = vmul.f32 %v332_v3, %v326_v8  ;;  %v501_v0 = vld [vmem:[%s4925_s6 + $0x58] sm:$0xff]  ;;  %v495_v1 = vld [vmem:[%s4925_s6 + $0x28] sm:$0xff]  ;;  %v502_v4 = vld [vmem:[%s4925_s6 + $0x60] sm:$0xff] }
  0xb9   :  { %v503_v8 = vld [vmem:[%s4925_s6 + $0x68] sm:$0xff] }
  0xba   :  { %v311_v10 = vadd.f32 %v310_v6, %v299_v7 }
  0xbb   :  { %v356_v13 = vpop.permute.xlu1 %355  ;;  %v344_v14 = vpop.permute.xlu0 %343 }
  0xbc   :  { %v323_v17 = vadd.f32 %v322_v11, %v311_v10  ;;  %v346_v21 = vmul.f32 %v344_v14, %v338_v12  ;;  %v358_v25 = vmul.f32 %v356_v13, %v350_v18  ;;  %v504_v12 = vld [vmem:[%s4925_s6 + $0x70] sm:$0xff]  ;;  %v505_v13 = vld [vmem:[%s4925_s6 + $0x78] sm:$0xff]  ;;  %s3600_s6 = smov [#allocation2]  }
  0xbd   :  { %s2464_s3 = sshll.u32 %s3600_s6, 4  ;;  %s2465_s3 = int_to_ptr.vmem [resolvable:$true] %s2464_s3 }
  0xbe   :  { %v335_v20 = vadd.f32 %v334_v16, %v323_v17  ;;  %v2526_v16 = vld [vmem:[%s4926_s29] ss:$0 sm:$0xff]  ;;  %p3577_p1 = scmp.lt.s32.totalorder %s2465_s3, %s2465_s3 }
  0xbf   :  { %v368_v23 = vpop.permute.xlu0 %367  ;;  %v380_v28 = vpop.permute.xlu1 %379 }
  0xc0   :  { %v347_v26 = vadd.f32 %v346_v21, %v335_v20  ;;  %v370_v31 = vmul.f32 %v368_v23, %v362_v22  ;;  %v382_v34 = vmul.f32 %v380_v28, %v374_v27 }
  0xc2   :  { %v359_v29 = vadd.f32 %v358_v25, %v347_v26 }
  0xc3   :  { %v392_v33 = vpop.permute.xlu0 %391  ;;  %v400_v39 = vpop.permute.xlu1 %399 }
  0xc4   :  { %v371_v35 = vadd.f32 %v370_v31, %v359_v29  ;;  %v394_v37 = vmul.f32 %v392_v33, %v386_v32 }
  0xc6   :  { %v383_v36 = vadd.f32 %v382_v34, %v371_v35 }
  0xc7   :  { %v409_v43 = vpop.permute.xlu0 %408 }
  0xc8   :  { %v395_v38 = vadd.f32 %v394_v37, %v383_v36 }
  0xca   :  { %v402_v40 = vadd.f32 %v400_v39, %v395_v38 }
  0xcc   :  { %v403_v41 = vmax.f32 %v402_v40, 0.0 }
  0xce   :  { %2945 = vmatpush3.msk.msra.mxu0 %vm415_vm1, %v403_v41 }
  0xcf   :  { %2947 = vmatmul.mubr.msk.f32.vlgmr.msra.gmra.mrb[0].mxu0 %vm411_vm2, %v404_v42 }
 0x1a2   :  { %v485_v44 = vpop.f32.mrb[0].mxu0 }
 0x1a3   :  { %v486_v45 = vadd.f32 %v485_v44, %v409_v43  ;;  %v2948_v46 = vpop.f32.mrb[1].mxu0 }
 0x1a5   :  { %v489_v49 = vmax.f32 %v486_v45, 0.0 }
 0x1a7   :  { %v507_v50 = vmul.f32 %v491_v47, %v489_v49  ;;  %v506_v51 = vmul.f32 %v490_v48, %v489_v49  ;;  %v508_v54 = vmul.f32 %v492_v52, %v489_v49  ;;  %v514_v55 = vmul.f32 %v498_v53, %v489_v49 }
 0x1a8   :  { %v515_v58 = vmul.f32 %v499_v56, %v489_v49  ;;  %v509_v59 = vmul.f32 %v493_v57, %v489_v49  ;;  %v516_v62 = vmul.f32 %v500_v60, %v489_v49  ;;  %v510_v63 = vmul.f32 %v494_v61, %v489_v49 }
 0x1a9   :  { %524 = vadd.xlane.f32.xlu0 %v507_v50  ;;  %522 = vadd.xlane.f32.xlu1 %v506_v51  ;;  %v517_v2 = vmul.f32 %v501_v0, %v489_v49  ;;  %v511_v3 = vmul.f32 %v495_v1, %v489_v49  ;;  %v518_v6 = vmul.f32 %v502_v4, %v489_v49 }
 0x1aa   :  { %v512_v7 = vmul.f32 %v496_v5, %v489_v49  ;;  %v519_v10 = vmul.f32 %v503_v8, %v489_v49  ;;  %v513_v11 = vmul.f32 %v497_v9, %v489_v49  ;;  %v520_v14 = vmul.f32 %v504_v12, %v489_v49 }
 0x1ab   :  { %v521_v15 = vmul.f32 %v505_v13, %v489_v49 }
 0x1ad   :  { %526 = vadd.xlane.f32.xlu0 %v508_v54  ;;  %538 = vadd.xlane.f32.xlu1 %v514_v55 }
 0x1b1   :  { %540 = vadd.xlane.f32.xlu0 %v515_v58  ;;  %528 = vadd.xlane.f32.xlu1 %v509_v59 }
 0x1b5   :  { %542 = vadd.xlane.f32.xlu0 %v516_v62  ;;  %530 = vadd.xlane.f32.xlu1 %v510_v63 }
 0x1b9   :  { %544 = vadd.xlane.f32.xlu0 %v517_v2  ;;  %532 = vadd.xlane.f32.xlu1 %v511_v3  ;;  %v596_v3 = vld [vmem:[%s4927_s0] sm:$0xff] }
 0x1ba   :  { %2949 = vmatprep.subr.mxu1 %v596_v3 }
 0x1bb   :  { %2950 = vmatpush3.msra.mxu1 %v596_v3  ;;  %v837_v3 = vld [vmem:[%s4894_s9] sm:$0xff] }
 0x1bd   :  { %546 = vadd.xlane.f32.xlu0 %v518_v6  ;;  %534 = vadd.xlane.f32.xlu1 %v512_v7 }
 0x1c1   :  { %548 = vadd.xlane.f32.xlu0 %v519_v10  ;;  %536 = vadd.xlane.f32.xlu1 %v513_v11  ;;  %v668_v10 = vlaneseq }
 0x1c3   :  { %v669_v13 = vand.u32 127, %v668_v10 }
 0x1c5   :  { %550 = vadd.xlane.f32.xlu0 %v520_v14  ;;  %552 = vadd.xlane.f32.xlu1 %v521_v15  ;;  %v3949_v14 = vshrl.u32 %v668_v10, 7 }
 0x1db   :  { %561 = vbcast.lane.b32.xlu0 %v2526_v16, 256 }
 0x236   :  { %v525_v17 = vpop.xlane.xlu0 %524  ;;  %v523_v22 = vpop.xlane.xlu1 %522 }
 0x23a   :  { %v527_v18 = vpop.xlane.xlu0 %526  ;;  %v539_v25 = vpop.xlane.xlu1 %538 }
 0x23e   :  { %v541_v19 = vpop.xlane.xlu0 %540  ;;  %v529_v27 = vpop.xlane.xlu1 %528 }
 0x242   :  { %v543_v20 = vpop.xlane.xlu0 %542  ;;  %v531_v36 = vpop.xlane.xlu1 %530 }
 0x246   :  { %v545_v21 = vpop.xlane.xlu0 %544  ;;  %v533_v45 = vpop.xlane.xlu1 %532 }
 0x24a   :  { %v547_v23 = vpop.xlane.xlu0 %546  ;;  %v535_v50 = vpop.xlane.xlu1 %534 }
 0x24e   :  { %v549_v24 = vpop.xlane.xlu0 %548  ;;  %v537_v59 = vpop.xlane.xlu1 %536 }
 0x252   :  { %v551_v26 = vpop.xlane.xlu0 %550  ;;  %v553_v63 = vpop.xlane.xlu1 %552 }
 0x256   :  { %v562_v28 = vpop.permute.xlu0 %561 }
 0x257   :  { %v566_v29 = vadd.f32 %v562_v28, %v527_v18  ;;  %v564_v31 = vadd.f32 %v562_v28, %v523_v22  ;;  %v573_v34 = vadd.f32 %v562_v28, %v541_v19  ;;  %v565_v35 = vadd.f32 %v562_v28, %v525_v17 }
 0x258   :  { %v574_v39 = vadd.f32 %v562_v28, %v543_v20  ;;  %v572_v40 = vadd.f32 %v562_v28, %v539_v25  ;;  %v575_v43 = vadd.f32 %v562_v28, %v545_v21  ;;  %v567_v44 = vadd.f32 %v562_v28, %v529_v27 }
 0x259   :  { %v582_v32 = vmax.f32 %v566_v29, 0.0  ;;  %v580_v33 = vmax.f32 %v564_v31, 0.0  ;;  %v589_v37 = vmax.f32 %v573_v34, 0.0  ;;  %v581_v38 = vmax.f32 %v565_v35, 0.0 }
 0x25a   :  { %v590_v41 = vmax.f32 %v574_v39, 0.0  ;;  %v588_v42 = vmax.f32 %v572_v40, 0.0  ;;  %v591_v46 = vmax.f32 %v575_v43, 0.0  ;;  %v583_v47 = vmax.f32 %v567_v44, 0.0 }
 0x25b   :  { %627 = vperm.xlu0 %3570, %v582_v32   ;;  %621 = vperm.xlu1 %3571, %v580_v33   ;;  %v576_v48 = vadd.f32 %v562_v28, %v547_v23  ;;  %v568_v49 = vadd.f32 %v562_v28, %v531_v36  ;;  %v577_v53 = vadd.f32 %v562_v28, %v549_v24 }
 0x25c   :  { %v569_v54 = vadd.f32 %v562_v28, %v533_v45  ;;  %v578_v57 = vadd.f32 %v562_v28, %v551_v26  ;;  %v570_v58 = vadd.f32 %v562_v28, %v535_v50  ;;  %v571_v62 = vadd.f32 %v562_v28, %v537_v59 }
 0x25d   :  { %v592_v51 = vmax.f32 %v576_v48, 0.0  ;;  %v584_v52 = vmax.f32 %v568_v49, 0.0  ;;  %v593_v55 = vmax.f32 %v577_v53, 0.0  ;;  %v579_v1 = vadd.f32 %v562_v28, %v553_v63 }
 0x25e   :  { %v585_v56 = vmax.f32 %v569_v54, 0.0  ;;  %v594_v60 = vmax.f32 %v578_v57, 0.0  ;;  %v586_v61 = vmax.f32 %v570_v58, 0.0  ;;  %v587_v0 = vmax.f32 %v571_v62, 0.0  ;;  %v2527_v58 = vld [vmem:[%s4893_s8] ss:$0 sm:$0xff] }
 0x25f   :  { %648 = vperm.xlu0 %3570, %v589_v37   ;;  %624 = vperm.xlu1 %3571, %v581_v38   ;;  %v595_v2 = vmax.f32 %v579_v1, 0.0  ;;  %v672_v17 = vsub.s32 %v669_v13, %v3949_v14  ;;  %v3978_v62 = vsub.s32 0, %v3949_v14  ;;  %v3981_v63 = vsub.s32 1, %v3949_v14 }
 0x260   :  { %v3987_v1 = vsub.s32 3, %v3949_v14 }
 0x263   :  { %651 = vperm.xlu0 %3570, %v590_v41   ;;  %645 = vperm.xlu1 %3571, %v588_v42  }
 0x267   :  { %654 = vperm.xlu0 %3570, %v591_v46   ;;  %630 = vperm.xlu1 %3571, %v583_v47  }
 0x26b   :  { %657 = vperm.xlu0 %3570, %v592_v51   ;;  %633 = vperm.xlu1 %3571, %v584_v52  }
 0x26f   :  { %660 = vperm.xlu0 %3570, %v593_v55   ;;  %636 = vperm.xlu1 %3571, %v585_v56   ;;  %v1021_v55 = vld [vmem:[%s4896_s11] sm:$0xff]  ;;  %v1022_v56 = vld [vmem:[%s4896_s11 + $0x8] sm:$0xff] }
 0x270   :  { %v3318_v57 = vpack.c.bf16 %v1022_v56, %v1021_v55 }
 0x272   :  { %3319 = vmatprep.subr.bf16.mxu0 %v3318_v57 }
 0x273   :  { %663 = vperm.xlu0 %3570, %v594_v60   ;;  %639 = vperm.xlu1 %3571, %v586_v61  }
 0x274   :  { %3321 = vmatpush3.bf16.msra.mxu0 %v3318_v57 }
 0x277   :  { %642 = vperm.xlu1 %3571, %v587_v0   ;;  %v3984_v0 = vsub.s32 2, %v3949_v14 }
 0x27b   :  { %666 = vperm.xlu1 %3571, %v595_v2  }
 0x2da   :  { %v628_v4 = vpop.permute.xlu0 %627  ;;  %v622_v5 = vpop.permute.xlu1 %621 }
 0x2db   :  { %v673_v20 = vrot.slane %v622_v5, %v672_v17  ;;  %v681_v25 = vrot.slane %v628_v4, %v672_v17  ;;  %v838_v4 = vld [vmem:[%s4894_s9 + $0x8] sm:$0xff]  ;;  %v2530_v5 = vld [vmem:[%s4894_s9 + $0x10] sm:$0xff] }
 0x2de   :  { %v649_v6 = vpop.permute.xlu0 %648  ;;  %v625_v7 = vpop.permute.xlu1 %624 }
 0x2df   :  { %v677_v18 = vrot.slane %v625_v7, %v672_v17  ;;  %v709_v28 = vrot.slane %v649_v6, %v672_v17  ;;  %v2531_v6 = vld [vmem:[%s4894_s9 + $0x18] sm:$0xff]  ;;  %v4002_v7 = vsub.s32 4, %v3949_v14 }
 0x2e1   :  { %v735_v22 = vsel %vm734_vm3, %v677_v18, %v673_v20 }
 0x2e2   :  { %v652_v8 = vpop.permute.xlu0 %651  ;;  %v646_v9 = vpop.permute.xlu1 %645  ;;  %v737_v32 = vsel %vm736_vm4, %v681_v25, %v735_v22  ;;  %v2535_v22 = vld [vmem:[%s4894_s9 + $0x38] sm:$0xff] }
 0x2e3   :  { %v705_v23 = vrot.slane %v646_v9, %v672_v17  ;;  %v713_v31 = vrot.slane %v652_v8, %v672_v17 }
 0x2e5   :  { %v748_v34 = vsel %vm734_vm3, %v709_v28, %v705_v23 }
 0x2e6   :  { %v655_v11 = vpop.permute.xlu0 %654  ;;  %v631_v12 = vpop.permute.xlu1 %630  ;;  %v749_v44 = vsel %vm736_vm4, %v713_v31, %v748_v34  ;;  %v2537_v31 = vld [vmem:[%s4894_s9 + $0x48] sm:$0xff] }
 0x2e7   :  { %v685_v24 = vrot.slane %v631_v12, %v672_v17  ;;  %v717_v35 = vrot.slane %v655_v11, %v672_v17  ;;  %v2532_v11 = vld [vmem:[%s4894_s9 + $0x20] sm:$0xff]  ;;  %v2533_v12 = vld [vmem:[%s4894_s9 + $0x28] sm:$0xff] }
 0x2e9   :  { %v739_v36 = vsel %vm738_vm5, %v685_v24, %v737_v32  ;;  %v750_v47 = vsel %vm738_vm5, %v717_v35, %v749_v44  ;;  %v4025_v24 = vsub.s32 6, %v3949_v14 }
 0x2ea   :  { %v658_v15 = vpop.permute.xlu0 %657  ;;  %v634_v16 = vpop.permute.xlu1 %633 }
 0x2eb   :  { %v689_v26 = vrot.slane %v634_v16, %v672_v17  ;;  %v721_v38 = vrot.slane %v658_v15, %v672_v17  ;;  %v4015_v15 = vsub.s32 5, %v3949_v14 }
 0x2ed   :  { %v741_v39 = vsel %vm740_vm6, %v689_v26, %v739_v36  ;;  %v751_v49 = vsel %vm740_vm6, %v721_v38, %v750_v47 }
 0x2ee   :  { %v637_v19 = vpop.permute.xlu1 %636  ;;  %v661_v21 = vpop.permute.xlu0 %660 }
 0x2ef   :  { %v693_v29 = vrot.slane %v637_v19, %v672_v17  ;;  %v725_v41 = vrot.slane %v661_v21, %v672_v17  ;;  %v2534_v21 = vld [vmem:[%s4894_s9 + $0x30] sm:$0xff] }
 0x2f1   :  { %v743_v43 = vsel %vm742_vm7, %v693_v29, %v741_v39  ;;  %v752_v51 = vsel %vm742_vm7, %v725_v41, %v751_v49  ;;  %v2536_v29 = vld [vmem:[%s4894_s9 + $0x40] sm:$0xff]  ;;  %v2538_v39 = vld [vmem:[%s4894_s9 + $0x50] sm:$0xff] }
 0x2f2   :  { %v640_v27 = vpop.permute.xlu1 %639  ;;  %v664_v37 = vpop.permute.xlu0 %663 }
 0x2f3   :  { %v697_v33 = vrot.slane %v640_v27, %v672_v17  ;;  %v729_v45 = vrot.slane %v664_v37, %v672_v17 }
 0x2f5   :  { %v745_v46 = vsel %vm744_vm8, %v697_v33, %v743_v43  ;;  %v753_v53 = vsel %vm744_vm8, %v729_v45, %v752_v51  ;;  %v4035_v33 = vsub.s32 7, %v3949_v14  ;;  %v2540_v45 = vld [vmem:[%s4894_s9 + $0x60] sm:$0xff] }
 0x2f6   :  { %v643_v40 = vpop.permute.xlu1 %642 }
 0x2f7   :  { %v701_v42 = vrot.slane %v643_v40, %v672_v17  ;;  %v2539_v40 = vld [vmem:[%s4894_s9 + $0x58] sm:$0xff] }
 0x2f9   :  { %v747_v48 = vsel %vm746_vm9, %v701_v42, %v745_v46  ;;  %v2541_v46 = vld [vmem:[%s4894_s9 + $0x68] sm:$0xff] }
 0x2fa   :  { %2951 = vmatprep.mubr.msk.f32.mxu1 %vm755_vm10, %v747_v48  ;;  %v667_v50 = vpop.permute.xlu1 %666 }
 0x2fb   :  { %v733_v52 = vrot.slane %v667_v50, %v672_v17 }
 0x2fd   :  { %v754_v54 = vsel %vm746_vm9, %v733_v52, %v753_v53  ;;  %v2542_v52 = vld [vmem:[%s4894_s9 + $0x70] sm:$0xff]  ;;  %v2543_v53 = vld [vmem:[%s4894_s9 + $0x78] sm:$0xff] }
 0x2fe   :  { %2952 = vmatmul.mubr.msk.f32.vlgmr.msra.gmra.mrb[0].mxu1 %vm755_vm10, %v754_v54 }
 0x2ff   :  { %2965 = vmatprep.mubr.msk.f32.mxu1 %vm3598_vm0, %v3597_v30 }
 0x3d1   :  { %v2953_v59 = vpop.f32.mrb[0].mxu1 }
 0x3d2   :  { %v826_v60 = vpop.f32.mrb[1].mxu1  ;;  %v832_v20 = vadd.f32 %v2953_v59, %v2527_v58  ;;  %v2544_v59 = vld [vmem:[%s4894_s9 + $0x80] sm:$0xff] }
 0x3d3   :  { %v827_v61 = vadd.f32 %v2527_v58, %v826_v60  ;;  %v2545_v60 = vld [vmem:[%s4894_s9 + $0x88] sm:$0xff] }
 0x3d4   :  { %v4037_v38 = vmax.f32 %v832_v20, 0.0 }
 0x3d5   :  { %v835_v2 = vmax.f32 %v827_v61, 0.0 }
 0x3d6   :  { %v928_v54 = vrot.slane %v4037_v38, %v3978_v62  ;;  %v939_v61 = vrot.slane %v4037_v38, %v3981_v63 }
 0x3d7   :  { %v842_v8 = vrot.slane %v835_v2, %v3978_v62  ;;  %v851_v9 = vrot.slane %v835_v2, %v3981_v63  ;;  %v862_v10 = vrot.slane %v835_v2, %v3984_v0  ;;  %v873_v13 = vrot.slane %v835_v2, %v3987_v1 }
 0x3d8   :  { %v884_v23 = vrot.slane %v835_v2, %v4002_v7  ;;  %v895_v32 = vrot.slane %v835_v2, %v4015_v15  ;;  %v906_v41 = vrot.slane %v835_v2, %v4025_v24  ;;  %v917_v47 = vrot.slane %v835_v2, %v4035_v33 }
 0x3d9   :  { %v843_v16 = vmul.f32 %v842_v8, %v837_v3  ;;  %v844_v17 = vmul.f32 %v842_v8, %v838_v4  ;;  %v852_v18 = vmul.f32 %v2530_v5, %v851_v9  ;;  %v853_v19 = vmul.f32 %v2531_v6, %v851_v9  ;;  %v2546_v6 = vld [vmem:[%s4894_s9 + $0x90] sm:$0xff]  ;;  %v2547_v8 = vld [vmem:[%s4894_s9 + $0x98] sm:$0xff] }
 0x3da   :  { %v863_v27 = vmul.f32 %v2532_v11, %v862_v10  ;;  %v864_v28 = vmul.f32 %v2533_v12, %v862_v10  ;;  %v874_v36 = vmul.f32 %v2534_v21, %v873_v13  ;;  %v875_v37 = vmul.f32 %v2535_v22, %v873_v13 }
 0x3db   :  { %v854_v25 = vadd.f32 %v852_v18, %v843_v16  ;;  %v855_v26 = vadd.f32 %v853_v19, %v844_v17  ;;  %v885_v14 = vmul.f32 %v2536_v29, %v884_v23  ;;  %v886_v44 = vmul.f32 %v2537_v31, %v884_v23  ;;  %v2548_v16 = vld [vmem:[%s4894_s9 + $0xa0] sm:$0xff]  ;;  %v2549_v17 = vld [vmem:[%s4894_s9 + $0xa8] sm:$0xff]  ;;  %v2550_v23 = vld [vmem:[%s4894_s9 + $0xb0] sm:$0xff] }
 0x3dc   :  { %v896_v50 = vmul.f32 %v2538_v39, %v895_v32  ;;  %v897_v51 = vmul.f32 %v2539_v40, %v895_v32  ;;  %v907_v57 = vmul.f32 %v2540_v45, %v906_v41  ;;  %v908_v58 = vmul.f32 %v2541_v46, %v906_v41  ;;  %v2554_v41 = vld [vmem:[%s4894_s9 + $0xd0] sm:$0xff] }
 0x3dd   :  { %v865_v34 = vadd.f32 %v863_v27, %v854_v25  ;;  %v866_v35 = vadd.f32 %v864_v28, %v855_v26  ;;  %v918_v4 = vmul.f32 %v2542_v52, %v917_v47  ;;  %v919_v5 = vmul.f32 %v2543_v53, %v917_v47  ;;  %v2551_v26 = vld [vmem:[%s4894_s9 + $0xb8] sm:$0xff]  ;;  %v2556_v47 = vld [vmem:[%s4894_s9 + $0xe0] sm:$0xff] }
 0x3de   :  { %v950_v9 = vrot.slane %v4037_v38, %v3984_v0  ;;  %v929_v12 = vmul.f32 %v2544_v59, %v928_v54  ;;  %v930_v13 = vmul.f32 %v2545_v60, %v928_v54  ;;  %v961_v18 = vrot.slane %v4037_v38, %v3987_v1  ;;  %v2558_v54 = vld [vmem:[%s4894_s9 + $0xf0] sm:$0xff] }
 0x3df   :  { %v876_v42 = vadd.f32 %v874_v36, %v865_v34  ;;  %v877_v43 = vadd.f32 %v875_v37, %v866_v35  ;;  %v940_v21 = vmul.f32 %v2546_v6, %v939_v61  ;;  %v941_v22 = vmul.f32 %v2547_v8, %v939_v61  ;;  %v2552_v34 = vld [vmem:[%s4894_s9 + $0xc0] sm:$0xff]  ;;  %v2553_v35 = vld [vmem:[%s4894_s9 + $0xc8] sm:$0xff] }
 0x3e0   :  { %v951_v25 = vmul.f32 %v2548_v16, %v950_v9  ;;  %v952_v29 = vmul.f32 %v2549_v17, %v950_v9  ;;  %v972_v31 = vrot.slane %v4037_v38, %v4002_v7  ;;  %v962_v32 = vmul.f32 %v2550_v23, %v961_v18  ;;  %v1349_v17 = vld [vmem:[%s4904_s19] sm:$0xff] }
 0x3e1   :  { %v887_v48 = vadd.f32 %v885_v14, %v876_v42  ;;  %v888_v49 = vadd.f32 %v886_v44, %v877_v43  ;;  %v963_v39 = vmul.f32 %v2551_v26, %v961_v18  ;;  %v983_v40 = vrot.slane %v4037_v38, %v4015_v15  ;;  %v2555_v42 = vld [vmem:[%s4894_s9 + $0xd8] sm:$0xff]  ;;  %v1350_v18 = vld [vmem:[%s4904_s19 + $0x8] sm:$0xff]  ;;  %v1353_v23 = vld [vmem:[%s4904_s19 + $0x20] sm:$0xff] }
 0x3e2   :  { %v994_v43 = vrot.slane %v4037_v38, %v4025_v24  ;;  %v973_v45 = vmul.f32 %v2552_v34, %v972_v31  ;;  %v974_v46 = vmul.f32 %v2553_v35, %v972_v31  ;;  %v1357_v31 = vld [vmem:[%s4904_s19 + $0x40] sm:$0xff] }
 0x3e3   :  { %v898_v55 = vadd.f32 %v896_v50, %v887_v48  ;;  %v899_v56 = vadd.f32 %v897_v51, %v888_v49  ;;  %v2557_v48 = vld [vmem:[%s4894_s9 + $0xe8] sm:$0xff]  ;;  %v1005_v49 = vrot.slane %v4037_v38, %v4035_v33  ;;  %v984_v52 = vmul.f32 %v2554_v41, %v983_v40  ;;  %v2561_v35 = vld [vmem:[%s4897_s12] ss:$0 sm:$0xff] }
 0x3e4   :  { %v985_v53 = vmul.f32 %v2555_v42, %v983_v40  ;;  %v996_v59 = vmul.f32 %v2557_v48, %v994_v43  ;;  %v1114_v41 = vld [vmem:[%s4898_s13] sm:$0x3]  ;;  %v2564_v42 = vld [vmem:[%s4898_s13 + $0x2] sm:$0x3] }
 0x3e5   :  { %v909_v2 = vadd.f32 %v907_v57, %v898_v55  ;;  %v910_v3 = vadd.f32 %v908_v58, %v899_v56  ;;  %v2559_v55 = vld [vmem:[%s4894_s9 + $0xf8] sm:$0xff]  ;;  %v995_v58 = vmul.f32 %v2556_v47, %v994_v43 }
 0x3e6   :  { %v1007_v38 = vmul.f32 %v2559_v55, %v1005_v49 }
 0x3e7   :  { %v920_v10 = vadd.f32 %v918_v4, %v909_v2  ;;  %v921_v11 = vadd.f32 %v919_v5, %v910_v3  ;;  %v1006_v2 = vmul.f32 %v2558_v54, %v1005_v49  ;;  %v2560_v3 = vld [vmem:[%s4895_s10] ss:$0 sm:$0xff]  ;;  %v2566_v49 = vld [vmem:[%s4898_s13 + $0x6] sm:$0x3]  ;;  %v2567_v54 = vld [vmem:[%s4898_s13 + $0x8] sm:$0x3] }
 0x3e9   :  { %v931_v19 = vadd.f32 %v929_v12, %v920_v10  ;;  %v932_v20 = vadd.f32 %v930_v13, %v921_v11  ;;  %v1249_v11 = vld [vmem:[%s4900_s15] sm:$0xff]  ;;  %v3599_v12 = vmov 0.0|0.0   ;;  %v1250_v13 = vld [vmem:[%s4900_s15 + $0x8] sm:$0xff] }
 0x3ea   :  { %3322 = vmatprep.subr.bf16.mxu1 %v3599_v12  ;;  %3325 = vmatprep.subr.bf16.mxu0 %v3599_v12  ;;  %v3323_v16 = vpack.c.bf16 %v1250_v13, %v1249_v11  ;;  %v2571_v11 = vld [vmem:[%s4898_s13 + $0x10] sm:$0x3] }
 0x3eb   :  { %v942_v27 = vadd.f32 %v940_v21, %v931_v19  ;;  %v943_v28 = vadd.f32 %v941_v22, %v932_v20  ;;  %v1351_v19 = vld [vmem:[%s4904_s19 + $0x10] sm:$0xff]  ;;  %v3326_v20 = vpack.c.bf16 %v1350_v18, %v1349_v17  ;;  %v1352_v21 = vld [vmem:[%s4904_s19 + $0x18] sm:$0xff] }
 0x3ec   :  { %3324 = vmatpush3.bf16.msra.mxu1 %v3323_v16  ;;  %v3329_v22 = vpack.c.bf16 %v1352_v21, %v1351_v19  ;;  %v2572_v18 = vld [vmem:[%s4898_s13 + $0x12] sm:$0x3] }
 0x3ed   :  { %v953_v36 = vadd.f32 %v951_v25, %v942_v27  ;;  %v954_v37 = vadd.f32 %v952_v29, %v943_v28  ;;  %3349 = vmatprep.subr.bf16.mxu1 %v3599_v12  ;;  %v1354_v25 = vld [vmem:[%s4904_s19 + $0x28] sm:$0xff]  ;;  %v1355_v27 = vld [vmem:[%s4904_s19 + $0x30] sm:$0xff]  ;;  %v1356_v28 = vld [vmem:[%s4904_s19 + $0x38] sm:$0xff] }
 0x3ee   :  { %v3332_v26 = vpack.c.bf16 %v1354_v25, %v1353_v23  ;;  %v3335_v29 = vpack.c.bf16 %v1356_v28, %v1355_v27 }
 0x3ef   :  { %v964_v14 = vadd.f32 %v962_v32, %v953_v36  ;;  %v965_v44 = vadd.f32 %v963_v39, %v954_v37  ;;  %v1358_v32 = vld [vmem:[%s4904_s19 + $0x48] sm:$0xff] }
 0x3f0   :  { %v3338_v34 = vpack.c.bf16 %v1358_v32, %v1357_v31 }
 0x3f1   :  { %v975_v50 = vadd.f32 %v973_v45, %v964_v14  ;;  %v976_v51 = vadd.f32 %v974_v46, %v965_v44  ;;  %v2565_v45 = vld [vmem:[%s4898_s13 + $0x4] sm:$0x3] }
 0x3f3   :  { %v986_v56 = vadd.f32 %v984_v52, %v975_v50  ;;  %v987_v57 = vadd.f32 %v985_v53, %v976_v51 }
 0x3f5   :  { %v997_v60 = vadd.f32 %v995_v58, %v986_v56  ;;  %v998_v61 = vadd.f32 %v996_v59, %v987_v57  ;;  %v2568_v58 = vld [vmem:[%s4898_s13 + $0xa] sm:$0x3] }
 0x3f7   :  { %v1008_v4 = vadd.f32 %v1006_v2, %v997_v60  ;;  %v1009_v5 = vadd.f32 %v1007_v38, %v998_v61  ;;  %v2569_v38 = vld [vmem:[%s4898_s13 + $0xc] sm:$0x3] }
 0x3f9   :  { %v1017_v6 = vadd.f32 %v2560_v3, %v1008_v4  ;;  %v1018_v8 = vadd.f32 %v2560_v3, %v1009_v5 }
 0x3fb   :  { %v1019_v9 = vmax.f32 %v1017_v6, 0.0  ;;  %v1020_v10 = vmax.f32 %v1018_v8, 0.0  ;;  %v2570_v6 = vld [vmem:[%s4898_s13 + $0xe] sm:$0x3] }
 0x3fd   :  { %2958 = vmatprep.mubr.msk.f32.mxu0 %vm1030_vm11, %v1019_v9 }
 0x3fe   :  { %2959 = vmatmul.mubr.msk.f32.vlgmr.msra.gmra.mrb[2].mxu0 %vm1030_vm11, %v1020_v10 }
 0x3ff   :  { %3000 = vmatprep.mubr.msk.f32.mxu0 %vm3598_vm0, %v3597_v30  ;;  %3327 = vmatpush3.bf16.msra.mxu0 %v3326_v20 }
 0x400   :  { %3328 = vmatprep.subr.bf16.mxu0 %v3599_v12 }
 0x403   :  { %3330 = vmatpush3.bf16.msra.mxu0 %v3329_v22 }
 0x404   :  { %3331 = vmatprep.subr.bf16.mxu0 %v3599_v12 }
 0x407   :  { %3333 = vmatpush3.bf16.msra.mxu0 %v3332_v26 }
 0x408   :  { %3334 = vmatprep.subr.bf16.mxu0 %v3599_v12 }
 0x40b   :  { %3336 = vmatpush3.bf16.msra.mxu0 %v3335_v29 }
 0x40c   :  { %3337 = vmatprep.subr.bf16.mxu0 %v3599_v12 }
 0x40f   :  { %3339 = vmatpush3.bf16.msra.mxu0 %v3338_v34 }
 0x410   :  { %3340 = vmatprep.subr.bf16.mxu0 %v3599_v12 }
 0x4d1   :  { %v2960_v36 = vpop.f32.mrb[2].mxu0 }
 0x4d2   :  { %v1103_v37 = vpop.f32.mrb[3].mxu0  ;;  %v1109_v50 = vadd.f32 %v2960_v36, %v2561_v35 }
 0x4d3   :  { %v1104_v39 = vadd.f32 %v2561_v35, %v1103_v37 }
 0x4d4   :  { %v1113_v59 = vmax.f32 %v1109_v50, 0.0  ;;  %v1362_v50 = vld [vmem:[%s4904_s19 + $0x68] sm:$0xff] }
 0x4d5   :  { %v1112_v40 = vmax.f32 %v1104_v39, 0.0 }
 0x4d6   :  { %v1181_v10 = vrot.slane %v1113_v59, %v3978_v62  ;;  %v1189_v17 = vrot.slane %v1113_v59, %v3981_v63  ;;  %v1197_v21 = vrot.slane %v1113_v59, %v3984_v0  ;;  %v1205_v25 = vrot.slane %v1113_v59, %v3987_v1 }
 0x4d7   :  { %v1118_v43 = vrot.slane %v1112_v40, %v3978_v62  ;;  %v1125_v14 = vrot.slane %v1112_v40, %v3981_v63  ;;  %v1133_v44 = vrot.slane %v1112_v40, %v3984_v0  ;;  %v1141_v48 = vrot.slane %v1112_v40, %v3987_v1  ;;  %v2573_v62 = vld [vmem:[%s4898_s13 + $0x14] sm:$0x3]  ;;  %v2574_v63 = vld [vmem:[%s4898_s13 + $0x16] sm:$0x3]  ;;  %v2575_v0 = vld [vmem:[%s4898_s13 + $0x18] sm:$0x3] }
 0x4d8   :  { %v1149_v53 = vrot.slane %v1112_v40, %v4002_v7  ;;  %v1157_v57 = vrot.slane %v1112_v40, %v4015_v15  ;;  %v1165_v2 = vrot.slane %v1112_v40, %v4025_v24  ;;  %v1173_v4 = vrot.slane %v1112_v40, %v4035_v33  ;;  %v2576_v1 = vld [vmem:[%s4898_s13 + $0x1a] sm:$0x3] }
 0x4d9   :  { %v1119_v46 = vmul.f32 %v1118_v43, %v1114_v41  ;;  %v1126_v47 = vmul.f32 %v2564_v42, %v1125_v14  ;;  %v1134_v52 = vmul.f32 %v2565_v45, %v1133_v44  ;;  %v1142_v56 = vmul.f32 %v2566_v49, %v1141_v48  ;;  %v1361_v48 = vld [vmem:[%s4904_s19 + $0x60] sm:$0xff] }
 0x4da   :  { %v1150_v61 = vmul.f32 %v2567_v54, %v1149_v53  ;;  %v1158_v3 = vmul.f32 %v2568_v58, %v1157_v57  ;;  %v1166_v9 = vmul.f32 %v2569_v38, %v1165_v2  ;;  %v1174_v16 = vmul.f32 %v2570_v6, %v1173_v4  ;;  %v2591_v53 = vld [vmem:[%s4904_s19 + $0x90] sm:$0xff]  ;;  %v1364_v58 = vld [vmem:[%s4904_s19 + $0x78] sm:$0xff]  ;;  %v2597_v6 = vld [vmem:[%s4904_s19 + $0xc0] sm:$0xff] }
 0x4db   :  { %v1127_v51 = vadd.f32 %v1126_v47, %v1119_v46  ;;  %v1182_v20 = vmul.f32 %v2571_v11, %v1181_v10  ;;  %v1190_v23 = vmul.f32 %v2572_v18, %v1189_v17  ;;  %v1198_v27 = vmul.f32 %v2573_v62, %v1197_v21  ;;  %v1360_v47 = vld [vmem:[%s4904_s19 + $0x58] sm:$0xff]  ;;  %v1363_v57 = vld [vmem:[%s4904_s19 + $0x70] sm:$0xff]  ;;  %v2580_v10 = vld [vmem:[%s4901_s16] ss:$0 sm:$0xff] }
 0x4dc   :  { %v1213_v28 = vrot.slane %v1113_v59, %v4002_v7  ;;  %v1206_v31 = vmul.f32 %v2574_v63, %v1205_v25  ;;  %v1221_v32 = vrot.slane %v1113_v59, %v4015_v15  ;;  %v1229_v36 = vrot.slane %v1113_v59, %v4025_v24  ;;  %v2577_v7 = vld [vmem:[%s4898_s13 + $0x1c] sm:$0x3]  ;;  %v2578_v15 = vld [vmem:[%s4898_s13 + $0x1e] sm:$0x3]  ;;  %v2579_v24 = vld [vmem:[%s4899_s14] ss:$0 sm:$0xff] }
 0x4dd   :  { %v1135_v55 = vadd.f32 %v1134_v52, %v1127_v51  ;;  %v1237_v40 = vrot.slane %v1113_v59, %v4035_v33  ;;  %v1359_v33 = vld [vmem:[%s4904_s19 + $0x50] sm:$0xff]  ;;  %v2589_v51 = vld [vmem:[%s4904_s19 + $0x80] sm:$0xff]  ;;  %v2590_v52 = vld [vmem:[%s4904_s19 + $0x88] sm:$0xff]  ;;  %v3344_v54 = vpack.c.bf16 %v1362_v50, %v1361_v48  ;;  %v3347_v2 = vpack.c.bf16 %v1364_v58, %v1363_v57 }
 0x4de   :  { %v1214_v35 = vmul.f32 %v2575_v0, %v1213_v28  ;;  %v1222_v39 = vmul.f32 %v2576_v1, %v1221_v32  ;;  %v1230_v42 = vmul.f32 %v2577_v7, %v1229_v36  ;;  %v3341_v49 = vpack.c.bf16 %v1360_v47, %v1359_v33  ;;  %v2596_v4 = vld [vmem:[%s4904_s19 + $0xb8] sm:$0xff]  ;;  %v2582_v17 = vld [vmem:[%s4902_s17] ss:$0 sm:$0xff]  ;;  %v2612_v28 = vld [vmem:[%s4904_s19 + $0x108] sm:$0xff] }
 0x4df   :  { %v1143_v60 = vadd.f32 %v1142_v56, %v1135_v55  ;;  %v1238_v14 = vmul.f32 %v2578_v15, %v1237_v40  ;;  %v3350_v55 = vpack.c.bf16 %v2590_v52, %v2589_v51  ;;  %v2592_v56 = vld [vmem:[%s4904_s19 + $0x98] sm:$0xff]  ;;  %v2601_v25 = vld [vmem:[%s4904_s19 + $0xe0] sm:$0xff]  ;;  %v2613_v0 = vld [vmem:[%s4904_s19 + $0x110] sm:$0xff] }
 0x4e0   :  { %3342 = vmatpush3.bf16.msra.mxu0 %v3341_v49  ;;  %v3353_v59 = vpack.c.bf16 %v2592_v56, %v2591_v53  ;;  %v2614_v32 = vld [vmem:[%s4904_s19 + $0x118] sm:$0xff]  ;;  %v2603_v1 = vld [vmem:[%s4904_s19 + $0xf0] sm:$0xff]  ;;  %v2615_v36 = vld [vmem:[%s4904_s19 + $0x120] sm:$0xff] }
 0x4e1   :  { %v1151_v5 = vadd.f32 %v1150_v61, %v1143_v60  ;;  %3343 = vmatprep.subr.bf16.mxu0 %v3599_v12  ;;  %v2593_v60 = vld [vmem:[%s4904_s19 + $0xa0] sm:$0xff]  ;;  %v2594_v61 = vld [vmem:[%s4904_s19 + $0xa8] sm:$0xff]  ;;  %v2617_v40 = vld [vmem:[%s4904_s19 + $0x130] sm:$0xff] }
 0x4e2   :  { %v3356_v38 = vpack.c.bf16 %v2594_v61, %v2593_v60  ;;  %v2616_v7 = vld [vmem:[%s4904_s19 + $0x128] sm:$0xff]  ;;  %v2618_v15 = vld [vmem:[%s4904_s19 + $0x138] sm:$0xff]  ;;  %v2586_v33 = vld [vmem:[%s4902_s17 + $0x1] ss:$0 sm:$0xff] }
 0x4e3   :  { %v1159_v8 = vadd.f32 %v1158_v3, %v1151_v5  ;;  %v2595_v3 = vld [vmem:[%s4904_s19 + $0xb0] sm:$0xff]  ;;  %v2588_v48 = vld [vmem:[%s4903_s18 + $0x1] ss:$0 sm:$0xff]  ;;  %v2622_v53 = vld [vmem:[%s4904_s19 + $0x158] sm:$0xff] }
 0x4e4   :  { %3345 = vmatpush3.bf16.msra.mxu0 %v3344_v54  ;;  %v3359_v5 = vpack.c.bf16 %v2596_v4, %v2595_v3  ;;  %v2621_v52 = vld [vmem:[%s4904_s19 + $0x150] sm:$0xff]  ;;  %v2623_v54 = vld [vmem:[%s4904_s19 + $0x160] sm:$0xff]  ;;  %v2624_v56 = vld [vmem:[%s4904_s19 + $0x168] sm:$0xff] }
 0x4e5   :  { %v1167_v13 = vadd.f32 %v1166_v9, %v1159_v8  ;;  %3346 = vmatprep.subr.bf16.mxu0 %v3599_v12  ;;  %v2598_v8 = vld [vmem:[%s4904_s19 + $0xc8] sm:$0xff]  ;;  %v2633_v57 = vld [vmem:[%s4904_s19 + $0x180] sm:$0xff]  ;;  %v3392_v60 = vpack.c.bf16 %v2624_v56, %v2623_v54  ;;  %v2626_v3 = vld [vmem:[%s4904_s19 + $0x178] sm:$0xff] }
 0x4e6   :  { %v3362_v9 = vpack.c.bf16 %v2598_v8, %v2597_v6  ;;  %v2634_v58 = vld [vmem:[%s4904_s19 + $0x188] sm:$0xff]  ;;  %v2632_v54 = vld [vmem:[%s4903_s18 + $0x3] ss:$0 sm:$0xff] }
 0x4e7   :  { %v1175_v19 = vadd.f32 %v1174_v16, %v1167_v13  ;;  %v3398_v61 = vpack.c.bf16 %v2634_v58, %v2633_v57  ;;  %v2638_v6 = vld [vmem:[%s4904_s19 + $0x1a8] sm:$0xff]  ;;  %v2665_v58 = vld [vmem:[%s4904_s19 + $0x250] sm:$0xff] }
 0x4e8   :  { %3348 = vmatpush3.bf16.msra.mxu0 %v3347_v2  ;;  %v2636_v2 = vld [vmem:[%s4904_s19 + $0x198] sm:$0xff] }
 0x4e9   :  { %v1183_v22 = vadd.f32 %v1182_v20, %v1175_v19  ;;  %3373 = vmatprep.subr.bf16.mxu0 %v3599_v12  ;;  %v2583_v19 = vld [vmem:[%s4903_s18] ss:$0 sm:$0xff] }
 0x4eb   :  { %v1191_v26 = vadd.f32 %v1190_v23, %v1183_v22  ;;  %v2599_v22 = vld [vmem:[%s4904_s19 + $0xd0] sm:$0xff]  ;;  %v2600_v23 = vld [vmem:[%s4904_s19 + $0xd8] sm:$0xff] }
 0x4ec   :  { %v3365_v63 = vpack.c.bf16 %v2600_v23, %v2599_v22  ;;  %v2608_v22 = vld [vmem:[%s4902_s17 + $0x2] ss:$0 sm:$0xff] }
 0x4ed   :  { %v1199_v29 = vadd.f32 %v1198_v27, %v1191_v26  ;;  %v2602_v26 = vld [vmem:[%s4904_s19 + $0xe8] sm:$0xff]  ;;  %v2611_v27 = vld [vmem:[%s4904_s19 + $0x100] sm:$0xff] }
 0x4ef   :  { %v1207_v34 = vadd.f32 %v1206_v31, %v1199_v29  ;;  %v3368_v29 = vpack.c.bf16 %v2602_v26, %v2601_v25  ;;  %v3374_v31 = vpack.c.bf16 %v2612_v28, %v2611_v27  ;;  %v2610_v25 = vld [vmem:[%s4903_s18 + $0x2] ss:$0 sm:$0xff]  ;;  %v2643_v28 = vld [vmem:[%s4904_s19 + $0x1d0] sm:$0xff] }
 0x4f1   :  { %v1215_v37 = vadd.f32 %v1214_v35, %v1207_v34  ;;  %v2604_v34 = vld [vmem:[%s4904_s19 + $0xf8] sm:$0xff]  ;;  %v3377_v35 = vpack.c.bf16 %v2614_v32, %v2613_v0  ;;  %v2646_v32 = vld [vmem:[%s4904_s19 + $0x1e8] sm:$0xff] }
 0x4f2   :  { %v2644_v0 = vld [vmem:[%s4904_s19 + $0x1d8] sm:$0xff] }
 0x4f3   :  { %v1223_v41 = vadd.f32 %v1222_v39, %v1215_v37  ;;  %v3371_v37 = vpack.c.bf16 %v2604_v34, %v2603_v1  ;;  %v3380_v39 = vpack.c.bf16 %v2616_v7, %v2615_v36  ;;  %v2655_v1 = vld [vmem:[%s4904_s19 + $0x200] sm:$0xff]  ;;  %v2656_v34 = vld [vmem:[%s4904_s19 + $0x208] sm:$0xff] }
 0x4f4   :  { %v3422_v7 = vpack.c.bf16 %v2656_v34, %v2655_v1  ;;  %v2687_v34 = vld [vmem:[%s4904_s19 + $0x2d0] sm:$0xff] }
 0x4f5   :  { %v1231_v43 = vadd.f32 %v1230_v42, %v1223_v41  ;;  %v3383_v41 = vpack.c.bf16 %v2618_v15, %v2617_v40  ;;  %v2619_v42 = vld [vmem:[%s4904_s19 + $0x140] sm:$0xff]  ;;  %v2648_v40 = vld [vmem:[%s4904_s19 + $0x1f8] sm:$0xff] }
 0x4f7   :  { %v1239_v44 = vadd.f32 %v1238_v14, %v1231_v43  ;;  %v2620_v43 = vld [vmem:[%s4904_s19 + $0x148] sm:$0xff] }
 0x4f8   :  { %v3386_v14 = vpack.c.bf16 %v2620_v43, %v2619_v42  ;;  %v2660_v42 = vld [vmem:[%s4904_s19 + $0x228] sm:$0xff] }
 0x4f9   :  { %v1247_v45 = vadd.f32 %v2579_v24, %v1239_v44  ;;  %v2584_v24 = vld [vmem:[%s4905_s20] ss:$0 sm:$0xff] }
 0x4fb   :  { %v1248_v46 = vmax.f32 %v1247_v45, 0.0 }
 0x4fd   :  { %2966 = vmatmul.mubr.msk.f32.vlgmr.msra.gmra.mrb[2].mxu1 %vm1030_vm11, %v1248_v46 }
 0x4fe   :  { %3035 = vmatprep.mubr.msk.f32.mxu1 %vm3598_vm0, %v3597_v30  ;;  %3351 = vmatpush3.bf16.msra.mxu1 %v3350_v55  ;;  %v3389_v55 = vpack.c.bf16 %v2622_v53, %v2621_v52  ;;  %v2630_v52 = vld [vmem:[%s4902_s17 + $0x3] ss:$0 sm:$0xff] }
 0x4ff   :  { %3352 = vmatprep.subr.bf16.mxu1 %v3599_v12 }
 0x502   :  { %3354 = vmatpush3.bf16.msra.mxu1 %v3353_v59  ;;  %v2635_v59 = vld [vmem:[%s4904_s19 + $0x190] sm:$0xff] }
 0x503   :  { %3355 = vmatprep.subr.bf16.mxu1 %v3599_v12  ;;  %v3401_v4 = vpack.c.bf16 %v2636_v2, %v2635_v59  ;;  %v2666_v59 = vld [vmem:[%s4904_s19 + $0x258] sm:$0xff]  ;;  %v2668_v2 = vld [vmem:[%s4904_s19 + $0x268] sm:$0xff] }
 0x506   :  { %3357 = vmatpush3.bf16.msra.mxu1 %v3356_v38  ;;  %v2625_v38 = vld [vmem:[%s4904_s19 + $0x170] sm:$0xff] }
 0x507   :  { %3358 = vmatprep.subr.bf16.mxu1 %v3599_v12  ;;  %v3395_v8 = vpack.c.bf16 %v2626_v3, %v2625_v38  ;;  %v2677_v38 = vld [vmem:[%s4904_s19 + $0x280] sm:$0xff]  ;;  %v2678_v3 = vld [vmem:[%s4904_s19 + $0x288] sm:$0xff] }
 0x50a   :  { %3360 = vmatpush3.bf16.msra.mxu1 %v3359_v5  ;;  %v2637_v5 = vld [vmem:[%s4904_s19 + $0x1a0] sm:$0xff] }
 0x50b   :  { %3361 = vmatprep.subr.bf16.mxu1 %v3599_v12 }
 0x50e   :  { %3363 = vmatpush3.bf16.msra.mxu1 %v3362_v9  ;;  %v3404_v9 = vpack.c.bf16 %v2638_v6, %v2637_v5  ;;  %v3446_v6 = vpack.c.bf16 %v2678_v3, %v2677_v38  ;;  %v2709_v3 = vld [vmem:[%s4904_s19 + $0x350] sm:$0xff] }
 0x50f   :  { %3364 = vmatprep.subr.bf16.mxu1 %v3599_v12 }
 0x512   :  { %3366 = vmatpush3.bf16.msra.mxu1 %v3365_v63 }
 0x513   :  { %3367 = vmatprep.subr.bf16.mxu1 %v3599_v12 }
 0x516   :  { %3369 = vmatpush3.bf16.msra.mxu1 %v3368_v29  ;;  %v2645_v29 = vld [vmem:[%s4904_s19 + $0x1e0] sm:$0xff] }
 0x517   :  { %3370 = vmatprep.subr.bf16.mxu1 %v3599_v12  ;;  %v3416_v36 = vpack.c.bf16 %v2646_v32, %v2645_v29  ;;  %v2654_v29 = vld [vmem:[%s4903_s18 + $0x4] ss:$0 sm:$0xff] }
 0x51a   :  { %3372 = vmatpush3.bf16.msra.mxu1 %v3371_v37  ;;  %v2658_v37 = vld [vmem:[%s4904_s19 + $0x218] sm:$0xff] }
 0x51b   :  { %3397 = vmatprep.subr.bf16.mxu1 %v3599_v12 }
 0x5d0   :  { %v1327_v11 = vpop.f32.mrb[2].mxu1 }
 0x5d1   :  { %v1328_v13 = vadd.f32 %v2580_v10, %v1327_v11  ;;  %v2967_v16 = vpop.f32.mrb[3].mxu1  ;;  %v2639_v10 = vld [vmem:[%s4904_s19 + $0x1b0] sm:$0xff]  ;;  %v2640_v11 = vld [vmem:[%s4904_s19 + $0x1b8] sm:$0xff] }
 0x5d2   :  { %v2641_v16 = vld [vmem:[%s4904_s19 + $0x1c0] sm:$0xff] }
 0x5d3   :  { %v1331_v18 = vmax.f32 %v1328_v13, 0.0  ;;  %v3407_v13 = vpack.c.bf16 %v2640_v11, %v2639_v10  ;;  %v2670_v10 = vld [vmem:[%s4904_s19 + $0x278] sm:$0xff] }
 0x5d5   :  { %v1339_v20 = vmul.f32 %v2582_v17, %v1331_v18  ;;  %v2642_v17 = vld [vmem:[%s4904_s19 + $0x1c8] sm:$0xff] }
 0x5d6   :  { %v3410_v18 = vpack.c.bf16 %v2642_v17, %v2641_v16  ;;  %v2682_v16 = vld [vmem:[%s4904_s19 + $0x2a8] sm:$0xff] }
 0x5d7   :  { %v1347_v21 = vadd.f32 %v2583_v19, %v1339_v20  ;;  %v2606_v19 = vld [vmem:[%s4905_s20 + $0x1] ss:$0 sm:$0xff] }
 0x5d9   :  { %v1348_v62 = vmax.f32 %v1347_v21, 0.0 }
 0x5db   :  { %3001 = vmatmul.mubr.f32.vlgmr.msra.gmra.mrb[4].mxu0 %v1348_v62 }
 0x5dc   :  { %3070 = vmatprep.mubr.msk.f32.mxu0 %vm3598_vm0, %v3597_v30  ;;  %3375 = vmatpush3.bf16.msra.mxu0 %v3374_v31  ;;  %v3413_v31 = vpack.c.bf16 %v2644_v0, %v2643_v28  ;;  %v2652_v28 = vld [vmem:[%s4902_s17 + $0x4] ss:$0 sm:$0xff] }
 0x5dd   :  { %3376 = vmatprep.subr.bf16.mxu0 %v3599_v12 }
 0x5e0   :  { %3378 = vmatpush3.bf16.msra.mxu0 %v3377_v35  ;;  %v2657_v35 = vld [vmem:[%s4904_s19 + $0x210] sm:$0xff] }
 0x5e1   :  { %3379 = vmatprep.subr.bf16.mxu0 %v3599_v12  ;;  %v3425_v15 = vpack.c.bf16 %v2658_v37, %v2657_v35  ;;  %v2688_v35 = vld [vmem:[%s4904_s19 + $0x2d8] sm:$0xff]  ;;  %v2690_v37 = vld [vmem:[%s4904_s19 + $0x2e8] sm:$0xff] }
 0x5e4   :  { %3381 = vmatpush3.bf16.msra.mxu0 %v3380_v39  ;;  %v2647_v39 = vld [vmem:[%s4904_s19 + $0x1f0] sm:$0xff] }
 0x5e5   :  { %3382 = vmatprep.subr.bf16.mxu0 %v3599_v12  ;;  %v3419_v43 = vpack.c.bf16 %v2648_v40, %v2647_v39  ;;  %v2699_v39 = vld [vmem:[%s4904_s19 + $0x300] sm:$0xff]  ;;  %v2700_v40 = vld [vmem:[%s4904_s19 + $0x308] sm:$0xff] }
 0x5e8   :  { %3384 = vmatpush3.bf16.msra.mxu0 %v3383_v41  ;;  %v2659_v41 = vld [vmem:[%s4904_s19 + $0x220] sm:$0xff] }
 0x5e9   :  { %3385 = vmatprep.subr.bf16.mxu0 %v3599_v12 }
 0x5ec   :  { %3387 = vmatpush3.bf16.msra.mxu0 %v3386_v14  ;;  %v3428_v14 = vpack.c.bf16 %v2660_v42, %v2659_v41  ;;  %v3470_v42 = vpack.c.bf16 %v2700_v40, %v2699_v39  ;;  %v2731_v40 = vld [vmem:[%s4904_s19 + $0x3d0] sm:$0xff] }
 0x5ed   :  { %3388 = vmatprep.subr.bf16.mxu0 %v3599_v12 }
 0x5f0   :  { %3390 = vmatpush3.bf16.msra.mxu0 %v3389_v55 }
 0x5f1   :  { %3391 = vmatprep.subr.bf16.mxu0 %v3599_v12 }
 0x5f4   :  { %3393 = vmatpush3.bf16.msra.mxu0 %v3392_v60  ;;  %v2667_v60 = vld [vmem:[%s4904_s19 + $0x260] sm:$0xff] }
 0x5f5   :  { %3394 = vmatprep.subr.bf16.mxu0 %v3599_v12  ;;  %v3440_v5 = vpack.c.bf16 %v2668_v2, %v2667_v60  ;;  %v2676_v60 = vld [vmem:[%s4903_s18 + $0x5] ss:$0 sm:$0xff] }
 0x5f8   :  { %3396 = vmatpush3.bf16.msra.mxu0 %v3395_v8  ;;  %v2680_v8 = vld [vmem:[%s4904_s19 + $0x298] sm:$0xff] }
 0x5f9   :  { %3421 = vmatprep.subr.bf16.mxu0 %v3599_v12 }
 0x6ae   :  { %v1438_v44 = vpop.f32.mrb[4].mxu0 }
 0x6af   :  { %v1439_v45 = vadd.f32 %v2584_v24, %v1438_v44  ;;  %v3002_v46 = vpop.f32.mrb[5].mxu0  ;;  %v2661_v24 = vld [vmem:[%s4904_s19 + $0x230] sm:$0xff]  ;;  %v2662_v44 = vld [vmem:[%s4904_s19 + $0x238] sm:$0xff] }
 0x6b0   :  { %v2663_v46 = vld [vmem:[%s4904_s19 + $0x240] sm:$0xff] }
 0x6b1   :  { %v1442_v47 = vmax.f32 %v1439_v45, 0.0  ;;  %v3431_v45 = vpack.c.bf16 %v2662_v44, %v2661_v24  ;;  %v2692_v24 = vld [vmem:[%s4904_s19 + $0x2f8] sm:$0xff] }
 0x6b3   :  { %v1451_v49 = vmul.f32 %v2586_v33, %v1442_v47  ;;  %v2664_v33 = vld [vmem:[%s4904_s19 + $0x248] sm:$0xff] }
 0x6b4   :  { %v3434_v47 = vpack.c.bf16 %v2664_v33, %v2663_v46  ;;  %v2704_v46 = vld [vmem:[%s4904_s19 + $0x328] sm:$0xff] }
 0x6b5   :  { %v1460_v50 = vadd.f32 %v2588_v48, %v1451_v49  ;;  %v2628_v48 = vld [vmem:[%s4905_s20 + $0x2] ss:$0 sm:$0xff] }
 0x6b7   :  { %v1461_v51 = vmax.f32 %v1460_v50, 0.0 }
 0x6b9   :  { %3036 = vmatmul.mubr.f32.vlgmr.msra.gmra.mrb[4].mxu1 %v1461_v51 }
 0x6ba   :  { %3105 = vmatprep.mubr.msk.f32.mxu1 %vm3598_vm0, %v3597_v30  ;;  %3399 = vmatpush3.bf16.msra.mxu1 %v3398_v61  ;;  %v3437_v61 = vpack.c.bf16 %v2666_v59, %v2665_v58  ;;  %v2674_v58 = vld [vmem:[%s4902_s17 + $0x5] ss:$0 sm:$0xff] }
 0x6bb   :  { %3400 = vmatprep.subr.bf16.mxu1 %v3599_v12 }
 0x6be   :  { %3402 = vmatpush3.bf16.msra.mxu1 %v3401_v4  ;;  %v2679_v4 = vld [vmem:[%s4904_s19 + $0x290] sm:$0xff] }
 0x6bf   :  { %3403 = vmatprep.subr.bf16.mxu1 %v3599_v12  ;;  %v3449_v11 = vpack.c.bf16 %v2680_v8, %v2679_v4  ;;  %v2710_v4 = vld [vmem:[%s4904_s19 + $0x358] sm:$0xff]  ;;  %v2712_v8 = vld [vmem:[%s4904_s19 + $0x368] sm:$0xff] }
 0x6c2   :  { %3405 = vmatpush3.bf16.msra.mxu1 %v3404_v9  ;;  %v2669_v9 = vld [vmem:[%s4904_s19 + $0x270] sm:$0xff] }
 0x6c3   :  { %3406 = vmatprep.subr.bf16.mxu1 %v3599_v12  ;;  %v3443_v17 = vpack.c.bf16 %v2670_v10, %v2669_v9  ;;  %v2721_v9 = vld [vmem:[%s4904_s19 + $0x380] sm:$0xff]  ;;  %v2722_v10 = vld [vmem:[%s4904_s19 + $0x388] sm:$0xff] }
 0x6c6   :  { %3408 = vmatpush3.bf16.msra.mxu1 %v3407_v13  ;;  %v2681_v13 = vld [vmem:[%s4904_s19 + $0x2a0] sm:$0xff] }
 0x6c7   :  { %3409 = vmatprep.subr.bf16.mxu1 %v3599_v12 }
 0x6ca   :  { %3411 = vmatpush3.bf16.msra.mxu1 %v3410_v18  ;;  %v3452_v18 = vpack.c.bf16 %v2682_v16, %v2681_v13  ;;  %v3494_v16 = vpack.c.bf16 %v2722_v10, %v2721_v9  ;;  %v2753_v10 = vld [vmem:[%s4904_s19 + $0x450] sm:$0xff] }
 0x6cb   :  { %3412 = vmatprep.subr.bf16.mxu1 %v3599_v12 }
 0x6ce   :  { %3414 = vmatpush3.bf16.msra.mxu1 %v3413_v31 }
 0x6cf   :  { %3415 = vmatprep.subr.bf16.mxu1 %v3599_v12 }
 0x6d2   :  { %3417 = vmatpush3.bf16.msra.mxu1 %v3416_v36  ;;  %v2689_v36 = vld [vmem:[%s4904_s19 + $0x2e0] sm:$0xff] }
 0x6d3   :  { %3418 = vmatprep.subr.bf16.mxu1 %v3599_v12  ;;  %v3464_v41 = vpack.c.bf16 %v2690_v37, %v2689_v36  ;;  %v2698_v36 = vld [vmem:[%s4903_s18 + $0x6] ss:$0 sm:$0xff] }
 0x6d6   :  { %3420 = vmatpush3.bf16.msra.mxu1 %v3419_v43  ;;  %v2702_v43 = vld [vmem:[%s4904_s19 + $0x318] sm:$0xff] }
 0x6d7   :  { %3445 = vmatprep.subr.bf16.mxu1 %v3599_v12 }
 0x78c   :  { %v1553_v20 = vpop.f32.mrb[4].mxu1 }
 0x78d   :  { %v1554_v21 = vadd.f32 %v2606_v19, %v1553_v20  ;;  %v3037_v62 = vpop.f32.mrb[5].mxu1  ;;  %v2683_v19 = vld [vmem:[%s4904_s19 + $0x2b0] sm:$0xff]  ;;  %v2684_v20 = vld [vmem:[%s4904_s19 + $0x2b8] sm:$0xff] }
 0x78e   :  { %v2685_v62 = vld [vmem:[%s4904_s19 + $0x2c0] sm:$0xff] }
 0x78f   :  { %v1557_v23 = vmax.f32 %v1554_v21, 0.0  ;;  %v3455_v21 = vpack.c.bf16 %v2684_v20, %v2683_v19  ;;  %v2714_v19 = vld [vmem:[%s4904_s19 + $0x378] sm:$0xff] }
 0x791   :  { %v1566_v63 = vmul.f32 %v2608_v22, %v1557_v23  ;;  %v2686_v22 = vld [vmem:[%s4904_s19 + $0x2c8] sm:$0xff] }
 0x792   :  { %v3458_v23 = vpack.c.bf16 %v2686_v22, %v2685_v62  ;;  %v2726_v62 = vld [vmem:[%s4904_s19 + $0x3a8] sm:$0xff] }
 0x793   :  { %v1575_v26 = vadd.f32 %v2610_v25, %v1566_v63  ;;  %v2650_v25 = vld [vmem:[%s4905_s20 + $0x3] ss:$0 sm:$0xff] }
 0x795   :  { %v1576_v27 = vmax.f32 %v1575_v26, 0.0 }
 0x797   :  { %3071 = vmatmul.mubr.f32.vlgmr.msra.gmra.mrb[6].mxu0 %v1576_v27 }
 0x798   :  { %3140 = vmatprep.mubr.msk.f32.mxu0 %vm3598_vm0, %v3597_v30  ;;  %3423 = vmatpush3.bf16.msra.mxu0 %v3422_v7  ;;  %v3461_v7 = vpack.c.bf16 %v2688_v35, %v2687_v34  ;;  %v2696_v34 = vld [vmem:[%s4902_s17 + $0x6] ss:$0 sm:$0xff] }
 0x799   :  { %3424 = vmatprep.subr.bf16.mxu0 %v3599_v12 }
 0x79c   :  { %3426 = vmatpush3.bf16.msra.mxu0 %v3425_v15  ;;  %v2701_v15 = vld [vmem:[%s4904_s19 + $0x310] sm:$0xff] }
 0x79d   :  { %3427 = vmatprep.subr.bf16.mxu0 %v3599_v12  ;;  %v3473_v44 = vpack.c.bf16 %v2702_v43, %v2701_v15  ;;  %v2732_v15 = vld [vmem:[%s4904_s19 + $0x3d8] sm:$0xff]  ;;  %v2734_v43 = vld [vmem:[%s4904_s19 + $0x3e8] sm:$0xff] }
 0x7a0   :  { %3429 = vmatpush3.bf16.msra.mxu0 %v3428_v14  ;;  %v2691_v14 = vld [vmem:[%s4904_s19 + $0x2f0] sm:$0xff] }
 0x7a1   :  { %3430 = vmatprep.subr.bf16.mxu0 %v3599_v12  ;;  %v3467_v33 = vpack.c.bf16 %v2692_v24, %v2691_v14  ;;  %v2743_v14 = vld [vmem:[%s4904_s19 + $0x400] sm:$0xff]  ;;  %v2744_v24 = vld [vmem:[%s4904_s19 + $0x408] sm:$0xff] }
 0x7a4   :  { %3432 = vmatpush3.bf16.msra.mxu0 %v3431_v45  ;;  %v2703_v45 = vld [vmem:[%s4904_s19 + $0x320] sm:$0xff] }
 0x7a5   :  { %3433 = vmatprep.subr.bf16.mxu0 %v3599_v12 }
 0x7a8   :  { %3435 = vmatpush3.bf16.msra.mxu0 %v3434_v47  ;;  %v3476_v47 = vpack.c.bf16 %v2704_v46, %v2703_v45  ;;  %v3518_v46 = vpack.c.bf16 %v2744_v24, %v2743_v14  ;;  %v2740_v14 = vld [vmem:[%s4902_s17 + $0x8] ss:$0 sm:$0xff] }
 0x7a9   :  { %3436 = vmatprep.subr.bf16.mxu0 %v3599_v12 }
 0x7ac   :  { %3438 = vmatpush3.bf16.msra.mxu0 %v3437_v61 }
 0x7ad   :  { %3439 = vmatprep.subr.bf16.mxu0 %v3599_v12 }
 0x7b0   :  { %3441 = vmatpush3.bf16.msra.mxu0 %v3440_v5  ;;  %v2711_v5 = vld [vmem:[%s4904_s19 + $0x360] sm:$0xff] }
 0x7b1   :  { %3442 = vmatprep.subr.bf16.mxu0 %v3599_v12  ;;  %v3488_v13 = vpack.c.bf16 %v2712_v8, %v2711_v5  ;;  %v2720_v5 = vld [vmem:[%s4903_s18 + $0x7] ss:$0 sm:$0xff] }
 0x7b4   :  { %3444 = vmatpush3.bf16.msra.mxu0 %v3443_v17  ;;  %v2724_v17 = vld [vmem:[%s4904_s19 + $0x398] sm:$0xff] }
 0x7b5   :  { %3469 = vmatprep.subr.bf16.mxu0 %v3599_v12 }
 0x86a   :  { %v1668_v49 = vpop.f32.mrb[6].mxu0 }
 0x86b   :  { %v1669_v50 = vadd.f32 %v2628_v48, %v1668_v49  ;;  %v3072_v51 = vpop.f32.mrb[7].mxu0  ;;  %v2705_v48 = vld [vmem:[%s4904_s19 + $0x330] sm:$0xff]  ;;  %v2706_v49 = vld [vmem:[%s4904_s19 + $0x338] sm:$0xff] }
 0x86c   :  { %v2707_v51 = vld [vmem:[%s4904_s19 + $0x340] sm:$0xff] }
 0x86d   :  { %v1672_v53 = vmax.f32 %v1669_v50, 0.0  ;;  %v3479_v50 = vpack.c.bf16 %v2706_v49, %v2705_v48  ;;  %v2736_v48 = vld [vmem:[%s4904_s19 + $0x3f8] sm:$0xff] }
 0x86f   :  { %v1681_v55 = vmul.f32 %v2630_v52, %v1672_v53  ;;  %v2708_v52 = vld [vmem:[%s4904_s19 + $0x348] sm:$0xff] }
 0x870   :  { %v3482_v53 = vpack.c.bf16 %v2708_v52, %v2707_v51  ;;  %v2748_v51 = vld [vmem:[%s4904_s19 + $0x428] sm:$0xff] }
 0x871   :  { %v1690_v56 = vadd.f32 %v2632_v54, %v1681_v55  ;;  %v2672_v54 = vld [vmem:[%s4905_s20 + $0x4] ss:$0 sm:$0xff] }
 0x873   :  { %v1691_v57 = vmax.f32 %v1690_v56, 0.0 }
 0x875   :  { %3106 = vmatmul.mubr.f32.vlgmr.msra.gmra.mrb[6].mxu1 %v1691_v57 }
 0x876   :  { %3175 = vmatprep.mubr.msk.f32.mxu1 %vm3598_vm0, %v3597_v30  ;;  %3447 = vmatpush3.bf16.msra.mxu1 %v3446_v6  ;;  %v3485_v6 = vpack.c.bf16 %v2710_v4, %v2709_v3  ;;  %v2718_v3 = vld [vmem:[%s4902_s17 + $0x7] ss:$0 sm:$0xff] }
 0x877   :  { %3448 = vmatprep.subr.bf16.mxu1 %v3599_v12 }
 0x87a   :  { %3450 = vmatpush3.bf16.msra.mxu1 %v3449_v11  ;;  %v2723_v11 = vld [vmem:[%s4904_s19 + $0x390] sm:$0xff] }
 0x87b   :  { %3451 = vmatprep.subr.bf16.mxu1 %v3599_v12  ;;  %v3497_v20 = vpack.c.bf16 %v2724_v17, %v2723_v11  ;;  %v2754_v11 = vld [vmem:[%s4904_s19 + $0x458] sm:$0xff]  ;;  %v2756_v17 = vld [vmem:[%s4904_s19 + $0x468] sm:$0xff] }
 0x87e   :  { %3453 = vmatpush3.bf16.msra.mxu1 %v3452_v18  ;;  %v2713_v18 = vld [vmem:[%s4904_s19 + $0x370] sm:$0xff] }
 0x87f   :  { %3454 = vmatprep.subr.bf16.mxu1 %v3599_v12  ;;  %v3491_v22 = vpack.c.bf16 %v2714_v19, %v2713_v18  ;;  %v2364_v18 = vld [vmem:[%s4906_s21 + $0x8] sm:$0xff]  ;;  %v2365_v19 = vld [vmem:[%s4906_s21 + $0x10] sm:$0xff] }
 0x882   :  { %3456 = vmatpush3.bf16.msra.mxu1 %v3455_v21  ;;  %v2725_v21 = vld [vmem:[%s4904_s19 + $0x3a0] sm:$0xff] }
 0x883   :  { %3457 = vmatprep.subr.bf16.mxu1 %v3599_v12 }
 0x886   :  { %3459 = vmatpush3.bf16.msra.mxu1 %v3458_v23  ;;  %v3500_v23 = vpack.c.bf16 %v2726_v62, %v2725_v21  ;;  %v2366_v62 = vld [vmem:[%s4906_s21 + $0x18] sm:$0xff] }
 0x887   :  { %3460 = vmatprep.subr.bf16.mxu1 %v3599_v12 }
 0x88a   :  { %3462 = vmatpush3.bf16.msra.mxu1 %v3461_v7 }
 0x88b   :  { %3463 = vmatprep.subr.bf16.mxu1 %v3599_v12 }
 0x88e   :  { %3465 = vmatpush3.bf16.msra.mxu1 %v3464_v41  ;;  %v2733_v41 = vld [vmem:[%s4904_s19 + $0x3e0] sm:$0xff] }
 0x88f   :  { %3466 = vmatprep.subr.bf16.mxu1 %v3599_v12  ;;  %v3512_v45 = vpack.c.bf16 %v2734_v43, %v2733_v41 }
 0x892   :  { %3468 = vmatpush3.bf16.msra.mxu1 %v3467_v33  ;;  %v2746_v33 = vld [vmem:[%s4904_s19 + $0x418] sm:$0xff] }
 0x893   :  { %3493 = vmatprep.subr.bf16.mxu1 %v3599_v12 }
 0x948   :  { %v1783_v63 = vpop.f32.mrb[6].mxu1 }
 0x949   :  { %v1784_v26 = vadd.f32 %v2650_v25, %v1783_v63  ;;  %v3107_v27 = vpop.f32.mrb[7].mxu1  ;;  %v2727_v25 = vld [vmem:[%s4904_s19 + $0x3b0] sm:$0xff]  ;;  %v2728_v63 = vld [vmem:[%s4904_s19 + $0x3b8] sm:$0xff] }
 0x94a   :  { %v2729_v27 = vld [vmem:[%s4904_s19 + $0x3c0] sm:$0xff] }
 0x94b   :  { %v1787_v0 = vmax.f32 %v1784_v26, 0.0  ;;  %v3503_v26 = vpack.c.bf16 %v2728_v63, %v2727_v25  ;;  %v3545_v25 = vpack.c.bf16 %v2366_v62, %v2365_v19  ;;  %v2367_v63 = vld [vmem:[%s4906_s21 + $0x20] sm:$0xff] }
 0x94d   :  { %v1796_v31 = vmul.f32 %v2652_v28, %v1787_v0  ;;  %v2730_v28 = vld [vmem:[%s4904_s19 + $0x3c8] sm:$0xff] }
 0x94e   :  { %v3506_v0 = vpack.c.bf16 %v2730_v28, %v2729_v27 }
 0x94f   :  { %v1805_v32 = vadd.f32 %v2654_v29, %v1796_v31  ;;  %v2694_v29 = vld [vmem:[%s4905_s20 + $0x5] ss:$0 sm:$0xff] }
 0x951   :  { %v1806_v1 = vmax.f32 %v1805_v32, 0.0 }
 0x953   :  { %3141 = vmatmul.mubr.f32.vlgmr.msra.gmra.mrb[8].mxu0 %v1806_v1 }
 0x954   :  { %3210 = vmatprep.mubr.msk.f32.mxu0 %vm3598_vm0, %v3597_v30  ;;  %3471 = vmatpush3.bf16.msra.mxu0 %v3470_v42  ;;  %v3509_v42 = vpack.c.bf16 %v2732_v15, %v2731_v40  ;;  %v2738_v15 = vld [vmem:[%s4905_s20 + $0x7] ss:$0 sm:$0xff] }
 0x955   :  { %3472 = vmatprep.subr.bf16.mxu0 %v3599_v12 }
 0x958   :  { %3474 = vmatpush3.bf16.msra.mxu0 %v3473_v44  ;;  %v2745_v44 = vld [vmem:[%s4904_s19 + $0x410] sm:$0xff] }
 0x959   :  { %3475 = vmatprep.subr.bf16.mxu0 %v3599_v12  ;;  %v3521_v49 = vpack.c.bf16 %v2746_v33, %v2745_v44  ;;  %v2742_v44 = vld [vmem:[%s4903_s18 + $0x8] ss:$0 sm:$0xff] }
 0x95c   :  { %3477 = vmatpush3.bf16.msra.mxu0 %v3476_v47  ;;  %v2735_v47 = vld [vmem:[%s4904_s19 + $0x3f0] sm:$0xff] }
 0x95d   :  { %3478 = vmatprep.subr.bf16.mxu0 %v3599_v12  ;;  %v3515_v52 = vpack.c.bf16 %v2736_v48, %v2735_v47  ;;  %v2378_v47 = vld [vmem:[%s4906_s21 + $0x78] sm:$0xff] }
 0x960   :  { %3480 = vmatpush3.bf16.msra.mxu0 %v3479_v50  ;;  %v2747_v50 = vld [vmem:[%s4904_s19 + $0x420] sm:$0xff] }
 0x961   :  { %3481 = vmatprep.subr.bf16.mxu0 %v3599_v12 }
 0x964   :  { %3483 = vmatpush3.bf16.msra.mxu0 %v3482_v53  ;;  %v3524_v53 = vpack.c.bf16 %v2748_v51, %v2747_v50 }
 0x965   :  { %3484 = vmatprep.subr.bf16.mxu0 %v3599_v12 }
 0x968   :  { %3486 = vmatpush3.bf16.msra.mxu0 %v3485_v6 }
 0x969   :  { %3487 = vmatprep.subr.bf16.mxu0 %v3599_v12 }
 0x96c   :  { %3489 = vmatpush3.bf16.msra.mxu0 %v3488_v13  ;;  %v2755_v13 = vld [vmem:[%s4904_s19 + $0x460] sm:$0xff] }
 0x96d   :  { %3490 = vmatprep.subr.bf16.mxu0 %v3599_v12 }
 0x970   :  { %3492 = vmatpush3.bf16.msra.mxu0 %v3491_v22  ;;  %v2757_v22 = vld [vmem:[%s4904_s19 + $0x470] sm:$0xff] }
 0x971   :  { %3517 = vmatprep.subr.bf16.mxu0 %v3599_v12 }
 0xa26   :  { %v1898_v55 = vpop.f32.mrb[8].mxu0 }
 0xa27   :  { %v1899_v56 = vadd.f32 %v2672_v54, %v1898_v55  ;;  %v3142_v57 = vpop.f32.mrb[9].mxu0  ;;  %v2749_v54 = vld [vmem:[%s4904_s19 + $0x430] sm:$0xff]  ;;  %v2750_v55 = vld [vmem:[%s4904_s19 + $0x438] sm:$0xff] }
 0xa28   :  { %v2751_v57 = vld [vmem:[%s4904_s19 + $0x440] sm:$0xff] }
 0xa29   :  { %v1902_v59 = vmax.f32 %v1899_v56, 0.0  ;;  %v3527_v56 = vpack.c.bf16 %v2750_v55, %v2749_v54  ;;  %v2761_v54 = vld [vmem:[%s4907_s22] ss:$0 sm:$0xff] }
 0xa2b   :  { %v1911_v61 = vmul.f32 %v2674_v58, %v1902_v59  ;;  %v2752_v58 = vld [vmem:[%s4904_s19 + $0x448] sm:$0xff] }
 0xa2c   :  { %v3530_v59 = vpack.c.bf16 %v2752_v58, %v2751_v57 }
 0xa2d   :  { %v1920_v2 = vadd.f32 %v2676_v60, %v1911_v61  ;;  %v2716_v60 = vld [vmem:[%s4905_s20 + $0x6] ss:$0 sm:$0xff] }
 0xa2f   :  { %v1921_v38 = vmax.f32 %v1920_v2, 0.0 }
 0xa31   :  { %3176 = vmatmul.mubr.f32.vlgmr.msra.gmra.mrb[8].mxu1 %v1921_v38 }
 0xa32   :  { %3245 = vmatprep.mubr.msk.f32.mxu1 %vm3598_vm0, %v3597_v30  ;;  %3495 = vmatpush3.bf16.msra.mxu1 %v3494_v16  ;;  %v3533_v16 = vpack.c.bf16 %v2754_v11, %v2753_v10 }
 0xa33   :  { %3496 = vmatprep.subr.bf16.mxu1 %v3599_v12 }
 0xa36   :  { %3498 = vmatpush3.bf16.msra.mxu1 %v3497_v20  ;;  %v3536_v20 = vpack.c.bf16 %v2756_v17, %v2755_v13 }
 0xa37   :  { %3499 = vmatprep.subr.bf16.mxu1 %v3599_v12 }
 0xa3a   :  { %3501 = vmatpush3.bf16.msra.mxu1 %v3500_v23  ;;  %v2758_v23 = vld [vmem:[%s4904_s19 + $0x478] sm:$0xff] }
 0xa3b   :  { %3502 = vmatprep.subr.bf16.mxu1 %v3599_v12  ;;  %v3539_v27 = vpack.c.bf16 %v2758_v23, %v2757_v22 }
 0xa3e   :  { %3504 = vmatpush3.bf16.msra.mxu1 %v3503_v26  ;;  %v2368_v26 = vld [vmem:[%s4906_s21 + $0x28] sm:$0xff] }
 0xa3f   :  { %3505 = vmatprep.subr.bf16.mxu1 %v3599_v12  ;;  %v3548_v28 = vpack.c.bf16 %v2368_v26, %v2367_v63 }
 0xa42   :  { %3507 = vmatpush3.bf16.msra.mxu1 %v3506_v0  ;;  %v2369_v0 = vld [vmem:[%s4906_s21 + $0x30] sm:$0xff] }
 0xa43   :  { %3508 = vmatprep.subr.bf16.mxu1 %v3599_v12 }
 0xa46   :  { %3510 = vmatpush3.bf16.msra.mxu1 %v3509_v42 }
 0xa47   :  { %3511 = vmatprep.subr.bf16.mxu1 %v3599_v12 }
 0xa4a   :  { %3513 = vmatpush3.bf16.msra.mxu1 %v3512_v45 }
 0xa4b   :  { %3514 = vmatprep.subr.bf16.mxu1 %v3599_v12 }
 0xa4e   :  { %3516 = vmatpush3.bf16.msra.mxu1 %v3515_v52 }
 0xa4f   :  { %3541 = vmatprep.subr.bf16.mxu1 %v3599_v12 }
 0xb04   :  { %v2013_v31 = vpop.f32.mrb[8].mxu1 }
 0xb05   :  { %v2014_v32 = vadd.f32 %v2694_v29, %v2013_v31  ;;  %v3177_v1 = vpop.f32.mrb[9].mxu1  ;;  %v2370_v29 = vld [vmem:[%s4906_s21 + $0x38] sm:$0xff] }
 0xb06   :  { %v3551_v31 = vpack.c.bf16 %v2370_v29, %v2369_v0  ;;  %v2372_v1 = vld [vmem:[%s4906_s21 + $0x48] sm:$0xff] }
 0xb07   :  { %v2017_v35 = vmax.f32 %v2014_v32, 0.0  ;;  %v2371_v32 = vld [vmem:[%s4906_s21 + $0x40] sm:$0xff] }
 0xb09   :  { %v2026_v7 = vmul.f32 %v2696_v34, %v2017_v35  ;;  %v3554_v34 = vpack.c.bf16 %v2372_v1, %v2371_v32  ;;  %v2373_v35 = vld [vmem:[%s4906_s21 + $0x50] sm:$0xff] }
 0xb0b   :  { %v2035_v37 = vadd.f32 %v2698_v36, %v2026_v7  ;;  %v2374_v36 = vld [vmem:[%s4906_s21 + $0x58] sm:$0xff] }
 0xb0c   :  { %v3557_v7 = vpack.c.bf16 %v2374_v36, %v2373_v35 }
 0xb0d   :  { %v2036_v39 = vmax.f32 %v2035_v37, 0.0  ;;  %v2375_v37 = vld [vmem:[%s4906_s21 + $0x60] sm:$0xff] }
 0xb0f   :  { %3211 = vmatmul.mubr.f32.vlgmr.msra.gmra.mrb[10].mxu0 %v2036_v39  ;;  %v2376_v39 = vld [vmem:[%s4906_s21 + $0x68] sm:$0xff] }
 0xb10   :  { %3280 = vmatprep.mubr.msk.f32.mxu0 %vm3598_vm0, %v3597_v30  ;;  %3519 = vmatpush3.bf16.msra.mxu0 %v3518_v46  ;;  %v3560_v40 = vpack.c.bf16 %v2376_v39, %v2375_v37 }
 0xb11   :  { %3520 = vmatprep.subr.bf16.mxu0 %v3599_v12 }
 0xb14   :  { %3522 = vmatpush3.bf16.msra.mxu0 %v3521_v49  ;;  %v2760_v49 = vld [vmem:[%s4905_s20 + $0x8] ss:$0 sm:$0xff] }
 0xb15   :  { %3523 = vmatprep.subr.bf16.mxu0 %v3599_v12 }
 0xb18   :  { %3525 = vmatpush3.bf16.msra.mxu0 %v3524_v53 }
 0xb19   :  { %3526 = vmatprep.subr.bf16.mxu0 %v3599_v12 }
 0xb1c   :  { %3528 = vmatpush3.bf16.msra.mxu0 %v3527_v56 }
 0xb1d   :  { %3529 = vmatprep.subr.bf16.mxu0 %v3599_v12 }
 0xb20   :  { %3531 = vmatpush3.bf16.msra.mxu0 %v3530_v59 }
 0xb21   :  { %3532 = vmatprep.subr.bf16.mxu0 %v3599_v12 }
 0xb24   :  { %3534 = vmatpush3.bf16.msra.mxu0 %v3533_v16 }
 0xb25   :  { %3535 = vmatprep.subr.bf16.mxu0 %v3599_v12 }
 0xb28   :  { %3537 = vmatpush3.bf16.msra.mxu0 %v3536_v20 }
 0xb29   :  { %3538 = vmatprep.subr.bf16.mxu0 %v3599_v12 }
 0xb2c   :  { %3540 = vmatpush3.bf16.msra.mxu0 %v3539_v27 }
 0xbe2   :  { %v2128_v61 = vpop.f32.mrb[10].mxu0 }
 0xbe3   :  { %v2129_v2 = vadd.f32 %v2716_v60, %v2128_v61  ;;  %v3212_v38 = vpop.f32.mrb[11].mxu0 }
 0xbe5   :  { %v2132_v4 = vmax.f32 %v2129_v2, 0.0 }
 0xbe7   :  { %v2141_v6 = vmul.f32 %v2718_v3, %v2132_v4 }
 0xbe9   :  { %v2150_v8 = vadd.f32 %v2720_v5, %v2141_v6 }
 0xbeb   :  { %v2151_v9 = vmax.f32 %v2150_v8, 0.0 }
 0xbed   :  { %3246 = vmatmul.mubr.f32.vlgmr.msra.gmra.mrb[10].mxu1 %v2151_v9 }
 0xbee   :  { %3315 = vmatprep.mubr.msk.f32.mxu1 %vm3598_vm0, %v3597_v30  ;;  %v2363_v30 = vld [vmem:[%s4906_s21] sm:$0xff] }
 0xbef   :  { %v3542_v21 = vpack.c.bf16 %v2364_v18, %v2363_v30 }
 0xbf1   :  { %3543 = vmatpush3.bf16.msra.mxu1 %v3542_v21 }
 0xbf2   :  { %3544 = vmatprep.subr.bf16.mxu1 %v3599_v12 }
 0xbf5   :  { %3546 = vmatpush3.bf16.msra.mxu1 %v3545_v25 }
 0xbf6   :  { %3547 = vmatprep.subr.bf16.mxu1 %v3599_v12 }
 0xbf9   :  { %3549 = vmatpush3.bf16.msra.mxu1 %v3548_v28 }
 0xbfa   :  { %3550 = vmatprep.subr.bf16.mxu1 %v3599_v12 }
 0xbfd   :  { %3552 = vmatpush3.bf16.msra.mxu1 %v3551_v31 }
 0xbfe   :  { %3553 = vmatprep.subr.bf16.mxu1 %v3599_v12 }
 0xc01   :  { %3555 = vmatpush3.bf16.msra.mxu1 %v3554_v34 }
 0xc02   :  { %3556 = vmatprep.subr.bf16.mxu1 %v3599_v12 }
 0xc05   :  { %3558 = vmatpush3.bf16.msra.mxu1 %v3557_v7 }
 0xc06   :  { %3559 = vmatprep.subr.bf16.mxu1 %v3599_v12 }
 0xc09   :  { %3561 = vmatpush3.bf16.msra.mxu1 %v3560_v40 }
 0xc0a   :  { %3562 = vmatprep.subr.bf16.mxu1 %v3599_v12  ;;  %v2377_v12 = vld [vmem:[%s4906_s21 + $0x70] sm:$0xff]  ;;  %s3572_s21 = scalar_lea.vmem %s2465_s3, 32 }
 0xc0b   :  { %v3563_v48 = vpack.c.bf16 %v2378_v47, %v2377_v12  ;;  %p3573_p0 = scmp.ne.s32.totalorder %s2465_s3, %s3572_s21  ;;  %p3578_p2 = scmp.lt.s32.totalorder %s3572_s21, %s3572_s21 }
 0xc0d   :  { %3564 = vmatpush3.bf16.msra.mxu1 %v3563_v48  ;;  %p3579_p3 = por %p3578_p2, %p3577_p1 }
 0xc0f   :  { %p3580_p4 = pnand %p3579_p3, %p3573_p0 }
 0xcc0   :  { %v2243_v41 = vpop.f32.mrb[10].mxu1 }
 0xcc1   :  { %v2244_v42 = vadd.f32 %v2738_v15, %v2243_v41  ;;  %v3247_v43 = vpop.f32.mrb[11].mxu1 }
 0xcc3   :  { %v2247_v24 = vmax.f32 %v2244_v42, 0.0 }
 0xcc5   :  { %v2256_v45 = vmul.f32 %v2740_v14, %v2247_v24 }
 0xcc7   :  { %v2265_v46 = vadd.f32 %v2742_v44, %v2256_v45 }
 0xcc9   :  { %v2266_v33 = vmax.f32 %v2265_v46, 0.0 }
 0xccb   :  { %3281 = vmatmul.mubr.f32.vlgmr.msra.gmra.mrb[12].mxu0 %v2266_v33 }
 0xd9e   :  { %v2358_v50 = vpop.f32.mrb[12].mxu0 }
 0xd9f   :  { %v2359_v51 = vadd.f32 %v2760_v49, %v2358_v50  ;;  %v3282_v52 = vpop.f32.mrb[13].mxu0 }
 0xda1   :  { %v2362_v53 = vmax.f32 %v2359_v51, 0.0 }
 0xda3   :  { %3316 = vmatmul.mubr.f32.vlgmr.msra.gmra.mrb[12].mxu1 %v2362_v53 }
 0xe76   :  { %v2452_v55 = vpop.f32.mrb[12].mxu1 }
 0xe77   :  { %v2453_v56 = vadd.f32 %v2761_v54, %v2452_v55  ;;  %v3317_v57 = vpop.f32.mrb[13].mxu1 }
 0xe79   :  { %2457 = vst.msk [vmem:[#allocation2] sm:$0x3] %vm2456_vm12, %v2453_v56 }
 0xe7a   :  { %3583 = shalt.err (!%p3580_p4)
}
 0xe7b   :  { %s3584_s4 = scalar_lea.hbm %s4908_s23, 32 }
 0xe7c   :  { %p3585_p5 = scmp.ne.s32.totalorder %s4908_s23, %s3584_s4  ;;  %p3588_p6 = scmp.lt.u32.totalorder %s3584_s4, %s4908_s23 }
 0xe7e   :  { %p3590_p7 = pnand %p3588_p6, %p3585_p5 }
 0xe80   :  { %3593 = shalt.err (!%p3590_p7)
}
 0xe81   :  { %2467 = dma.vmem_to_hbm [thread:$0]  %s2465_s3, 32, %s4908_s23, [#allocation3]  }
 0xe82   :  { %3594 = dma.done.wait [#allocation3], 32  }
 0xe83   :  { %3595 = vsyncadd [#allocation3], 4294967264 }
 0xe84   :  { %2471 = vsyncpa [#allocation3], 1 }

</bundles_post_ra>
